<compile_context>
chip_gen: v7x
topology: tpu7x:2x2x1
jax: 0.10.0
libtpu: 0.0.40
codegen_flags: <defaults>
</compile_context>

<pallas_src>
import jax
import jax.numpy as jnp
import numpy as np
from jax.experimental import pallas as pl
from jax.experimental.pallas import tpu as pltpu

_VMEM_SPEC = pl.BlockSpec(memory_space=pltpu.MemorySpace.VMEM)


# ------------------- conv + bias + ReLU + 2x2 maxpool kernel ---------------- #

def _conv_pool_relu_kernel(w_ref, x_ref, b_ref, o_ref):
    """o = relu(max_q (w @ x[q]) + b): fused conv GEMM + bias + ReLU + 2x2 pool.

    w_ref: (C_out, K) bf16, x_ref: (4, K, M) bf16 (one slab per pool quadrant),
    b_ref: (C_out, 1) f32, o_ref: (C_out, M) bf16, M = N*Hp*Wp (lane-dense).
    """
    w = w_ref[...]
    y = jnp.dot(w, x_ref[0], preferred_element_type=jnp.float32)
    for q in range(1, 4):                      # static unroll over pool taps
        y = jnp.maximum(y, jnp.dot(w, x_ref[q],
                                   preferred_element_type=jnp.float32))
    y = jnp.maximum(y + b_ref[...], 0.0)
    o_ref[...] = y.astype(o_ref.dtype)


def conv_pool_relu(w, cols, b, out_dtype=jnp.bfloat16):
    """maxpool2x2(relu(conv)) as a single single-block pallas_call.

    w: (C_out, K) bf16, cols: (4, K, M) bf16, b: (C_out, 1) f32 -> (C_out, M).
    """
    c_out, k = w.shape
    q, k2, m = cols.shape
    assert q == 4 and k == k2, (w.shape, cols.shape)
    return pl.pallas_call(
        _conv_pool_relu_kernel,
        out_shape=jax.ShapeDtypeStruct((c_out, m), out_dtype),
        in_specs=[_VMEM_SPEC, _VMEM_SPEC, _VMEM_SPEC],
        out_specs=_VMEM_SPEC,
    )(w, cols, b)


# ------------------------ fused fc1/fc2/fc3 Pallas kernel ------------------- #

def _fc_chain_kernel(f_ref, w1_ref, b1_ref, w2_ref, b2_ref, w3_ref, b3_ref,
                     o_ref):
    # fc1 runs on the MXU in bf16 (weight pre-cast outside jit), f32 accumulate.
    h = jnp.dot(f_ref[...], w1_ref[...], preferred_element_type=jnp.float32)
    h = jnp.maximum(h + b1_ref[...], 0.0)
    h = jnp.dot(h, w2_ref[...], preferred_element_type=jnp.float32)
    h = jnp.maximum(h + b2_ref[...], 0.0)
    z = jnp.dot(h, w3_ref[...], preferred_element_type=jnp.float32) + b3_ref[...]
    # Exact sigmoid (EUP exp + divide); the EUP slot is idle here, so the exact
    # reciprocal is free and keeps the output tight against the f32 reference.
    o_ref[...] = (1.0 / (1.0 + jnp.exp(-z))).astype(o_ref.dtype)


def fc_chain(f, w1, b1, w2, b2, w3, b3):
    """sigmoid(relu(relu(f@w1+b1)@w2+b2)@w3+b3) in a single pallas_call."""
    n = f.shape[0]
    d3 = w3.shape[1]
    return pl.pallas_call(
        _fc_chain_kernel,
        out_shape=jax.ShapeDtypeStruct((n, d3), jnp.float32),
        in_specs=[_VMEM_SPEC] * 7,
        out_specs=_VMEM_SPEC,
    )(f, w1, b1, w2, b2, w3, b3)


# --------------------------------- JAX glue -------------------------------- #

def _im2col_pool_cnhw(x, kh, kw, dilation=1, dtype=jnp.bfloat16):
    """x: (C, N, H, W) -> (cols (4, C*kh*kw, N*Hp*Wp), Hp, Wp).

    The leading axis enumerates the 2x2 max-pool quadrant of every pooled
    output pixel, so the conv kernel can fuse the pool as a max of 4 GEMMs.
    Rows are ordered (c, ky, kx) to match an OIHW weight reshaped to
    (C_out, C_in*kh*kw).  Total bytes == plain im2col (quadrants partition the
    conv output positions); emitted in bf16 to halve the DMA.
    """
    c, n, h, w = x.shape
    ho = h - dilation * (kh - 1)
    wo = w - dilation * (kw - 1)
    hp, wp = ho // 2, wo // 2
    x = x.astype(dtype)
    quads = []
    for dy in range(2):
        for dx in range(2):
            taps = []
            for ky in range(kh):
                for kx in range(kw):
                    y0 = ky * dilation + dy
                    x0 = kx * dilation + dx
                    taps.append(x[:, :, y0:y0 + 2 * hp:2, x0:x0 + 2 * wp:2])
            quad = jnp.stack(taps, axis=1)          # (C, kh*kw, N, Hp, Wp)
            quads.append(quad.reshape(c * kh * kw, n * hp * wp))
    return jnp.stack(quads, axis=0), hp, wp


def net2_forward(x, pp):
    """x: (N, 1, 80, 80) float32, pp: prepare_params(...) -> (N, 36) float32."""
    n = x.shape[0]

    # (C, N, H, W) layout through the conv stack: conv GEMM outputs are then
    # lane-dense and reshape back without a transpose.
    xc = jnp.transpose(x, (1, 0, 2, 3))                       # (1, N, 80, 80)

    # conv1: Conv2d(1, 6, k=5, dilation=2) + ReLU + pool, fused.
    cols1, hp1, wp1 = _im2col_pool_cnhw(xc, 5, 5, dilation=2)  # (4, 25, N*36*36)
    y1 = conv_pool_relu(pp["w1"], cols1, pp["b1"])             # (6, N*36*36) bf16
    y1 = y1.reshape(6, n, hp1, wp1)                            # (6, N, 36, 36)

    # conv2: Conv2d(6, 16, k=5) + ReLU + pool, fused.
    cols2, hp2, wp2 = _im2col_pool_cnhw(y1, 5, 5)              # (4, 150, N*16*16)
    y2 = conv_pool_relu(pp["w2"], cols2, pp["b2"])             # (16, N*256) bf16
    y2 = y2.reshape(16, n, hp2, wp2)                           # (16, N, 16, 16)

    # flatten to torch order (n, c*h*w): one tiny (8 KiB) transpose in glue.
    f = jnp.transpose(y2, (1, 0, 2, 3)).reshape(n, 16 * hp2 * wp2)   # (N, 4096)

    # fc1 -> relu -> fc2 -> relu -> fc3 -> sigmoid fused in one pallas_call.
    return fc_chain(f, pp["fc1_w"], pp["fc1_b"],
                    pp["fc2_w"], pp["fc2_b"],
                    pp["fc3_w"], pp["fc3_b"])


# --------------------- one-time weight prep (outside jit) ------------------- #

def prepare_params(p):
    """Reshape / transpose / cast every weight ONCE, outside the jitted
    forward, so no per-call XLA transpose/cast traffic remains."""
    return {
        "w1": jnp.asarray(p["w1"].reshape(6, 25), jnp.bfloat16),
        "b1": jnp.asarray(p["b1"].reshape(6, 1), jnp.float32),
        "w2": jnp.asarray(p["w2"].reshape(16, 150), jnp.bfloat16),
        "b2": jnp.asarray(p["b2"].reshape(16, 1), jnp.float32),
        "fc1_w": jnp.asarray(p["fc1_w"].T, jnp.bfloat16),        # (4096, 256)
        "fc1_b": jnp.asarray(p["fc1_b"].reshape(1, 256), jnp.float32),
        "fc2_w": jnp.asarray(p["fc2_w"].T, jnp.float32),         # (256, 64)
        "fc2_b": jnp.asarray(p["fc2_b"].reshape(1, 64), jnp.float32),
        "fc3_w": jnp.asarray(p["fc3_w"].T, jnp.float32),         # (64, 36)
        "fc3_b": jnp.asarray(p["fc3_b"].reshape(1, 36), jnp.float32),
    }


# --------------------------- parameters (synthetic) ------------------------ #

def _uniform(key, shape, fan_in):
    k = 1.0 / np.sqrt(fan_in)
    return jax.random.uniform(key, shape, jnp.float32, -k, k)


def init_params(key):
    ks = jax.random.split(key, 10)
    return {
        "w1": _uniform(ks[0], (6, 1, 5, 5), 1 * 5 * 5),
        "b1": _uniform(ks[1], (6,), 1 * 5 * 5),
        "w2": _uniform(ks[2], (16, 6, 5, 5), 6 * 5 * 5),
        "b2": _uniform(ks[3], (16,), 6 * 5 * 5),
        "fc1_w": _uniform(ks[4], (256, 4096), 4096),   # torch Linear: (out, in)
        "fc1_b": _uniform(ks[5], (256,), 4096),
        "fc2_w": _uniform(ks[6], (64, 256), 256),
        "fc2_b": _uniform(ks[7], (64,), 256),
        "fc3_w": _uniform(ks[8], (36, 64), 64),
        "fc3_b": _uniform(ks[9], (36,), 64),
    }


# --------------------------- pure-JAX reference ---------------------------- #

def maxpool2x2(x):
    a, b, h, w = x.shape
    return x.reshape(a, b, h // 2, 2, w // 2, 2).max(axis=(3, 5))


def net2_reference(x, p):
    hp = jax.lax.Precision.HIGHEST
    y = jax.lax.conv_general_dilated(
        x, p["w1"], window_strides=(1, 1), padding="VALID", rhs_dilation=(2, 2),
        dimension_numbers=("NCHW", "OIHW", "NCHW"), precision=hp)
    y = jnp.maximum(y + p["b1"][None, :, None, None], 0.0)
    y = maxpool2x2(y)
    y = jax.lax.conv_general_dilated(
        y, p["w2"], window_strides=(1, 1), padding="VALID",
        dimension_numbers=("NCHW", "OIHW", "NCHW"), precision=hp)
    y = jnp.maximum(y + p["b2"][None, :, None, None], 0.0)
    y = maxpool2x2(y)
    f = y.reshape(y.shape[0], -1)
    h = jnp.maximum(jnp.dot(f, p["fc1_w"].T, precision=hp) + p["fc1_b"], 0.0)
    h = jnp.maximum(jnp.dot(h, p["fc2_w"].T, precision=hp) + p["fc2_b"], 0.0)
    z = jnp.dot(h, p["fc3_w"].T, precision=hp) + p["fc3_b"]
    return 1.0 / (1.0 + jnp.exp(-z))


# ----------------------------------- main ---------------------------------- #

if __name__ == "__main__":
    key = jax.random.PRNGKey(0)
    k_x, k_p = jax.random.split(key)

    # fc1 expects 16*16*16 features => input spatial must be 80x80
    # ((80 - 8) = 72 -> pool 36 -> conv 32 -> pool 16), single input channel.
    x = jax.random.normal(k_x, (2, 1, 80, 80), dtype=jnp.float32)
    params = init_params(k_p)
    prepared = prepare_params(params)          # one-time, outside the jit

    fwd = jax.jit(net2_forward)
    out = jax.block_until_ready(fwd(x, prepared))
    assert out.shape == (2, 36), out.shape

    ref = jax.block_until_ready(net2_reference(x, params))
    out_np, ref_np = np.asarray(out), np.asarray(ref)
    # bf16 conv/fc1 operands (f32 MXU accumulation) give ~1e-4-level error on
    # the final probabilities; 2e-3 keeps comfortable margin.
    if not np.allclose(out_np, ref_np, atol=2e-3, rtol=2e-3):
        raise AssertionError(
            "Pallas NET2 forward mismatch vs reference; max abs diff = "
            f"{np.max(np.abs(out_np - ref_np))}")

    print("KERNEL_OK")
</pallas_src>

<mosaic_0001>
module attributes {stable_mosaic.version = 11 : i64} {
  func.func @_conv_pool_relu_kernel(%arg0: memref<6x25xbf16, #tpu.memory_space<vmem>>, %arg1: memref<4x25x2592xbf16, #tpu.memory_space<vmem>>, %arg2: memref<6x1xf32, #tpu.memory_space<vmem>>, %arg3: memref<6x2592xbf16, #tpu.memory_space<vmem>>) attributes {dimension_semantics = [], scalar_prefetch = 0 : i64, scratch_operands = 0 : i64, tpu.core_type = #tpu.core_type<tc>} {
    %c0 = arith.constant 0 : index
    %c0_0 = arith.constant 0 : index
    %0 = vector.load %arg0[%c0, %c0_0] : memref<6x25xbf16, #tpu.memory_space<vmem>>, vector<6x25xbf16>
    %c0_1 = arith.constant 0 : index
    %c0_2 = arith.constant 0 : index
    %c0_3 = arith.constant 0 : index
    %1 = vector.load %arg1[%c0_1, %c0_2, %c0_3] : memref<4x25x2592xbf16, #tpu.memory_space<vmem>>, vector<1x25x2592xbf16>
    %2 = vector.shape_cast %1 : vector<1x25x2592xbf16> to vector<25x2592xbf16>
    %cst = arith.constant dense<0.000000e+00> : vector<6x2592xf32>
    %3 = tpu.matmul %0, %2, %cst {dimension_numbers = #tpu.dot_dimension_numbers<[1], [0], [0], [1], [0, 0, 1, 1], [], []>} : vector<6x25xbf16>, vector<25x2592xbf16>, vector<6x2592xf32> -> vector<6x2592xf32>
    %c1 = arith.constant 1 : index
    %c0_4 = arith.constant 0 : index
    %c0_5 = arith.constant 0 : index
    %4 = vector.load %arg1[%c1, %c0_4, %c0_5] : memref<4x25x2592xbf16, #tpu.memory_space<vmem>>, vector<1x25x2592xbf16>
    %5 = vector.shape_cast %4 : vector<1x25x2592xbf16> to vector<25x2592xbf16>
    %cst_6 = arith.constant dense<0.000000e+00> : vector<6x2592xf32>
    %6 = tpu.matmul %0, %5, %cst_6 {dimension_numbers = #tpu.dot_dimension_numbers<[1], [0], [0], [1], [0, 0, 1, 1], [], []>} : vector<6x25xbf16>, vector<25x2592xbf16>, vector<6x2592xf32> -> vector<6x2592xf32>
    %7 = arith.maximumf %3, %6 : vector<6x2592xf32>
    %c2 = arith.constant 2 : index
    %c0_7 = arith.constant 0 : index
    %c0_8 = arith.constant 0 : index
    %8 = vector.load %arg1[%c2, %c0_7, %c0_8] : memref<4x25x2592xbf16, #tpu.memory_space<vmem>>, vector<1x25x2592xbf16>
    %9 = vector.shape_cast %8 : vector<1x25x2592xbf16> to vector<25x2592xbf16>
    %cst_9 = arith.constant dense<0.000000e+00> : vector<6x2592xf32>
    %10 = tpu.matmul %0, %9, %cst_9 {dimension_numbers = #tpu.dot_dimension_numbers<[1], [0], [0], [1], [0, 0, 1, 1], [], []>} : vector<6x25xbf16>, vector<25x2592xbf16>, vector<6x2592xf32> -> vector<6x2592xf32>
    %11 = arith.maximumf %7, %10 : vector<6x2592xf32>
    %c3 = arith.constant 3 : index
    %c0_10 = arith.constant 0 : index
    %c0_11 = arith.constant 0 : index
    %12 = vector.load %arg1[%c3, %c0_10, %c0_11] : memref<4x25x2592xbf16, #tpu.memory_space<vmem>>, vector<1x25x2592xbf16>
    %13 = vector.shape_cast %12 : vector<1x25x2592xbf16> to vector<25x2592xbf16>
    %cst_12 = arith.constant dense<0.000000e+00> : vector<6x2592xf32>
    %14 = tpu.matmul %0, %13, %cst_12 {dimension_numbers = #tpu.dot_dimension_numbers<[1], [0], [0], [1], [0, 0, 1, 1], [], []>} : vector<6x25xbf16>, vector<25x2592xbf16>, vector<6x2592xf32> -> vector<6x2592xf32>
    %15 = arith.maximumf %11, %14 : vector<6x2592xf32>
    %c0_13 = arith.constant 0 : index
    %c0_14 = arith.constant 0 : index
    %16 = vector.load %arg2[%c0_13, %c0_14] : memref<6x1xf32, #tpu.memory_space<vmem>>, vector<6x1xf32>
    %17 = vector.broadcast %16 : vector<6x1xf32> to vector<6x2592xf32>
    %18 = arith.addf %15, %17 : vector<6x2592xf32>
    %cst_15 = arith.constant 0.000000e+00 : f32
    %19 = vector.broadcast %cst_15 : f32 to vector<6x2592xf32>
    %20 = arith.maximumf %18, %19 : vector<6x2592xf32>
    %21 = arith.truncf %20 : vector<6x2592xf32> to vector<6x2592xbf16>
    %c0_16 = arith.constant 0 : index
    %c0_17 = arith.constant 0 : index
    %22 = vector.load %arg3[%c0_16, %c0_17] : memref<6x2592xbf16, #tpu.memory_space<vmem>>, vector<6x2592xbf16>
    tpu.vector_store %arg3[%c0_16, %c0_17], %21 {strides = array<i32>} : memref<6x2592xbf16, #tpu.memory_space<vmem>>, vector<6x2592xbf16>,
    return
  }
}

module attributes {stable_mosaic.version = 11 : i64} {
  func.func @_conv_pool_relu_kernel(%arg0: memref<16x150xbf16, #tpu.memory_space<vmem>>, %arg1: memref<4x150x512xbf16, #tpu.memory_space<vmem>>, %arg2: memref<16x1xf32, #tpu.memory_space<vmem>>, %arg3: memref<16x512xbf16, #tpu.memory_space<vmem>>) attributes {dimension_semantics = [], scalar_prefetch = 0 : i64, scratch_operands = 0 : i64, tpu.core_type = #tpu.core_type<tc>} {
    %c0 = arith.constant 0 : index
    %c0_0 = arith.constant 0 : index
    %0 = vector.load %arg0[%c0, %c0_0] : memref<16x150xbf16, #tpu.memory_space<vmem>>, vector<16x150xbf16>
    %c0_1 = arith.constant 0 : index
    %c0_2 = arith.constant 0 : index
    %c0_3 = arith.constant 0 : index
    %1 = vector.load %arg1[%c0_1, %c0_2, %c0_3] : memref<4x150x512xbf16, #tpu.memory_space<vmem>>, vector<1x150x512xbf16>
    %2 = vector.shape_cast %1 : vector<1x150x512xbf16> to vector<150x512xbf16>
    %cst = arith.constant dense<0.000000e+00> : vector<16x512xf32>
    %3 = tpu.matmul %0, %2, %cst {dimension_numbers = #tpu.dot_dimension_numbers<[1], [0], [0], [1], [0, 0, 1, 1], [], []>} : vector<16x150xbf16>, vector<150x512xbf16>, vector<16x512xf32> -> vector<16x512xf32>
    %c1 = arith.constant 1 : index
    %c0_4 = arith.constant 0 : index
    %c0_5 = arith.constant 0 : index
    %4 = vector.load %arg1[%c1, %c0_4, %c0_5] : memref<4x150x512xbf16, #tpu.memory_space<vmem>>, vector<1x150x512xbf16>
    %5 = vector.shape_cast %4 : vector<1x150x512xbf16> to vector<150x512xbf16>
    %cst_6 = arith.constant dense<0.000000e+00> : vector<16x512xf32>
    %6 = tpu.matmul %0, %5, %cst_6 {dimension_numbers = #tpu.dot_dimension_numbers<[1], [0], [0], [1], [0, 0, 1, 1], [], []>} : vector<16x150xbf16>, vector<150x512xbf16>, vector<16x512xf32> -> vector<16x512xf32>
    %7 = arith.maximumf %3, %6 : vector<16x512xf32>
    %c2 = arith.constant 2 : index
    %c0_7 = arith.constant 0 : index
    %c0_8 = arith.constant 0 : index
    %8 = vector.load %arg1[%c2, %c0_7, %c0_8] : memref<4x150x512xbf16, #tpu.memory_space<vmem>>, vector<1x150x512xbf16>
    %9 = vector.shape_cast %8 : vector<1x150x512xbf16> to vector<150x512xbf16>
    %cst_9 = arith.constant dense<0.000000e+00> : vector<16x512xf32>
    %10 = tpu.matmul %0, %9, %cst_9 {dimension_numbers = #tpu.dot_dimension_numbers<[1], [0], [0], [1], [0, 0, 1, 1], [], []>} : vector<16x150xbf16>, vector<150x512xbf16>, vector<16x512xf32> -> vector<16x512xf32>
    %11 = arith.maximumf %7, %10 : vector<16x512xf32>
    %c3 = arith.constant 3 : index
    %c0_10 = arith.constant 0 : index
    %c0_11 = arith.constant 0 : index
    %12 = vector.load %arg1[%c3, %c0_10, %c0_11] : memref<4x150x512xbf16, #tpu.memory_space<vmem>>, vector<1x150x512xbf16>
    %13 = vector.shape_cast %12 : vector<1x150x512xbf16> to vector<150x512xbf16>
    %cst_12 = arith.constant dense<0.000000e+00> : vector<16x512xf32>
    %14 = tpu.matmul %0, %13, %cst_12 {dimension_numbers = #tpu.dot_dimension_numbers<[1], [0], [0], [1], [0, 0, 1, 1], [], []>} : vector<16x150xbf16>, vector<150x512xbf16>, vector<16x512xf32> -> vector<16x512xf32>
    %15 = arith.maximumf %11, %14 : vector<16x512xf32>
    %c0_13 = arith.constant 0 : index
    %c0_14 = arith.constant 0 : index
    %16 = vector.load %arg2[%c0_13, %c0_14] : memref<16x1xf32, #tpu.memory_space<vmem>>, vector<16x1xf32>
    %17 = vector.broadcast %16 : vector<16x1xf32> to vector<16x512xf32>
    %18 = arith.addf %15, %17 : vector<16x512xf32>
    %cst_15 = arith.constant 0.000000e+00 : f32
    %19 = vector.broadcast %cst_15 : f32 to vector<16x512xf32>
    %20 = arith.maximumf %18, %19 : vector<16x512xf32>
    %21 = arith.truncf %20 : vector<16x512xf32> to vector<16x512xbf16>
    %c0_16 = arith.constant 0 : index
    %c0_17 = arith.constant 0 : index
    %22 = vector.load %arg3[%c0_16, %c0_17] : memref<16x512xbf16, #tpu.memory_space<vmem>>, vector<16x512xbf16>
    tpu.vector_store %arg3[%c0_16, %c0_17], %21 {strides = array<i32>} : memref<16x512xbf16, #tpu.memory_space<vmem>>, vector<16x512xbf16>,
    return
  }
}

module attributes {stable_mosaic.version = 11 : i64} {
  func.func @_fc_chain_kernel(%arg0: memref<2x4096xbf16, #tpu.memory_space<vmem>>, %arg1: memref<4096x256xbf16, #tpu.memory_space<vmem>>, %arg2: memref<1x256xf32, #tpu.memory_space<vmem>>, %arg3: memref<256x64xf32, #tpu.memory_space<vmem>>, %arg4: memref<1x64xf32, #tpu.memory_space<vmem>>, %arg5: memref<64x36xf32, #tpu.memory_space<vmem>>, %arg6: memref<1x36xf32, #tpu.memory_space<vmem>>, %arg7: memref<2x36xf32, #tpu.memory_space<vmem>>) attributes {dimension_semantics = [], scalar_prefetch = 0 : i64, scratch_operands = 0 : i64, tpu.core_type = #tpu.core_type<tc>} {
    %c0 = arith.constant 0 : index
    %c0_0 = arith.constant 0 : index
    %0 = vector.load %arg0[%c0, %c0_0] : memref<2x4096xbf16, #tpu.memory_space<vmem>>, vector<2x4096xbf16>
    %c0_1 = arith.constant 0 : index
    %c0_2 = arith.constant 0 : index
    %1 = vector.load %arg1[%c0_1, %c0_2] : memref<4096x256xbf16, #tpu.memory_space<vmem>>, vector<4096x256xbf16>
    %cst = arith.constant dense<0.000000e+00> : vector<2x256xf32>
    %2 = tpu.matmul %0, %1, %cst {dimension_numbers = #tpu.dot_dimension_numbers<[1], [0], [0], [1], [0, 0, 1, 1], [], []>} : vector<2x4096xbf16>, vector<4096x256xbf16>, vector<2x256xf32> -> vector<2x256xf32>
    %c0_3 = arith.constant 0 : index
    %c0_4 = arith.constant 0 : index
    %3 = vector.load %arg2[%c0_3, %c0_4] : memref<1x256xf32, #tpu.memory_space<vmem>>, vector<1x256xf32>
    %4 = vector.broadcast %3 : vector<1x256xf32> to vector<2x256xf32>
    %5 = arith.addf %2, %4 : vector<2x256xf32>
    %cst_5 = arith.constant 0.000000e+00 : f32
    %6 = vector.broadcast %cst_5 : f32 to vector<2x256xf32>
    %7 = arith.maximumf %5, %6 : vector<2x256xf32>
    %c0_6 = arith.constant 0 : index
    %c0_7 = arith.constant 0 : index
    %8 = vector.load %arg3[%c0_6, %c0_7] : memref<256x64xf32, #tpu.memory_space<vmem>>, vector<256x64xf32>
    %cst_8 = arith.constant dense<0.000000e+00> : vector<2x64xf32>
    %9 = tpu.matmul %7, %8, %cst_8 {dimension_numbers = #tpu.dot_dimension_numbers<[1], [0], [0], [1], [0, 0, 1, 1], [], []>} : vector<2x256xf32>, vector<256x64xf32>, vector<2x64xf32> -> vector<2x64xf32>
    %c0_9 = arith.constant 0 : index
    %c0_10 = arith.constant 0 : index
    %10 = vector.load %arg4[%c0_9, %c0_10] : memref<1x64xf32, #tpu.memory_space<vmem>>, vector<1x64xf32>
    %11 = vector.broadcast %10 : vector<1x64xf32> to vector<2x64xf32>
    %12 = arith.addf %9, %11 : vector<2x64xf32>
    %cst_11 = arith.constant 0.000000e+00 : f32
    %13 = vector.broadcast %cst_11 : f32 to vector<2x64xf32>
    %14 = arith.maximumf %12, %13 : vector<2x64xf32>
    %c0_12 = arith.constant 0 : index
    %c0_13 = arith.constant 0 : index
    %15 = vector.load %arg5[%c0_12, %c0_13] : memref<64x36xf32, #tpu.memory_space<vmem>>, vector<64x36xf32>
    %cst_14 = arith.constant dense<0.000000e+00> : vector<2x36xf32>
    %16 = tpu.matmul %14, %15, %cst_14 {dimension_numbers = #tpu.dot_dimension_numbers<[1], [0], [0], [1], [0, 0, 1, 1], [], []>} : vector<2x64xf32>, vector<64x36xf32>, vector<2x36xf32> -> vector<2x36xf32>
    %c0_15 = arith.constant 0 : index
    %c0_16 = arith.constant 0 : index
    %17 = vector.load %arg6[%c0_15, %c0_16] : memref<1x36xf32, #tpu.memory_space<vmem>>, vector<1x36xf32>
    %18 = vector.broadcast %17 : vector<1x36xf32> to vector<2x36xf32>
    %19 = arith.addf %16, %18 : vector<2x36xf32>
    %cst_17 = arith.constant 0.000000e+00 : f32
    %20 = vector.broadcast %cst_17 : f32 to vector<2x36xf32>
    %21 = arith.subf %20, %19 : vector<2x36xf32>
    %22 = math.exp %21 : vector<2x36xf32>
    %cst_18 = arith.constant 1.000000e+00 : f32
    %23 = vector.broadcast %cst_18 : f32 to vector<2x36xf32>
    %24 = arith.addf %23, %22 : vector<2x36xf32>
    %cst_19 = arith.constant 1.000000e+00 : f32
    %25 = vector.broadcast %cst_19 : f32 to vector<2x36xf32>
    %26 = arith.divf %25, %24 : vector<2x36xf32>
    %c0_20 = arith.constant 0 : index
    %c0_21 = arith.constant 0 : index
    %27 = vector.load %arg7[%c0_20, %c0_21] : memref<2x36xf32, #tpu.memory_space<vmem>>, vector<2x36xf32>
    tpu.vector_store %arg7[%c0_20, %c0_21], %26 {strides = array<i32>} : memref<2x36xf32, #tpu.memory_space<vmem>>, vector<2x36xf32>,
    return
  }
}

</mosaic_0001>

<bundles_post_ra>
// kernel: net2_forward.3
= control target key start
LH: loop header
LB: loop body
LE: loop exit
PB: predicated region body
PF: predicated region fallthrough
CT: control target
= control target key end

     0   :  { %vm255_vm0 = vcmask 1043456   ;;  %vm256_vm1 = vcmask 1044480   ;;  %v3895_v1 = vmov 65535   ;;  %v3896_v3 = vmov 0   ;;  %s4945_s1 = inlined_call_operand.vmem [shape: bf16[4,25,2592], index: 1, kind: input, shape index: {}]   ;;  %s4946_s0 = inlined_call_operand.vmem [shape: bf16[6,25], index: 0, kind: input, shape index: {}]   ;;  %s4947_s2 = inlined_call_operand.vmem [shape: f32[6,1], index: 2, kind: input, shape index: {}]   ;;  %s4948_s3 = inlined_call_operand.vmem [shape: bf16[6,2592], index: 3, kind: output, shape index: {}]  }
   0x1   :  { %v3646_v0 = vld [vmem:[%s4945_s1 + $0x4] ss:$84 sps:$4 sm:$0xff]   ;;  %v257_v2 = vsel %vm255_vm0, 4294967295, %v3895_v1  ;;  %354 = vmatprep.mubr.bf16.mxu0 %v3896_v3  ;;  %395 = vmatprep.mubr.bf16.mxu1 %v3896_v3  ;;  %v3648_v4 = vld [vmem:[%s4945_s1 + $0xc] ss:$84 sps:$4 sm:$0xff]   ;;  %vm251_vm2 = vcmask 203776  }
   0x2   :  { %3645 = vset.pattern.permute.xlu0 %v3896_v3  ;;  %322 = vmatprep.subr.bf16.mxu0 %v3646_v0  ;;  %v3650_v5 = vld [vmem:[%s4945_s1] ss:$84 sps:$4 sm:$0xff]   ;;  %v3651_v6 = vld [vmem:[%s4945_s1 + $0x8] ss:$84 sps:$4 sm:$0xff]   ;;  %v3934_v7 = vsel %vm256_vm1, %v257_v2, 0  ;;  %vm3898_vm3 = vmmov 0  }
   0x3   :  { %363 = vmatprep.subr.bf16.mxu1 %v3648_v4  ;;  %v3652_v8 = vld [vmem:[%s4945_s1 + $0xac] ss:$84 sps:$4 sm:$0x1f]   ;;  %323 = vmatpush1.bf16.msra.mxu0 %v3650_v5  ;;  %v3654_v9 = vld [vmem:[%s4945_s1 + $0xb4] ss:$84 sps:$4 sm:$0x1f]  }
   0x4   :  { %364 = vmatpush1.bf16.msra.mxu1 %v3651_v6  ;;  %v263_v10 = vand.u32 %v3652_v8, %v3934_v7  ;;  %v3656_v11 = vld [vmem:[%s4945_s1 + $0xa8] ss:$84 sps:$4 sm:$0x1f]   ;;  %v3657_v12 = vld [vmem:[%s4945_s1 + $0xb0] ss:$84 sps:$4 sm:$0x1f]   ;;  %v269_v13 = vand.u32 %v3654_v9, %v3934_v7 }
   0x5   :  { %v260_v14 = vand.u32 %v3656_v11, %v3934_v7  ;;  %v266_v15 = vand.u32 %v3657_v12, %v3934_v7  ;;  %v3955_v16 = vld [vmem:[%s4946_s0] sm:$0x7]  ;;  %v3658_v17 = vld [vmem:[%s4945_s1 + $0x10] ss:$84 sps:$4 sm:$0xff]   ;;  %v3660_v18 = vld [vmem:[%s4945_s1 + $0x14] ss:$84 sps:$4 sm:$0xff]  }
   0x6   :  { %324 = vmatprep.subr.bf16.mxu0 %v263_v10  ;;  %365 = vmatprep.subr.bf16.mxu1 %v269_v13  ;;  %v3661_v19 = vld [vmem:[%s4945_s1 + $0x18] ss:$84 sps:$4 sm:$0xff]   ;;  %v3663_v20 = vld [vmem:[%s4945_s1 + $0x1c] ss:$84 sps:$4 sm:$0xff]   ;;  %v3670_v31 = vld [vmem:[%s4945_s1 + $0x20] ss:$84 sps:$4 sm:$0xff]  }
   0x7   :  { %325 = vmatpush1.bf16.msra.mxu0 %v260_v14  ;;  %v3664_v21 = vld [vmem:[%s4945_s1 + $0xb8] ss:$84 sps:$4 sm:$0x1f]   ;;  %v3666_v22 = vld [vmem:[%s4945_s1 + $0xbc] ss:$84 sps:$4 sm:$0x1f]  }
   0x8   :  { %366 = vmatpush1.bf16.msra.mxu1 %v266_v15  ;;  %404 = vmatprep.subr.bf16.mxu0 %v3660_v18  ;;  %v3667_v23 = vld [vmem:[%s4945_s1 + $0xc0] ss:$84 sps:$4 sm:$0x1f]   ;;  %v3669_v24 = vld [vmem:[%s4945_s1 + $0xc4] ss:$84 sps:$4 sm:$0x1f]   ;;  %v275_v25 = vand.u32 %v3666_v22, %v3934_v7  ;;  %v272_v27 = vand.u32 %v3664_v21, %v3934_v7 }
   0x9   :  { %445 = vmatprep.subr.bf16.mxu1 %v3663_v20  ;;  %v281_v26 = vand.u32 %v3669_v24, %v3934_v7  ;;  %v278_v28 = vand.u32 %v3667_v23, %v3934_v7  ;;  %v3672_v29 = vld [vmem:[%s4945_s1 + $0x24] ss:$84 sps:$4 sm:$0xff]   ;;  %v3675_v30 = vld [vmem:[%s4945_s1 + $0x2c] ss:$84 sps:$4 sm:$0xff]   ;;  %v3673_v32 = vld [vmem:[%s4945_s1 + $0x28] ss:$84 sps:$4 sm:$0xff]  }
   0xa   :  { %3273 = vmatmul.mubr.msk.bf16.vlgmr.msra.gmra.mrb[0].mxu0 %vm251_vm2, %v3955_v16  ;;  %v3676_v33 = vld [vmem:[%s4945_s1 + $0xc8] ss:$84 sps:$4 sm:$0x1f]   ;;  %v3678_v34 = vld [vmem:[%s4945_s1 + $0xcc] ss:$84 sps:$4 sm:$0x1f]  }
   0xb   :  { %3274 = vmatmul.mubr.msk.bf16.vlgmr.msra.gmra.mrb[0].mxu1 %vm251_vm2, %v3955_v16  ;;  %405 = vmatpush1.bf16.msra.mxu0 %v3658_v17  ;;  %v3679_v35 = vld [vmem:[%s4945_s1 + $0xd0] ss:$84 sps:$4 sm:$0x1f]   ;;  %v3681_v36 = vld [vmem:[%s4945_s1 + $0xd4] ss:$84 sps:$4 sm:$0x1f]   ;;  %v287_v37 = vand.u32 %v3678_v34, %v3934_v7  ;;  %v284_v40 = vand.u32 %v3676_v33, %v3934_v7 }
   0xc   :  { %446 = vmatpush1.bf16.msra.mxu1 %v3661_v19  ;;  %406 = vmatprep.subr.bf16.mxu0 %v275_v25  ;;  %v293_v38 = vand.u32 %v3681_v36, %v3934_v7  ;;  %v3684_v39 = vld [vmem:[%s4945_s1 + $0x34] ss:$84 sps:$4 sm:$0xff]   ;;  %v290_v41 = vand.u32 %v3679_v35, %v3934_v7  ;;  %v3687_v42 = vld [vmem:[%s4945_s1 + $0x3c] ss:$84 sps:$4 sm:$0xff]   ;;  %v3685_v47 = vld [vmem:[%s4945_s1 + $0x38] ss:$84 sps:$4 sm:$0xff]  }
   0xd   :  { %436 = vmatprep.mubr.bf16.mxu0 %v3896_v3  ;;  %447 = vmatprep.subr.bf16.mxu1 %v281_v26  ;;  %v3690_v43 = vld [vmem:[%s4945_s1 + $0xdc] ss:$84 sps:$4 sm:$0x1f]   ;;  %v3693_v44 = vld [vmem:[%s4945_s1 + $0xe4] ss:$84 sps:$4 sm:$0x1f]  }
   0xe   :  { %477 = vmatprep.mubr.bf16.mxu1 %v3896_v3  ;;  %v3682_v45 = vld [vmem:[%s4945_s1 + $0x30] ss:$84 sps:$4 sm:$0xff]   ;;  %v3688_v46 = vld [vmem:[%s4945_s1 + $0xd8] ss:$84 sps:$4 sm:$0x1f]   ;;  %v299_v49 = vand.u32 %v3690_v43, %v3934_v7  ;;  %v305_v50 = vand.u32 %v3693_v44, %v3934_v7  ;;  %v3897_v9 = vmov 0.0  }
   0xf   :  { %407 = vmatpush1.bf16.msra.mxu0 %v272_v27  ;;  %v3691_v48 = vld [vmem:[%s4945_s1 + $0xe0] ss:$84 sps:$4 sm:$0x1f]   ;;  %v296_v52 = vand.u32 %v3688_v46, %v3934_v7  ;;  %v3696_v54 = vld [vmem:[%s4945_s1 + $0x44] ss:$84 sps:$4 sm:$0xff]   ;;  %vm3225_vm4 = vcmask 256000  }
  0x10   :  { %448 = vmatpush1.bf16.msra.mxu1 %v278_v28  ;;  %486 = vmatprep.subr.bf16.mxu0 %v3672_v29  ;;  %v3702_v51 = vld [vmem:[%s4945_s1 + $0xec] ss:$84 sps:$4 sm:$0x1f]   ;;  %v302_v53 = vand.u32 %v3691_v48, %v3934_v7  ;;  %v3705_v55 = vld [vmem:[%s4945_s1 + $0xf4] ss:$84 sps:$4 sm:$0x1f]  }
  0x11   :  { %527 = vmatprep.subr.bf16.mxu1 %v3675_v30  ;;  %v3699_v56 = vld [vmem:[%s4945_s1 + $0x4c] ss:$84 sps:$4 sm:$0xff]   ;;  %v3697_v58 = vld [vmem:[%s4945_s1 + $0x48] ss:$84 sps:$4 sm:$0xff]   ;;  %v311_v61 = vand.u32 %v3702_v51, %v3934_v7  ;;  %v317_v62 = vand.u32 %v3705_v55, %v3934_v7  ;;  %v3706_v4 = vld [vmem:[%s4945_s1 + $0x150] ss:$84 sps:$4 sm:$0xff]  }
  0x12   :  { %3275 = vmatmul.mubr.msk.bf16.vlgmr.msra.gmra.mrb[4].mxu0 %vm251_vm2, %v3955_v16  ;;  %v3694_v57 = vld [vmem:[%s4945_s1 + $0x40] ss:$84 sps:$4 sm:$0xff]   ;;  %v3700_v59 = vld [vmem:[%s4945_s1 + $0xe8] ss:$84 sps:$4 sm:$0x1f]  }
  0x13   :  { %3276 = vmatmul.mubr.msk.bf16.vlgmr.msra.gmra.mrb[4].mxu1 %vm251_vm2, %v3955_v16  ;;  %487 = vmatpush1.bf16.msra.mxu0 %v3670_v31  ;;  %v3703_v60 = vld [vmem:[%s4945_s1 + $0xf0] ss:$84 sps:$4 sm:$0x1f]   ;;  %v308_v63 = vand.u32 %v3700_v59, %v3934_v7  ;;  %v3708_v1 = vld [vmem:[%s4945_s1 + $0x154] ss:$84 sps:$4 sm:$0xff]  }
  0x14   :  { %528 = vmatpush1.bf16.msra.mxu1 %v3673_v32  ;;  %488 = vmatprep.subr.bf16.mxu0 %v287_v37  ;;  %v314_v0 = vand.u32 %v3703_v60, %v3934_v7  ;;  %v3712_v2 = vld [vmem:[%s4945_s1 + $0x1fc] ss:$84 sps:$4 sm:$0x1f]   ;;  %v3710_v5 = vld [vmem:[%s4945_s1 + $0x1f8] ss:$84 sps:$4 sm:$0x1f]  }
  0x15   :  { %529 = vmatprep.subr.bf16.mxu1 %v293_v38  ;;  %518 = vmatprep.mubr.bf16.mxu0 %v3896_v3  ;;  %v3709_v6 = vld [vmem:[%s4945_s1 + $0x50] ss:$84 sps:$4 sm:$0xff]   ;;  %v3713_v8 = vld [vmem:[%s4945_s1 + $0xf8] ss:$84 sps:$4 sm:$0x1f]   ;;  %v1012_v10 = vand.u32 %v3712_v2, %v3934_v7  ;;  %v1009_v13 = vand.u32 %v3710_v5, %v3934_v7 }
  0x16   :  { %559 = vmatprep.mubr.bf16.mxu1 %v3896_v3  ;;  %v3716_v11 = vld [vmem:[%s4945_s1 + $0x15c] ss:$84 sps:$4 sm:$0xff]   ;;  %v320_v12 = vand.u32 %v3713_v8, %v3934_v7  ;;  %v3719_v14 = vld [vmem:[%s4945_s1 + $0x164] ss:$84 sps:$4 sm:$0xff]   ;;  %v3717_v19 = vld [vmem:[%s4945_s1 + $0x160] ss:$84 sps:$4 sm:$0xff]  }
  0x17   :  { %489 = vmatpush1.bf16.msra.mxu0 %v284_v40  ;;  %v3722_v15 = vld [vmem:[%s4945_s1 + $0x204] ss:$84 sps:$4 sm:$0x1f]   ;;  %v3725_v17 = vld [vmem:[%s4945_s1 + $0x20c] ss:$84 sps:$4 sm:$0x1f]  }
  0x18   :  { %530 = vmatpush1.bf16.msra.mxu1 %v290_v41  ;;  %568 = vmatprep.subr.bf16.mxu0 %v3684_v39  ;;  %v3714_v18 = vld [vmem:[%s4945_s1 + $0x158] ss:$84 sps:$4 sm:$0xff]   ;;  %v3720_v20 = vld [vmem:[%s4945_s1 + $0x200] ss:$84 sps:$4 sm:$0x1f]   ;;  %v1018_v22 = vand.u32 %v3722_v15, %v3934_v7  ;;  %v1024_v23 = vand.u32 %v3725_v17, %v3934_v7 }
  0x19   :  { %609 = vmatprep.subr.bf16.mxu1 %v3687_v42  ;;  %v3723_v21 = vld [vmem:[%s4945_s1 + $0x208] ss:$84 sps:$4 sm:$0x1f]   ;;  %v3728_v24 = vld [vmem:[%s4945_s1 + $0x16c] ss:$84 sps:$4 sm:$0xff]   ;;  %v1015_v26 = vand.u32 %v3720_v20, %v3934_v7 }
  0x1a   :  { %3277 = vmatmul.mubr.msk.bf16.vlgmr.msra.gmra.mrb[8].mxu0 %vm251_vm2, %v3955_v16  ;;  %v3731_v25 = vld [vmem:[%s4945_s1 + $0x174] ss:$84 sps:$4 sm:$0xff]   ;;  %v1021_v27 = vand.u32 %v3723_v21, %v3934_v7  ;;  %v3737_v29 = vld [vmem:[%s4945_s1 + $0x21c] ss:$84 sps:$4 sm:$0x1f]  }
  0x1b   :  { %3278 = vmatmul.mubr.msk.bf16.vlgmr.msra.gmra.mrb[8].mxu1 %vm251_vm2, %v3955_v16  ;;  %569 = vmatpush1.bf16.msra.mxu0 %v3682_v45  ;;  %v3734_v28 = vld [vmem:[%s4945_s1 + $0x214] ss:$84 sps:$4 sm:$0x1f]   ;;  %v3732_v31 = vld [vmem:[%s4945_s1 + $0x210] ss:$84 sps:$4 sm:$0x1f]   ;;  %v1036_v35 = vand.u32 %v3737_v29, %v3934_v7 }
  0x1c   :  { %610 = vmatpush1.bf16.msra.mxu1 %v3685_v47  ;;  %570 = vmatprep.subr.bf16.mxu0 %v299_v49  ;;  %v3726_v30 = vld [vmem:[%s4945_s1 + $0x168] ss:$84 sps:$4 sm:$0xff]   ;;  %v3735_v32 = vld [vmem:[%s4945_s1 + $0x218] ss:$84 sps:$4 sm:$0x1f]   ;;  %v1030_v34 = vand.u32 %v3734_v28, %v3934_v7  ;;  %v1027_v37 = vand.u32 %v3732_v31, %v3934_v7 }
  0x1d   :  { %611 = vmatprep.subr.bf16.mxu1 %v305_v50  ;;  %600 = vmatprep.mubr.bf16.mxu0 %v3896_v3  ;;  %v3729_v33 = vld [vmem:[%s4945_s1 + $0x170] ss:$84 sps:$4 sm:$0xff]   ;;  %v1033_v38 = vand.u32 %v3735_v32, %v3934_v7  ;;  %v3749_v41 = vld [vmem:[%s4945_s1 + $0x22c] ss:$84 sps:$4 sm:$0x1f]  }
  0x1e   :  { %641 = vmatprep.mubr.bf16.mxu1 %v3896_v3  ;;  %v3740_v36 = vld [vmem:[%s4945_s1 + $0x17c] ss:$84 sps:$4 sm:$0xff]   ;;  %v3743_v39 = vld [vmem:[%s4945_s1 + $0x184] ss:$84 sps:$4 sm:$0xff]   ;;  %v3741_v43 = vld [vmem:[%s4945_s1 + $0x180] ss:$84 sps:$4 sm:$0xff]   ;;  %v1048_v47 = vand.u32 %v3749_v41, %v3934_v7 }
  0x1f   :  { %571 = vmatpush1.bf16.msra.mxu0 %v296_v52  ;;  %v3746_v40 = vld [vmem:[%s4945_s1 + $0x224] ss:$84 sps:$4 sm:$0x1f]   ;;  %v3744_v44 = vld [vmem:[%s4945_s1 + $0x220] ss:$84 sps:$4 sm:$0x1f]  }
  0x20   :  { %612 = vmatpush1.bf16.msra.mxu1 %v302_v53  ;;  %650 = vmatprep.subr.bf16.mxu0 %v3696_v54  ;;  %v3738_v42 = vld [vmem:[%s4945_s1 + $0x178] ss:$84 sps:$4 sm:$0xff]   ;;  %v3747_v45 = vld [vmem:[%s4945_s1 + $0x228] ss:$84 sps:$4 sm:$0x1f]   ;;  %v1042_v46 = vand.u32 %v3746_v40, %v3934_v7  ;;  %v1039_v49 = vand.u32 %v3744_v44, %v3934_v7 }
  0x21   :  { %691 = vmatprep.subr.bf16.mxu1 %v3699_v56  ;;  %v3752_v48 = vld [vmem:[%s4945_s1 + $0x18c] ss:$84 sps:$4 sm:$0xff]   ;;  %v1045_v50 = vand.u32 %v3747_v45, %v3934_v7  ;;  %v3755_v51 = vld [vmem:[%s4945_s1 + $0x194] ss:$84 sps:$4 sm:$0xff]   ;;  %v3753_v56 = vld [vmem:[%s4945_s1 + $0x190] ss:$84 sps:$4 sm:$0xff]  }
  0x22   :  { %3279 = vmatmul.mubr.msk.bf16.vlgmr.msra.gmra.mrb[12].mxu0 %vm251_vm2, %v3955_v16  ;;  %v3758_v52 = vld [vmem:[%s4945_s1 + $0x234] ss:$84 sps:$4 sm:$0x1f]   ;;  %v3761_v53 = vld [vmem:[%s4945_s1 + $0x23c] ss:$84 sps:$4 sm:$0x1f]  }
  0x23   :  { %3280 = vmatmul.mubr.msk.bf16.vlgmr.msra.gmra.mrb[12].mxu1 %vm251_vm2, %v3955_v16  ;;  %651 = vmatpush1.bf16.msra.mxu0 %v3694_v57  ;;  %v3750_v54 = vld [vmem:[%s4945_s1 + $0x188] ss:$84 sps:$4 sm:$0xff]   ;;  %v3756_v55 = vld [vmem:[%s4945_s1 + $0x230] ss:$84 sps:$4 sm:$0x1f]   ;;  %v1060_v59 = vand.u32 %v3761_v53, %v3934_v7 }
  0x24   :  { %692 = vmatpush1.bf16.msra.mxu1 %v3697_v58  ;;  %652 = vmatprep.subr.bf16.mxu0 %v311_v61  ;;  %v3759_v57 = vld [vmem:[%s4945_s1 + $0x238] ss:$84 sps:$4 sm:$0x1f]   ;;  %v1054_v58 = vand.u32 %v3758_v52, %v3934_v7  ;;  %v1051_v60 = vand.u32 %v3756_v55, %v3934_v7  ;;  %v3766_v2 = vld [vmem:[%s4945_s1 + $0x240] ss:$84 sps:$4 sm:$0x1f]  }
  0x25   :  { %693 = vmatprep.subr.bf16.mxu1 %v317_v62  ;;  %682 = vmatprep.mubr.bf16.mxu0 %v3896_v3  ;;  %v1057_v61 = vand.u32 %v3759_v57, %v3934_v7  ;;  %v3764_v62 = vld [vmem:[%s4945_s1 + $0x19c] ss:$84 sps:$4 sm:$0xff]   ;;  %v3775_v8 = vld [vmem:[%s4945_s1 + $0x2ac] ss:$84 sps:$4 sm:$0xff]   ;;  %v3784_v21 = vld [vmem:[%s4945_s1 + $0x2b4] ss:$84 sps:$4 sm:$0xff]  }
  0x26   :  { %723 = vmatprep.mubr.bf16.mxu1 %v3896_v3  ;;  %v3773_v15 = vld [vmem:[%s4945_s1 + $0x2a8] ss:$84 sps:$4 sm:$0xff]   ;;  %v3785_v28 = vld [vmem:[%s4945_s1 + $0x2b8] ss:$84 sps:$4 sm:$0xff]  }
  0x27   :  { %653 = vmatpush1.bf16.msra.mxu0 %v308_v63  ;;  %v3768_v63 = vld [vmem:[%s4945_s1 + $0x244] ss:$84 sps:$4 sm:$0x1f]   ;;  %v3776_v17 = vld [vmem:[%s4945_s1 + $0x348] ss:$84 sps:$4 sm:$0x1f]  }
  0x28   :  { %694 = vmatpush1.bf16.msra.mxu1 %v314_v0  ;;  %3609 = vmatprep.subr.bf16.mxu0 %v3897_v9  ;;  %v3762_v0 = vld [vmem:[%s4945_s1 + $0x198] ss:$84 sps:$4 sm:$0xff]   ;;  %v1066_v5 = vand.u32 %v3768_v63, %v3934_v7  ;;  %v3797_v40 = vld [vmem:[%s4945_s1 + $0x2c8] ss:$84 sps:$4 sm:$0xff]  }
  0x29   :  { %1071 = vmatprep.subr.bf16.mxu1 %v3708_v1  ;;  %v3765_v1 = vld [vmem:[%s4945_s1 + $0x1a0] ss:$84 sps:$4 sm:$0xff]   ;;  %v3788_v29 = vld [vmem:[%s4945_s1 + $0x358] ss:$84 sps:$4 sm:$0x1f]  }
  0x2a   :  { %3281 = vmatmul.mubr.msk.bf16.vlgmr.msra.gmra.mrb[16].mxu0 %vm251_vm2, %v3955_v16  ;;  %v3800_v41 = vld [vmem:[%s4945_s1 + $0x368] ss:$84 sps:$4 sm:$0x1f]   ;;  %v3812_v52 = vld [vmem:[%s4945_s1 + $0x378] ss:$84 sps:$4 sm:$0x1f]  }
  0x2b   :  { %3282 = vmatmul.mubr.msk.bf16.vlgmr.msra.gmra.mrb[16].mxu1 %vm251_vm2, %v3955_v16  ;;  %3610 = vmatpush3.bf16.msra.mxu0 %v3709_v6  ;;  %v3772_v6 = vld [vmem:[%s4945_s1 + $0x2a4] ss:$84 sps:$4 sm:$0xff]   ;;  %v3808_v45 = vld [vmem:[%s4945_s1 + $0x2d4] ss:$84 sps:$4 sm:$0xff]  }
  0x2c   :  { %1072 = vmatpush1.bf16.msra.mxu1 %v3706_v4  ;;  %3611 = vmatprep.subr.bf16.mxu0 %v3897_v9  ;;  %v3769_v4 = vld [vmem:[%s4945_s1 + $0x248] ss:$84 sps:$4 sm:$0x1f]   ;;  %v3809_v53 = vld [vmem:[%s4945_s1 + $0x2d8] ss:$84 sps:$4 sm:$0xff]  }
  0x2d   :  { %1073 = vmatprep.subr.bf16.mxu1 %v1012_v10  ;;  %3613 = vmatprep.mubr.msk.bf16.mxu0 %vm3898_vm3, %v3897_v9  ;;  %v1063_v10 = vand.u32 %v3766_v2, %v3934_v7  ;;  %v3826_v57 = vld [vmem:[%s4945_s1 + $0x38c] ss:$84 sps:$4 sm:$0x1f]   ;;  %v3821_v63 = vld [vmem:[%s4945_s1 + $0x2e8] ss:$84 sps:$4 sm:$0xff]  }
  0x2e   :  { %1103 = vmatprep.mubr.bf16.mxu1 %v3896_v3  ;;  %v1830_v2 = vand.u32 %v3826_v57, %v3934_v7  ;;  %v3876_v57 = vld [vmem:[%s4945_s1 + $0x42c] ss:$84 sps:$4 sm:$0xff]  }
  0x2f   :  { %3612 = vmatpush3.bf16.msra.mxu0 %v320_v12  ;;  %v3778_v12 = vld [vmem:[%s4945_s1 + $0x34c] ss:$84 sps:$4 sm:$0x1f]  }
  0x30   :  { %1074 = vmatpush1.bf16.msra.mxu1 %v1009_v13  ;;  %1112 = vmatprep.subr.bf16.mxu0 %v3716_v11  ;;  %v1069_v11 = vand.u32 %v3769_v4, %v3934_v7  ;;  %v3781_v13 = vld [vmem:[%s4945_s1 + $0x354] ss:$84 sps:$4 sm:$0x1f]  }
  0x31   :  { %1153 = vmatprep.subr.bf16.mxu1 %v3719_v14  ;;  %v3770_v14 = vld [vmem:[%s4945_s1 + $0x2a0] ss:$84 sps:$4 sm:$0xff]   ;;  %v1788_v20 = vand.u32 %v3781_v13, %v3934_v7  ;;  %v3830_v13 = vld [vmem:[%s4945_s1 + $0x3f0] ss:$84 sps:$4 sm:$0xff]  }
  0x32   :  { %3614 = vmatmul.mubr.msk.bf16.vlgmr.msra.gmra.mrb[20].mxu0 %vm251_vm2, %v3955_v16 }
  0x33   :  { %3370 = vmatmul.mubr.msk.bf16.vlgmr.msra.gmra.mrb[20].mxu1 %vm251_vm2, %v3955_v16  ;;  %1113 = vmatpush1.bf16.msra.mxu0 %v3714_v18  ;;  %v3779_v18 = vld [vmem:[%s4945_s1 + $0x350] ss:$84 sps:$4 sm:$0x1f]  }
  0x34   :  { %1154 = vmatpush1.bf16.msra.mxu1 %v3717_v19  ;;  %1114 = vmatprep.subr.bf16.mxu0 %v1018_v22  ;;  %v1782_v19 = vand.u32 %v3778_v12, %v3934_v7  ;;  %v3787_v22 = vld [vmem:[%s4945_s1 + $0x2bc] ss:$84 sps:$4 sm:$0xff]  }
  0x35   :  { %1155 = vmatprep.subr.bf16.mxu1 %v1024_v23  ;;  %1144 = vmatprep.mubr.bf16.mxu0 %v3896_v3  ;;  %v1779_v23 = vand.u32 %v3776_v17, %v3934_v7  ;;  %v3836_v12 = vld [vmem:[%s4945_s1 + $0x49c] ss:$84 sps:$4 sm:$0x1f]   ;;  %v3837_v17 = vld [vmem:[%s4945_s1 + $0x398] ss:$84 sps:$4 sm:$0x1f]  }
  0x36   :  { %1185 = vmatprep.mubr.bf16.mxu1 %v3896_v3 }
  0x37   :  { %1115 = vmatpush1.bf16.msra.mxu0 %v1015_v26  ;;  %v3793_v26 = vld [vmem:[%s4945_s1 + $0x364] ss:$84 sps:$4 sm:$0x1f]  }
  0x38   :  { %1156 = vmatpush1.bf16.msra.mxu1 %v1021_v27  ;;  %1194 = vmatprep.subr.bf16.mxu0 %v3728_v24  ;;  %v1785_v24 = vand.u32 %v3779_v18, %v3934_v7  ;;  %v3782_v27 = vld [vmem:[%s4945_s1 + $0x2b0] ss:$84 sps:$4 sm:$0xff]   ;;  %v1800_v32 = vand.u32 %v3793_v26, %v3934_v7  ;;  %v2552_v18 = vand.u32 %v3836_v12, %v3934_v7  ;;  %v3841_v26 = vld [vmem:[%s4945_s1 + $0x400] ss:$84 sps:$4 sm:$0xff]  }
  0x39   :  { %1235 = vmatprep.subr.bf16.mxu1 %v3731_v25  ;;  %v3790_v25 = vld [vmem:[%s4945_s1 + $0x35c] ss:$84 sps:$4 sm:$0x1f]   ;;  %v3890_v12 = vld [vmem:[%s4945_s1 + $0x4e0] ss:$84 sps:$4 sm:$0x1f]  }
  0x3a   :  { %3371 = vmatmul.mubr.msk.bf16.vlgmr.msra.gmra.mrb[24].mxu0 %vm251_vm2, %v3955_v16  ;;  %v1794_v31 = vand.u32 %v3790_v25, %v3934_v7  ;;  %v3838_v25 = vld [vmem:[%s4945_s1 + $0x3f8] ss:$84 sps:$4 sm:$0xff]  }
  0x3b   :  { %3372 = vmatmul.mubr.msk.bf16.vlgmr.msra.gmra.mrb[24].mxu1 %vm251_vm2, %v3955_v16  ;;  %1195 = vmatpush1.bf16.msra.mxu0 %v3726_v30  ;;  %v3791_v30 = vld [vmem:[%s4945_s1 + $0x360] ss:$84 sps:$4 sm:$0x1f]  }
  0x3c   :  { %1236 = vmatpush1.bf16.msra.mxu1 %v3729_v33  ;;  %1196 = vmatprep.subr.bf16.mxu0 %v1030_v34  ;;  %v3796_v33 = vld [vmem:[%s4945_s1 + $0x2c4] ss:$84 sps:$4 sm:$0xff]   ;;  %v3799_v34 = vld [vmem:[%s4945_s1 + $0x2cc] ss:$84 sps:$4 sm:$0xff]  }
  0x3d   :  { %1237 = vmatprep.subr.bf16.mxu1 %v1036_v35  ;;  %1226 = vmatprep.mubr.bf16.mxu0 %v3896_v3  ;;  %v1791_v35 = vand.u32 %v3788_v29, %v3934_v7 }
  0x3e   :  { %1267 = vmatprep.mubr.bf16.mxu1 %v3896_v3 }
  0x3f   :  { %1197 = vmatpush1.bf16.msra.mxu0 %v1027_v37  ;;  %v3802_v37 = vld [vmem:[%s4945_s1 + $0x36c] ss:$84 sps:$4 sm:$0x1f]  }
  0x40   :  { %1238 = vmatpush1.bf16.msra.mxu1 %v1033_v38  ;;  %1276 = vmatprep.subr.bf16.mxu0 %v3740_v36  ;;  %v1797_v36 = vand.u32 %v3791_v30, %v3934_v7  ;;  %v3805_v38 = vld [vmem:[%s4945_s1 + $0x374] ss:$84 sps:$4 sm:$0x1f]  }
  0x41   :  { %1317 = vmatprep.subr.bf16.mxu1 %v3743_v39  ;;  %v3794_v39 = vld [vmem:[%s4945_s1 + $0x2c0] ss:$84 sps:$4 sm:$0xff]   ;;  %v1812_v44 = vand.u32 %v3805_v38, %v3934_v7  ;;  %v3853_v38 = vld [vmem:[%s4945_s1 + $0x410] ss:$84 sps:$4 sm:$0xff]  }
  0x42   :  { %3373 = vmatmul.mubr.msk.bf16.vlgmr.msra.gmra.mrb[28].mxu0 %vm251_vm2, %v3955_v16 }
  0x43   :  { %3374 = vmatmul.mubr.msk.bf16.vlgmr.msra.gmra.mrb[28].mxu1 %vm251_vm2, %v3955_v16  ;;  %1277 = vmatpush1.bf16.msra.mxu0 %v3738_v42  ;;  %v3803_v42 = vld [vmem:[%s4945_s1 + $0x370] ss:$84 sps:$4 sm:$0x1f]  }
  0x44   :  { %1318 = vmatpush1.bf16.msra.mxu1 %v3741_v43  ;;  %1278 = vmatprep.subr.bf16.mxu0 %v1042_v46  ;;  %v1806_v43 = vand.u32 %v3802_v37, %v3934_v7  ;;  %v1803_v46 = vand.u32 %v3800_v41, %v3934_v7  ;;  %v3850_v37 = vld [vmem:[%s4945_s1 + $0x408] ss:$84 sps:$4 sm:$0xff]  }
  0x45   :  { %1319 = vmatprep.subr.bf16.mxu1 %v1048_v47  ;;  %1308 = vmatprep.mubr.bf16.mxu0 %v3896_v3  ;;  %v1809_v47 = vand.u32 %v3803_v42, %v3934_v7 }
  0x46   :  { %1349 = vmatprep.mubr.bf16.mxu1 %v3896_v3 }
  0x47   :  { %1279 = vmatpush1.bf16.msra.mxu0 %v1039_v49  ;;  %v3814_v49 = vld [vmem:[%s4945_s1 + $0x37c] ss:$84 sps:$4 sm:$0x1f]  }
  0x48   :  { %1320 = vmatpush1.bf16.msra.mxu1 %v1045_v50  ;;  %1358 = vmatprep.subr.bf16.mxu0 %v3752_v48  ;;  %v3811_v48 = vld [vmem:[%s4945_s1 + $0x2dc] ss:$84 sps:$4 sm:$0xff]   ;;  %v3817_v50 = vld [vmem:[%s4945_s1 + $0x384] ss:$84 sps:$4 sm:$0x1f]   ;;  %v1818_v55 = vand.u32 %v3814_v49, %v3934_v7 }
  0x49   :  { %1399 = vmatprep.subr.bf16.mxu1 %v3755_v51  ;;  %v3806_v51 = vld [vmem:[%s4945_s1 + $0x2d0] ss:$84 sps:$4 sm:$0xff]   ;;  %v3862_v49 = vld [vmem:[%s4945_s1 + $0x418] ss:$84 sps:$4 sm:$0xff]  }
  0x4a   :  { %3375 = vmatmul.mubr.msk.bf16.vlgmr.msra.gmra.mrb[32].mxu0 %vm251_vm2, %v3955_v16 }
  0x4b   :  { %3376 = vmatmul.mubr.msk.bf16.vlgmr.msra.gmra.mrb[32].mxu1 %vm251_vm2, %v3955_v16  ;;  %1359 = vmatpush1.bf16.msra.mxu0 %v3750_v54  ;;  %v3815_v54 = vld [vmem:[%s4945_s1 + $0x380] ss:$84 sps:$4 sm:$0x1f]  }
  0x4c   :  { %1400 = vmatpush1.bf16.msra.mxu1 %v3753_v56  ;;  %1360 = vmatprep.subr.bf16.mxu0 %v1054_v58  ;;  %v1824_v56 = vand.u32 %v3817_v50, %v3934_v7  ;;  %v1815_v58 = vand.u32 %v3812_v52, %v3934_v7  ;;  %v3865_v50 = vld [vmem:[%s4945_s1 + $0x420] ss:$84 sps:$4 sm:$0xff]   ;;  %v3871_v52 = vld [vmem:[%s4945_s1 + $0x4c8] ss:$84 sps:$4 sm:$0x1f]  }
  0x4d   :  { %1401 = vmatprep.subr.bf16.mxu1 %v1060_v59  ;;  %1390 = vmatprep.mubr.bf16.mxu0 %v3896_v3  ;;  %v1821_v59 = vand.u32 %v3815_v54, %v3934_v7 }
  0x4e   :  { %1431 = vmatprep.mubr.bf16.mxu1 %v3896_v3 }
  0x4f   :  { %1361 = vmatpush1.bf16.msra.mxu0 %v1051_v60  ;;  %v3820_v60 = vld [vmem:[%s4945_s1 + $0x2e4] ss:$84 sps:$4 sm:$0xff]  }
  0x50   :  { %1402 = vmatpush1.bf16.msra.mxu1 %v1057_v61  ;;  %1440 = vmatprep.subr.bf16.mxu0 %v3764_v62  ;;  %v3829_v61 = vld [vmem:[%s4945_s1 + $0x394] ss:$84 sps:$4 sm:$0x1f]  }
  0x51   :  { %3617 = vmatprep.subr.bf16.mxu1 %v3897_v9  ;;  %v3818_v62 = vld [vmem:[%s4945_s1 + $0x2e0] ss:$84 sps:$4 sm:$0xff]   ;;  %v1836_v4 = vand.u32 %v3829_v61, %v3934_v7  ;;  %v3874_v61 = vld [vmem:[%s4945_s1 + $0x428] ss:$84 sps:$4 sm:$0xff]  }
  0x52   :  { %3377 = vmatmul.mubr.msk.bf16.vlgmr.msra.gmra.mrb[36].mxu0 %vm251_vm2, %v3955_v16 }
  0x53   :  { %3378 = vmatmul.mubr.msk.bf16.vlgmr.msra.gmra.mrb[36].mxu1 %vm251_vm2, %v3955_v16  ;;  %1441 = vmatpush1.bf16.msra.mxu0 %v3762_v0  ;;  %v3824_v0 = vld [vmem:[%s4945_s1 + $0x388] ss:$84 sps:$4 sm:$0x1f]  }
  0x54   :  { %3618 = vmatpush3.bf16.msra.mxu1 %v3765_v1  ;;  %1442 = vmatprep.subr.bf16.mxu0 %v1066_v5  ;;  %v3827_v1 = vld [vmem:[%s4945_s1 + $0x390] ss:$84 sps:$4 sm:$0x1f]  }
  0x55   :  { %3619 = vmatprep.subr.bf16.mxu1 %v3897_v9  ;;  %1472 = vmatprep.mubr.bf16.mxu0 %v3896_v3  ;;  %v3082_v5 = vld [vmem:[%s4947_s2] sm:$0x3f] }
  0x56   :  { %3621 = vmatprep.mubr.msk.bf16.mxu1 %vm3898_vm3, %v3897_v9  ;;  %3085 = vperm.xlu0 %3645, %v3082_v5   ;;  %v3888_v5 = vld [vmem:[%s4945_s1 + $0x43c] ss:$84 sps:$4 sm:$0xff]  }
  0x57   :  { %1443 = vmatpush1.bf16.msra.mxu0 %v1063_v10  ;;  %v1833_v10 = vand.u32 %v3827_v1, %v3934_v7 }
  0x58   :  { %3620 = vmatpush3.bf16.msra.mxu1 %v1069_v11  ;;  %1841 = vmatprep.subr.bf16.mxu0 %v3772_v6  ;;  %v4457_v6 = vld [vmem:[%s4946_s0] sm:$0x7]  ;;  %v3832_v11 = vld [vmem:[%s4945_s1 + $0x3f4] ss:$84 sps:$4 sm:$0xff]  }
  0x59   :  { %1882 = vmatprep.subr.bf16.mxu1 %v3775_v8  ;;  %v1827_v8 = vand.u32 %v3824_v0, %v3934_v7 }
  0x5a   :  { %3379 = vmatmul.mubr.msk.bf16.vlgmr.msra.gmra.mrb[40].mxu0 %vm251_vm2, %v3955_v16 }
  0x5b   :  { %3622 = vmatmul.mubr.msk.bf16.vlgmr.msra.gmra.mrb[40].mxu1 %vm251_vm2, %v3955_v16  ;;  %1842 = vmatpush1.bf16.msra.mxu0 %v3770_v14  ;;  %v3833_v14 = vld [vmem:[%s4945_s1 + $0x2f0] ss:$84 sps:$4 sm:$0xff]  }
  0x5c   :  { %1883 = vmatpush1.bf16.msra.mxu1 %v3773_v15  ;;  %1843 = vmatprep.subr.bf16.mxu0 %v1782_v19  ;;  %v3834_v15 = vld [vmem:[%s4945_s1 + $0x498] ss:$84 sps:$4 sm:$0x1f]   ;;  %v1839_v19 = vand.u32 %v3837_v17, %v3934_v7 }
  0x5d   :  { %1884 = vmatprep.subr.bf16.mxu1 %v1788_v20  ;;  %1873 = vmatprep.mubr.bf16.mxu0 %v3896_v3  ;;  %v2549_v20 = vand.u32 %v3834_v15, %v3934_v7  ;;  %v2603_v15 = vand.u32 %v3890_v12, %v3934_v7 }
  0x5e   :  { %1914 = vmatprep.mubr.bf16.mxu1 %v3896_v3 }
  0x5f   :  { %1844 = vmatpush1.bf16.msra.mxu0 %v1779_v23  ;;  %v3846_v23 = vld [vmem:[%s4945_s1 + $0x4a4] ss:$84 sps:$4 sm:$0x1f]  }
  0x60   :  { %1885 = vmatpush1.bf16.msra.mxu1 %v1785_v24  ;;  %1923 = vmatprep.subr.bf16.mxu0 %v3784_v21  ;;  %v3840_v21 = vld [vmem:[%s4945_s1 + $0x3fc] ss:$84 sps:$4 sm:$0xff]   ;;  %v3849_v24 = vld [vmem:[%s4945_s1 + $0x4ac] ss:$84 sps:$4 sm:$0x1f]   ;;  %v2558_v29 = vand.u32 %v3846_v23, %v3934_v7 }
  0x61   :  { %1964 = vmatprep.subr.bf16.mxu1 %v3787_v22  ;;  %v3843_v22 = vld [vmem:[%s4945_s1 + $0x404] ss:$84 sps:$4 sm:$0xff]   ;;  %v2564_v30 = vand.u32 %v3849_v24, %v3934_v7 }
  0x62   :  { %3467 = vmatmul.mubr.msk.bf16.vlgmr.msra.gmra.mrb[44].mxu0 %vm251_vm2, %v3955_v16 }
  0x63   :  { %3468 = vmatmul.mubr.msk.bf16.vlgmr.msra.gmra.mrb[44].mxu1 %vm251_vm2, %v3955_v16  ;;  %1924 = vmatpush1.bf16.msra.mxu0 %v3782_v27  ;;  %v3844_v27 = vld [vmem:[%s4945_s1 + $0x4a0] ss:$84 sps:$4 sm:$0x1f]  }
  0x64   :  { %1965 = vmatpush1.bf16.msra.mxu1 %v3785_v28  ;;  %1925 = vmatprep.subr.bf16.mxu0 %v1794_v31  ;;  %v3847_v28 = vld [vmem:[%s4945_s1 + $0x4a8] ss:$84 sps:$4 sm:$0x1f]   ;;  %v2555_v31 = vand.u32 %v3844_v27, %v3934_v7 }
  0x65   :  { %1966 = vmatprep.subr.bf16.mxu1 %v1800_v32  ;;  %1955 = vmatprep.mubr.bf16.mxu0 %v3896_v3  ;;  %v2561_v32 = vand.u32 %v3847_v28, %v3934_v7 }
  0x66   :  { %1996 = vmatprep.mubr.bf16.mxu1 %v3896_v3 }
  0x67   :  { %1926 = vmatpush1.bf16.msra.mxu0 %v1791_v35  ;;  %v3858_v35 = vld [vmem:[%s4945_s1 + $0x4b4] ss:$84 sps:$4 sm:$0x1f]  }
  0x68   :  { %1967 = vmatpush1.bf16.msra.mxu1 %v1797_v36  ;;  %2005 = vmatprep.subr.bf16.mxu0 %v3796_v33  ;;  %v3852_v33 = vld [vmem:[%s4945_s1 + $0x40c] ss:$84 sps:$4 sm:$0xff]   ;;  %v3861_v36 = vld [vmem:[%s4945_s1 + $0x4bc] ss:$84 sps:$4 sm:$0x1f]   ;;  %v2570_v41 = vand.u32 %v3858_v35, %v3934_v7 }
  0x69   :  { %2046 = vmatprep.subr.bf16.mxu1 %v3799_v34  ;;  %v3855_v34 = vld [vmem:[%s4945_s1 + $0x414] ss:$84 sps:$4 sm:$0xff]   ;;  %v2576_v42 = vand.u32 %v3861_v36, %v3934_v7 }
  0x6a   :  { %3469 = vmatmul.mubr.msk.bf16.vlgmr.msra.gmra.mrb[48].mxu0 %vm251_vm2, %v3955_v16 }
  0x6b   :  { %3470 = vmatmul.mubr.msk.bf16.vlgmr.msra.gmra.mrb[48].mxu1 %vm251_vm2, %v3955_v16  ;;  %2006 = vmatpush1.bf16.msra.mxu0 %v3794_v39  ;;  %v3856_v39 = vld [vmem:[%s4945_s1 + $0x4b0] ss:$84 sps:$4 sm:$0x1f]  }
  0x6c   :  { %2047 = vmatpush1.bf16.msra.mxu1 %v3797_v40  ;;  %2007 = vmatprep.subr.bf16.mxu0 %v1806_v43  ;;  %v3859_v40 = vld [vmem:[%s4945_s1 + $0x4b8] ss:$84 sps:$4 sm:$0x1f]   ;;  %v2567_v43 = vand.u32 %v3856_v39, %v3934_v7 }
  0x6d   :  { %2048 = vmatprep.subr.bf16.mxu1 %v1812_v44  ;;  %2037 = vmatprep.mubr.bf16.mxu0 %v3896_v3  ;;  %v2573_v44 = vand.u32 %v3859_v40, %v3934_v7 }
  0x6e   :  { %2078 = vmatprep.mubr.bf16.mxu1 %v3896_v3 }
  0x6f   :  { %2008 = vmatpush1.bf16.msra.mxu0 %v1803_v46  ;;  %v3867_v46 = vld [vmem:[%s4945_s1 + $0x424] ss:$84 sps:$4 sm:$0xff]  }
  0x70   :  { %2049 = vmatpush1.bf16.msra.mxu1 %v1809_v47  ;;  %2087 = vmatprep.subr.bf16.mxu0 %v3808_v45  ;;  %v3864_v45 = vld [vmem:[%s4945_s1 + $0x41c] ss:$84 sps:$4 sm:$0xff]   ;;  %v3870_v47 = vld [vmem:[%s4945_s1 + $0x4c4] ss:$84 sps:$4 sm:$0x1f]  }
  0x71   :  { %2128 = vmatprep.subr.bf16.mxu1 %v3811_v48  ;;  %v3873_v48 = vld [vmem:[%s4945_s1 + $0x4cc] ss:$84 sps:$4 sm:$0x1f]  }
  0x72   :  { %3471 = vmatmul.mubr.msk.bf16.vlgmr.msra.gmra.mrb[52].mxu0 %vm251_vm2, %v3955_v16  ;;  %v2588_v54 = vand.u32 %v3873_v48, %v3934_v7 }
  0x73   :  { %3472 = vmatmul.mubr.msk.bf16.vlgmr.msra.gmra.mrb[52].mxu1 %vm251_vm2, %v3955_v16  ;;  %2088 = vmatpush1.bf16.msra.mxu0 %v3806_v51  ;;  %v3823_v16 = vld [vmem:[%s4945_s1 + $0x2ec] ss:$84 sps:$4 sm:$0xff]  }
  0x74   :  { %2129 = vmatpush1.bf16.msra.mxu1 %v3809_v53  ;;  %2089 = vmatprep.subr.bf16.mxu0 %v1818_v55  ;;  %v3868_v51 = vld [vmem:[%s4945_s1 + $0x4c0] ss:$84 sps:$4 sm:$0x1f]   ;;  %v2582_v53 = vand.u32 %v3870_v47, %v3934_v7 }
  0x75   :  { %2130 = vmatprep.subr.bf16.mxu1 %v1824_v56  ;;  %2119 = vmatprep.mubr.bf16.mxu0 %v3896_v3  ;;  %v2579_v55 = vand.u32 %v3868_v51, %v3934_v7  ;;  %v2585_v56 = vand.u32 %v3871_v52, %v3934_v7 }
  0x76   :  { %2160 = vmatprep.mubr.bf16.mxu1 %v3896_v3 }
  0x77   :  { %2090 = vmatpush1.bf16.msra.mxu0 %v1815_v58  ;;  %v3879_v58 = vld [vmem:[%s4945_s1 + $0x434] ss:$84 sps:$4 sm:$0xff]  }
  0x78   :  { %2131 = vmatpush1.bf16.msra.mxu1 %v1821_v59  ;;  %2169 = vmatprep.subr.bf16.mxu0 %v3820_v60  ;;  %v3882_v59 = vld [vmem:[%s4945_s1 + $0x4d4] ss:$84 sps:$4 sm:$0x1f]   ;;  %v3885_v60 = vld [vmem:[%s4945_s1 + $0x4dc] ss:$84 sps:$4 sm:$0x1f]  }
  0x79   :  { %2210 = vmatprep.subr.bf16.mxu1 %v3823_v16  ;;  %v3877_v16 = vld [vmem:[%s4945_s1 + $0x430] ss:$84 sps:$4 sm:$0xff]   ;;  %v2594_v0 = vand.u32 %v3882_v59, %v3934_v7  ;;  %v2600_v1 = vand.u32 %v3885_v60, %v3934_v7 }
  0x7a   :  { %3473 = vmatmul.mubr.msk.bf16.vlgmr.msra.gmra.mrb[56].mxu0 %vm251_vm2, %v4457_v6 }
  0x7b   :  { %3474 = vmatmul.mubr.msk.bf16.vlgmr.msra.gmra.mrb[56].mxu1 %vm251_vm2, %v4457_v6  ;;  %2170 = vmatpush1.bf16.msra.mxu0 %v3818_v62  ;;  %v3880_v62 = vld [vmem:[%s4945_s1 + $0x4d0] ss:$84 sps:$4 sm:$0x1f]  }
  0x7c   :  { %2211 = vmatpush1.bf16.msra.mxu1 %v3821_v63  ;;  %2171 = vmatprep.subr.bf16.mxu0 %v1830_v2  ;;  %v3883_v63 = vld [vmem:[%s4945_s1 + $0x4d8] ss:$84 sps:$4 sm:$0x1f]   ;;  %v2591_v2 = vand.u32 %v3880_v62, %v3934_v7 }
  0x7d   :  { %2212 = vmatprep.subr.bf16.mxu1 %v1836_v4  ;;  %2201 = vmatprep.mubr.bf16.mxu0 %v3896_v3  ;;  %v2597_v4 = vand.u32 %v3883_v63, %v3934_v7 }
  0x7e   :  { %2242 = vmatprep.mubr.bf16.mxu1 %v3896_v3 }
  0x7f   :  { %2172 = vmatpush1.bf16.msra.mxu0 %v1827_v8  ;;  %v3892_v8 = vld [vmem:[%s4945_s1 + $0x4e4] ss:$84 sps:$4 sm:$0x1f]  }
  0x80   :  { %2213 = vmatpush1.bf16.msra.mxu1 %v1833_v10  ;;  %3625 = vmatprep.subr.bf16.mxu0 %v3897_v9  ;;  %v3886_v10 = vld [vmem:[%s4945_s1 + $0x438] ss:$84 sps:$4 sm:$0xff]  }
  0x81   :  { %2611 = vmatprep.subr.bf16.mxu1 %v3832_v11  ;;  %v3889_v11 = vld [vmem:[%s4945_s1 + $0x440] ss:$84 sps:$4 sm:$0xff]  }
  0x82   :  { %3475 = vmatmul.mubr.msk.bf16.vlgmr.msra.gmra.mrb[60].mxu0 %vm251_vm2, %v4457_v6 }
  0x83   :  { %3476 = vmatmul.mubr.msk.bf16.vlgmr.msra.gmra.mrb[60].mxu1 %vm251_vm2, %v4457_v6  ;;  %3626 = vmatpush3.bf16.msra.mxu0 %v3833_v14  ;;  %v2606_v14 = vand.u32 %v3892_v8, %v3934_v7 }
  0x84   :  { %2612 = vmatpush1.bf16.msra.mxu1 %v3830_v13  ;;  %3627 = vmatprep.subr.bf16.mxu0 %v3897_v9  ;;  %v3893_v13 = vld [vmem:[%s4945_s1 + $0x4e8] ss:$84 sps:$4 sm:$0x1f]  }
  0x85   :  { %2613 = vmatprep.subr.bf16.mxu1 %v2552_v18  ;;  %3629 = vmatprep.mubr.msk.bf16.mxu0 %vm3898_vm3, %v3897_v9  ;;  %v2609_v17 = vand.u32 %v3893_v13, %v3934_v7 }
  0x86   :  { %2643 = vmatprep.mubr.bf16.mxu1 %v3896_v3 }
  0x87   :  { %3628 = vmatpush3.bf16.msra.mxu0 %v1839_v19 }
  0x88   :  { %2614 = vmatpush1.bf16.msra.mxu1 %v2549_v20  ;;  %2652 = vmatprep.subr.bf16.mxu0 %v3840_v21 }
  0x89   :  { %2693 = vmatprep.subr.bf16.mxu1 %v3843_v22 }
  0x8a   :  { %3630 = vmatmul.mubr.msk.bf16.vlgmr.msra.gmra.mrb[64].mxu0 %vm251_vm2, %v4457_v6 }
  0x8b   :  { %3564 = vmatmul.mubr.msk.bf16.vlgmr.msra.gmra.mrb[64].mxu1 %vm251_vm2, %v4457_v6  ;;  %2653 = vmatpush1.bf16.msra.mxu0 %v3838_v25 }
  0x8c   :  { %2694 = vmatpush1.bf16.msra.mxu1 %v3841_v26  ;;  %2654 = vmatprep.subr.bf16.mxu0 %v2558_v29 }
  0x8d   :  { %2695 = vmatprep.subr.bf16.mxu1 %v2564_v30  ;;  %2684 = vmatprep.mubr.bf16.mxu0 %v3896_v3 }
  0x8e   :  { %2725 = vmatprep.mubr.bf16.mxu1 %v3896_v3 }
  0x8f   :  { %2655 = vmatpush1.bf16.msra.mxu0 %v2555_v31 }
  0x90   :  { %2696 = vmatpush1.bf16.msra.mxu1 %v2561_v32  ;;  %2734 = vmatprep.subr.bf16.mxu0 %v3852_v33 }
  0x91   :  { %2775 = vmatprep.subr.bf16.mxu1 %v3855_v34 }
  0x92   :  { %3565 = vmatmul.mubr.msk.bf16.vlgmr.msra.gmra.mrb[68].mxu0 %vm251_vm2, %v4457_v6 }
  0x93   :  { %3566 = vmatmul.mubr.msk.bf16.vlgmr.msra.gmra.mrb[68].mxu1 %vm251_vm2, %v4457_v6  ;;  %2735 = vmatpush1.bf16.msra.mxu0 %v3850_v37 }
  0x94   :  { %2776 = vmatpush1.bf16.msra.mxu1 %v3853_v38  ;;  %2736 = vmatprep.subr.bf16.mxu0 %v2570_v41 }
  0x95   :  { %2777 = vmatprep.subr.bf16.mxu1 %v2576_v42  ;;  %2766 = vmatprep.mubr.bf16.mxu0 %v3896_v3 }
  0x96   :  { %2807 = vmatprep.mubr.bf16.mxu1 %v3896_v3 }
  0x97   :  { %2737 = vmatpush1.bf16.msra.mxu0 %v2567_v43 }
  0x98   :  { %2778 = vmatpush1.bf16.msra.mxu1 %v2573_v44  ;;  %2816 = vmatprep.subr.bf16.mxu0 %v3864_v45 }
  0x99   :  { %2857 = vmatprep.subr.bf16.mxu1 %v3867_v46 }
  0x9a   :  { %3567 = vmatmul.mubr.msk.bf16.vlgmr.msra.gmra.mrb[72].mxu0 %vm251_vm2, %v4457_v6 }
  0x9b   :  { %3568 = vmatmul.mubr.msk.bf16.vlgmr.msra.gmra.mrb[72].mxu1 %vm251_vm2, %v4457_v6  ;;  %2817 = vmatpush1.bf16.msra.mxu0 %v3862_v49 }
  0x9c   :  { %2858 = vmatpush1.bf16.msra.mxu1 %v3865_v50  ;;  %2818 = vmatprep.subr.bf16.mxu0 %v2582_v53 }
  0x9d   :  { %2859 = vmatprep.subr.bf16.mxu1 %v2588_v54  ;;  %2848 = vmatprep.mubr.bf16.mxu0 %v3896_v3 }
  0x9e   :  { %2889 = vmatprep.mubr.bf16.mxu1 %v3896_v3 }
  0x9f   :  { %2819 = vmatpush1.bf16.msra.mxu0 %v2579_v55 }
  0xa0   :  { %2860 = vmatpush1.bf16.msra.mxu1 %v2585_v56  ;;  %2898 = vmatprep.subr.bf16.mxu0 %v3876_v57 }
  0xa1   :  { %2939 = vmatprep.subr.bf16.mxu1 %v3879_v58 }
  0xa2   :  { %3569 = vmatmul.mubr.msk.bf16.vlgmr.msra.gmra.mrb[76].mxu0 %vm251_vm2, %v4457_v6 }
  0xa3   :  { %3570 = vmatmul.mubr.msk.bf16.vlgmr.msra.gmra.mrb[76].mxu1 %vm251_vm2, %v4457_v6  ;;  %2899 = vmatpush1.bf16.msra.mxu0 %v3874_v61 }
  0xa4   :  { %2940 = vmatpush1.bf16.msra.mxu1 %v3877_v16  ;;  %2900 = vmatprep.subr.bf16.mxu0 %v2594_v0 }
  0xa5   :  { %2941 = vmatprep.subr.bf16.mxu1 %v2600_v1  ;;  %2930 = vmatprep.mubr.bf16.mxu0 %v3896_v3 }
  0xa6   :  { %2971 = vmatprep.mubr.bf16.mxu1 %v3896_v3 }
  0xa7   :  { %2901 = vmatpush1.bf16.msra.mxu0 %v2591_v2 }
  0xa8   :  { %2942 = vmatpush1.bf16.msra.mxu1 %v2597_v4  ;;  %2980 = vmatprep.subr.bf16.mxu0 %v3888_v5 }
  0xa9   :  { %3633 = vmatprep.subr.bf16.mxu1 %v3897_v9 }
  0xaa   :  { %3571 = vmatmul.mubr.msk.bf16.vlgmr.msra.gmra.mrb[80].mxu0 %vm251_vm2, %v4457_v6 }
  0xab   :  { %3572 = vmatmul.mubr.msk.bf16.vlgmr.msra.gmra.mrb[80].mxu1 %vm251_vm2, %v4457_v6  ;;  %2981 = vmatpush1.bf16.msra.mxu0 %v3886_v10 }
  0xac   :  { %3634 = vmatpush3.bf16.msra.mxu1 %v3889_v11  ;;  %2982 = vmatprep.subr.bf16.mxu0 %v2606_v14 }
  0xad   :  { %3635 = vmatprep.subr.bf16.mxu1 %v3897_v9  ;;  %3012 = vmatprep.mubr.bf16.mxu0 %v3896_v3 }
  0xae   :  { %3637 = vmatprep.mubr.msk.bf16.mxu1 %vm3898_vm3, %v3897_v9 }
  0xaf   :  { %2983 = vmatpush1.bf16.msra.mxu0 %v2603_v15 }
  0xb0   :  { %3636 = vmatpush3.bf16.msra.mxu1 %v2609_v17 }
  0xb2   :  { %3573 = vmatmul.mubr.msk.bf16.vlgmr.msra.gmra.mrb[84].mxu0 %vm251_vm2, %v4457_v6 }
  0xb3   :  { %3638 = vmatmul.mubr.msk.bf16.vlgmr.msra.gmra.mrb[84].mxu1 %vm251_vm2, %v4457_v6 }
  0xdd   :  { %v4667_v18 = vpop.f32.mrb[0].mxu0 }
  0xde   :  { %v4669_v19 = vpop.f32.mrb[0].mxu1  ;;  %v4671_v7 = vpop.f32.mrb[1].mxu0 }
  0xdf   :  { %v4673_v20 = vpop.f32.mrb[1].mxu1  ;;  %v360_v3 = vpop.f32.mrb[2].mxu0 }
  0xe0   :  { %v401_v21 = vpop.f32.mrb[2].mxu1  ;;  %v361_v22 = vpop.f32.mrb[3].mxu0 }
  0xe1   :  { %v402_v9 = vpop.f32.mrb[3].mxu1 }
  0xe5   :  { %v4675_v23 = vpop.f32.mrb[4].mxu0 }
  0xe6   :  { %v4677_v24 = vpop.f32.mrb[4].mxu1  ;;  %v4679_v25 = vpop.f32.mrb[5].mxu0 }
  0xe7   :  { %v4681_v26 = vpop.f32.mrb[5].mxu1  ;;  %v442_v6 = vpop.f32.mrb[6].mxu0 }
  0xe8   :  { %v483_v27 = vpop.f32.mrb[6].mxu1  ;;  %v443_v28 = vpop.f32.mrb[7].mxu0 }
  0xe9   :  { %v484_v29 = vpop.f32.mrb[7].mxu1 }
  0xed   :  { %v4683_v30 = vpop.f32.mrb[8].mxu0 }
  0xee   :  { %v4685_v31 = vpop.f32.mrb[8].mxu1  ;;  %v4687_v32 = vpop.f32.mrb[9].mxu0 }
  0xef   :  { %v4689_v33 = vpop.f32.mrb[9].mxu1  ;;  %v524_v34 = vpop.f32.mrb[10].mxu0 }
  0xf0   :  { %v565_v35 = vpop.f32.mrb[10].mxu1  ;;  %v525_v36 = vpop.f32.mrb[11].mxu0 }
  0xf1   :  { %v566_v37 = vpop.f32.mrb[11].mxu1 }
  0xf5   :  { %v4691_v38 = vpop.f32.mrb[12].mxu0 }
  0xf6   :  { %v4693_v39 = vpop.f32.mrb[12].mxu1  ;;  %v4695_v40 = vpop.f32.mrb[13].mxu0 }
  0xf7   :  { %v4697_v41 = vpop.f32.mrb[13].mxu1  ;;  %v606_v42 = vpop.f32.mrb[14].mxu0 }
  0xf8   :  { %v647_v43 = vpop.f32.mrb[14].mxu1  ;;  %v607_v44 = vpop.f32.mrb[15].mxu0 }
  0xf9   :  { %v648_v45 = vpop.f32.mrb[15].mxu1 }
  0xfd   :  { %v4699_v46 = vpop.f32.mrb[16].mxu0 }
  0xfe   :  { %v4701_v47 = vpop.f32.mrb[16].mxu1  ;;  %v4703_v48 = vpop.f32.mrb[17].mxu0 }
  0xff   :  { %v4705_v49 = vpop.f32.mrb[17].mxu1  ;;  %v688_v50 = vpop.f32.mrb[18].mxu0 }
 0x100   :  { %v729_v51 = vpop.f32.mrb[18].mxu1  ;;  %v689_v52 = vpop.f32.mrb[19].mxu0 }
 0x101   :  { %v730_v53 = vpop.f32.mrb[19].mxu1 }
 0x105   :  { %v4707_v54 = vpop.f32.mrb[20].mxu0 }
 0x106   :  { %v4709_v55 = vpop.f32.mrb[20].mxu1  ;;  %v3615_v57 = vpop.f32.mrb[21].mxu0 }
 0x107   :  { %v1521_v56 = vmax.f32 %v4667_v18, %v4709_v55  ;;  %v4713_v58 = vpop.f32.mrb[21].mxu1  ;;  %v769_v60 = vpop.f32.mrb[22].mxu0 }
 0x108   :  { %v1522_v59 = vmax.f32 %v4671_v7, %v4713_v58  ;;  %v1109_v61 = vpop.f32.mrb[22].mxu1  ;;  %v3616_v16 = vpop.f32.mrb[23].mxu0 }
 0x109   :  { %v1110_v62 = vpop.f32.mrb[23].mxu1 }
 0x10d   :  { %v4717_v63 = vpop.f32.mrb[24].mxu0 }
 0x10e   :  { %v4719_v0 = vpop.f32.mrb[24].mxu1  ;;  %v1523_v1 = vmax.f32 %v4669_v19, %v4717_v63  ;;  %v4725_v4 = vpop.f32.mrb[25].mxu0 }
 0x10f   :  { %v1525_v2 = vmax.f32 %v4675_v23, %v4719_v0  ;;  %v4727_v5 = vpop.f32.mrb[25].mxu1  ;;  %v1524_v8 = vmax.f32 %v4673_v20, %v4725_v4  ;;  %v1150_v11 = vpop.f32.mrb[26].mxu0 }
 0x110   :  { %v1526_v10 = vmax.f32 %v4679_v25, %v4727_v5  ;;  %v1191_v12 = vpop.f32.mrb[26].mxu1  ;;  %v1151_v13 = vpop.f32.mrb[27].mxu0 }
 0x111   :  { %v1192_v14 = vpop.f32.mrb[27].mxu1 }
 0x115   :  { %v4733_v15 = vpop.f32.mrb[28].mxu0 }
 0x116   :  { %v4735_v17 = vpop.f32.mrb[28].mxu1  ;;  %v1527_v19 = vmax.f32 %v4677_v24, %v4733_v15  ;;  %v4741_v21 = vpop.f32.mrb[29].mxu0 }
 0x117   :  { %v1529_v3 = vmax.f32 %v4683_v30, %v4735_v17  ;;  %v4743_v20 = vpop.f32.mrb[29].mxu1  ;;  %v1528_v22 = vmax.f32 %v4681_v26, %v4741_v21  ;;  %v1232_v6 = vpop.f32.mrb[30].mxu0 }
 0x118   :  { %v1530_v9 = vmax.f32 %v4687_v32, %v4743_v20  ;;  %v1273_v27 = vpop.f32.mrb[30].mxu1  ;;  %v1233_v28 = vpop.f32.mrb[31].mxu0 }
 0x119   :  { %v1274_v29 = vpop.f32.mrb[31].mxu1 }
 0x11d   :  { %v4749_v34 = vpop.f32.mrb[32].mxu0 }
 0x11e   :  { %v4751_v24 = vpop.f32.mrb[32].mxu1  ;;  %v1531_v35 = vmax.f32 %v4685_v31, %v4749_v34  ;;  %v4757_v37 = vpop.f32.mrb[33].mxu0 }
 0x11f   :  { %v1533_v36 = vmax.f32 %v4691_v38, %v4751_v24  ;;  %v4759_v26 = vpop.f32.mrb[33].mxu1  ;;  %v1532_v42 = vmax.f32 %v4689_v33, %v4757_v37  ;;  %v1314_v44 = vpop.f32.mrb[34].mxu0 }
 0x120   :  { %v1534_v43 = vmax.f32 %v4695_v40, %v4759_v26  ;;  %v1355_v45 = vpop.f32.mrb[34].mxu1  ;;  %v1315_v50 = vpop.f32.mrb[35].mxu0 }
 0x121   :  { %v1356_v51 = vpop.f32.mrb[35].mxu1 }
 0x125   :  { %v4765_v52 = vpop.f32.mrb[36].mxu0 }
 0x126   :  { %v4767_v31 = vpop.f32.mrb[36].mxu1  ;;  %v1535_v53 = vmax.f32 %v4693_v39, %v4765_v52  ;;  %v4773_v60 = vpop.f32.mrb[37].mxu0 }
 0x127   :  { %v1537_v57 = vmax.f32 %v4699_v46, %v4767_v31  ;;  %v4775_v33 = vpop.f32.mrb[37].mxu1  ;;  %v1536_v61 = vmax.f32 %v4697_v41, %v4773_v60  ;;  %v1396_v62 = vpop.f32.mrb[38].mxu0 }
 0x128   :  { %v1538_v16 = vmax.f32 %v4703_v48, %v4775_v33  ;;  %v1437_v63 = vpop.f32.mrb[38].mxu1  ;;  %v1397_v4 = vpop.f32.mrb[39].mxu0 }
 0x129   :  { %v1438_v11 = vpop.f32.mrb[39].mxu1 }
 0x12d   :  { %v4781_v12 = vpop.f32.mrb[40].mxu0 }
 0x12e   :  { %v4783_v39 = vpop.f32.mrb[40].mxu1  ;;  %v1539_v13 = vmax.f32 %v4701_v47, %v4781_v12  ;;  %v4789_v15 = vpop.f32.mrb[41].mxu0 }
 0x12f   :  { %v1541_v14 = vmax.f32 %v4707_v54, %v4783_v39  ;;  %v3623_v41 = vpop.f32.mrb[41].mxu1  ;;  %v1540_v21 = vmax.f32 %v4705_v49, %v4789_v15  ;;  %v1478_v6 = vpop.f32.mrb[42].mxu0 }
 0x130   :  { %v1518_v27 = vpop.f32.mrb[42].mxu1  ;;  %v1479_v28 = vpop.f32.mrb[43].mxu0 }
 0x131   :  { %v3624_v29 = vpop.f32.mrb[43].mxu1 }
 0x135   :  { %v1875_v34 = vpop.f32.mrb[44].mxu0 }
 0x136   :  { %v1916_v37 = vpop.f32.mrb[44].mxu1  ;;  %v4796_v44 = vmax.f32 %v1521_v56, %v1875_v34  ;;  %v1877_v45 = vpop.f32.mrb[45].mxu0 }
 0x137   :  { %v4798_v47 = vmax.f32 %v1523_v1, %v1916_v37  ;;  %v1918_v50 = vpop.f32.mrb[45].mxu1  ;;  %v4803_v51 = vmax.f32 %v1522_v59, %v1877_v45  ;;  %v1879_v52 = vpop.f32.mrb[46].mxu0 }
 0x138   :  { %v4805_v49 = vmax.f32 %v1524_v8, %v1918_v50  ;;  %v1920_v60 = vpop.f32.mrb[46].mxu1  ;;  %v1880_v62 = vpop.f32.mrb[47].mxu0 }
 0x139   :  { %v1921_v63 = vpop.f32.mrb[47].mxu1 }
 0x13a   :  { %v4863_v63 = vpop.permute.xlu0 %3085 }
 0x13d   :  { %v1957_v4 = vpop.f32.mrb[48].mxu0 }
 0x13e   :  { %v1998_v11 = vpop.f32.mrb[48].mxu1  ;;  %v4810_v18 = vmax.f32 %v1525_v2, %v1957_v4  ;;  %v1959_v56 = vpop.f32.mrb[49].mxu0 }
 0x13f   :  { %v4812_v55 = vmax.f32 %v1527_v19, %v1998_v11  ;;  %v2000_v1 = vpop.f32.mrb[49].mxu1  ;;  %v4817_v7 = vmax.f32 %v1526_v10, %v1959_v56  ;;  %v1961_v59 = vpop.f32.mrb[50].mxu0 }
 0x140   :  { %v4819_v58 = vmax.f32 %v1528_v22, %v2000_v1  ;;  %v2002_v8 = vpop.f32.mrb[50].mxu1  ;;  %v1962_v12 = vpop.f32.mrb[51].mxu0 }
 0x141   :  { %v2003_v15 = vpop.f32.mrb[51].mxu1 }
 0x145   :  { %v2039_v41 = vpop.f32.mrb[52].mxu0 }
 0x146   :  { %v2080_v6 = vpop.f32.mrb[52].mxu1  ;;  %v4824_v23 = vmax.f32 %v1529_v3, %v2039_v41  ;;  %v2041_v2 = vpop.f32.mrb[53].mxu0 }
 0x147   :  { %v4826_v0 = vmax.f32 %v1531_v35, %v2080_v6  ;;  %v2082_v19 = vpop.f32.mrb[53].mxu1  ;;  %v4831_v25 = vmax.f32 %v1530_v9, %v2041_v2  ;;  %v2043_v10 = vpop.f32.mrb[54].mxu0 }
 0x148   :  { %v4833_v5 = vmax.f32 %v1532_v42, %v2082_v19  ;;  %v2084_v22 = vpop.f32.mrb[54].mxu1  ;;  %v2044_v27 = vpop.f32.mrb[55].mxu0 }
 0x149   :  { %v2085_v28 = vpop.f32.mrb[55].mxu1 }
 0x14d   :  { %v2121_v29 = vpop.f32.mrb[56].mxu0 }
 0x14e   :  { %v2162_v34 = vpop.f32.mrb[56].mxu1  ;;  %v4838_v30 = vmax.f32 %v1533_v36, %v2121_v29  ;;  %v2123_v3 = vpop.f32.mrb[57].mxu0 }
 0x14f   :  { %v4840_v17 = vmax.f32 %v1535_v53, %v2162_v34  ;;  %v2164_v35 = vpop.f32.mrb[57].mxu1  ;;  %v4845_v32 = vmax.f32 %v1534_v43, %v2123_v3  ;;  %v2125_v9 = vpop.f32.mrb[58].mxu0 }
 0x150   :  { %v4847_v20 = vmax.f32 %v1536_v61, %v2164_v35  ;;  %v2166_v42 = vpop.f32.mrb[58].mxu1  ;;  %v2126_v37 = vpop.f32.mrb[59].mxu0 }
 0x151   :  { %v2167_v45 = vpop.f32.mrb[59].mxu1 }
 0x155   :  { %v2203_v50 = vpop.f32.mrb[60].mxu0 }
 0x156   :  { %v2244_v52 = vpop.f32.mrb[60].mxu1  ;;  %v4852_v38 = vmax.f32 %v1537_v57, %v2203_v50  ;;  %v2205_v36 = vpop.f32.mrb[61].mxu0 }
 0x157   :  { %v4854_v24 = vmax.f32 %v1539_v13, %v2244_v52  ;;  %v2246_v53 = vpop.f32.mrb[61].mxu1  ;;  %v4859_v40 = vmax.f32 %v1538_v16, %v2205_v36  ;;  %v2207_v43 = vpop.f32.mrb[62].mxu0 }
 0x158   :  { %v4861_v26 = vmax.f32 %v1540_v21, %v2246_v53  ;;  %v2248_v61 = vpop.f32.mrb[62].mxu1  ;;  %v2208_v60 = vpop.f32.mrb[63].mxu0 }
 0x159   :  { %v2249_v62 = vpop.f32.mrb[63].mxu1 }
 0x15d   :  { %v2285_v46 = vpop.f32.mrb[64].mxu0 }
 0x15e   :  { %v2645_v31 = vpop.f32.mrb[64].mxu1  ;;  %v4868_v57 = vmax.f32 %v1541_v14, %v2285_v46  ;;  %v3631_v48 = vpop.f32.mrb[65].mxu0 }
 0x15f   :  { %v3061_v13 = vmax.f32 %v4796_v44, %v2645_v31  ;;  %v2647_v33 = vpop.f32.mrb[65].mxu1  ;;  %v2288_v21 = vpop.f32.mrb[66].mxu0 }
 0x160   :  { %v3062_v16 = vmax.f32 %v4803_v51, %v2647_v33  ;;  %v2649_v4 = vpop.f32.mrb[66].mxu1  ;;  %v3632_v11 = vpop.f32.mrb[67].mxu0 }
 0x161   :  { %v2650_v56 = vpop.f32.mrb[67].mxu1  ;;  %v3088_v1 = vadd.f32 %v4863_v63, %v3061_v13 }
 0x162   :  { %v3089_v59 = vadd.f32 %v4863_v63, %v3062_v16 }
 0x163   :  { %v3109_v8 = vmax.f32 %v3088_v1, 0.0 }
 0x164   :  { %v3110_v12 = vmax.f32 %v3089_v59, 0.0 }
 0x165   :  { %v2686_v15 = vpop.f32.mrb[68].mxu0 }
 0x166   :  { %v2727_v54 = vpop.f32.mrb[68].mxu1  ;;  %v3586_v39 = vpack.c.bf16 %v3110_v12, %v3109_v8  ;;  %v3063_v14 = vmax.f32 %v4798_v47, %v2686_v15  ;;  %v2688_v41 = vpop.f32.mrb[69].mxu0 }
 0x167   :  { %v3065_v44 = vmax.f32 %v4810_v18, %v2727_v54  ;;  %v2729_v6 = vpop.f32.mrb[69].mxu1  ;;  %v3064_v51 = vmax.f32 %v4805_v49, %v2688_v41  ;;  %v2690_v19 = vpop.f32.mrb[70].mxu0 }
 0x168   :  { %3215 = vst [vmem:[%s4948_s3] sm:$0x77] %v3586_v39  ;;  %v3066_v2 = vmax.f32 %v4817_v7, %v2729_v6  ;;  %v2731_v10 = vpop.f32.mrb[70].mxu1  ;;  %v3090_v22 = vadd.f32 %v4863_v63, %v3063_v14  ;;  %v2691_v28 = vpop.f32.mrb[71].mxu0 }
 0x169   :  { %v3092_v27 = vadd.f32 %v4863_v63, %v3065_v44  ;;  %v2732_v47 = vpop.f32.mrb[71].mxu1  ;;  %v3091_v18 = vadd.f32 %v4863_v63, %v3064_v51 }
 0x16a   :  { %v3093_v29 = vadd.f32 %v4863_v63, %v3066_v2  ;;  %v3111_v34 = vmax.f32 %v3090_v22, 0.0 }
 0x16b   :  { %v3113_v49 = vmax.f32 %v3092_v27, 0.0  ;;  %v3112_v3 = vmax.f32 %v3091_v18, 0.0 }
 0x16c   :  { %v3114_v35 = vmax.f32 %v3093_v29, 0.0 }
 0x16d   :  { %v3587_v9 = vpack.c.bf16 %v3112_v3, %v3111_v34  ;;  %v2768_v37 = vpop.f32.mrb[72].mxu0 }
 0x16e   :  { %v3588_v42 = vpack.c.bf16 %v3114_v35, %v3113_v49  ;;  %v2809_v7 = vpop.f32.mrb[72].mxu1  ;;  %v3067_v45 = vmax.f32 %v4812_v55, %v2768_v37  ;;  %v2770_v52 = vpop.f32.mrb[73].mxu0 }
 0x16f   :  { %v3069_v50 = vmax.f32 %v4824_v23, %v2809_v7  ;;  %v2811_v36 = vpop.f32.mrb[73].mxu1  ;;  %3216 = vst [vmem:[%s4948_s3 + $0x8] sm:$0x77] %v3587_v9  ;;  %v3068_v53 = vmax.f32 %v4819_v58, %v2770_v52  ;;  %v2772_v61 = vpop.f32.mrb[74].mxu0 }
 0x170   :  { %3217 = vst [vmem:[%s4948_s3 + $0x10] sm:$0x77] %v3588_v42  ;;  %v3070_v43 = vmax.f32 %v4831_v25, %v2811_v36  ;;  %v2813_v60 = vpop.f32.mrb[74].mxu1  ;;  %v3094_v55 = vadd.f32 %v4863_v63, %v3067_v45  ;;  %v2773_v62 = vpop.f32.mrb[75].mxu0 }
 0x171   :  { %v3096_v23 = vadd.f32 %v4863_v63, %v3069_v50  ;;  %v2814_v46 = vpop.f32.mrb[75].mxu1  ;;  %v3095_v31 = vadd.f32 %v4863_v63, %v3068_v53 }
 0x172   :  { %v3097_v13 = vadd.f32 %v4863_v63, %v3070_v43  ;;  %v3115_v48 = vmax.f32 %v3094_v55, 0.0 }
 0x173   :  { %v3117_v33 = vmax.f32 %v3096_v23, 0.0  ;;  %v3116_v16 = vmax.f32 %v3095_v31, 0.0 }
 0x174   :  { %v3118_v21 = vmax.f32 %v3097_v13, 0.0 }
 0x175   :  { %v3589_v4 = vpack.c.bf16 %v3116_v16, %v3115_v48  ;;  %v2850_v11 = vpop.f32.mrb[76].mxu0 }
 0x176   :  { %v3590_v58 = vpack.c.bf16 %v3118_v21, %v3117_v33  ;;  %v2891_v25 = vpop.f32.mrb[76].mxu1  ;;  %v3071_v56 = vmax.f32 %v4826_v0, %v2850_v11  ;;  %v2852_v59 = vpop.f32.mrb[77].mxu0 }
 0x177   :  { %v3073_v1 = vmax.f32 %v4838_v30, %v2891_v25  ;;  %v2893_v8 = vpop.f32.mrb[77].mxu1  ;;  %3218 = vst [vmem:[%s4948_s3 + $0x18] sm:$0x77] %v3589_v4  ;;  %v3072_v12 = vmax.f32 %v4833_v5, %v2852_v59  ;;  %v2854_v54 = vpop.f32.mrb[78].mxu0 }
 0x178   :  { %3219 = vst [vmem:[%s4948_s3 + $0x20] sm:$0x77] %v3590_v58  ;;  %v3074_v15 = vmax.f32 %v4845_v32, %v2893_v8  ;;  %v2895_v39 = vpop.f32.mrb[78].mxu1  ;;  %v3098_v0 = vadd.f32 %v4863_v63, %v3071_v56  ;;  %v2855_v14 = vpop.f32.mrb[79].mxu0 }
 0x179   :  { %v3100_v30 = vadd.f32 %v4863_v63, %v3073_v1  ;;  %v2896_v44 = vpop.f32.mrb[79].mxu1  ;;  %v3099_v41 = vadd.f32 %v4863_v63, %v3072_v12 }
 0x17a   :  { %v3101_v6 = vadd.f32 %v4863_v63, %v3074_v15  ;;  %v3119_v51 = vmax.f32 %v3098_v0, 0.0 }
 0x17b   :  { %v3121_v2 = vmax.f32 %v3100_v30, 0.0  ;;  %v3120_v19 = vmax.f32 %v3099_v41, 0.0 }
 0x17c   :  { %v3122_v10 = vmax.f32 %v3101_v6, 0.0 }
 0x17d   :  { %v3591_v22 = vpack.c.bf16 %v3120_v19, %v3119_v51  ;;  %v2932_v27 = vpop.f32.mrb[80].mxu0 }
 0x17e   :  { %v3592_v5 = vpack.c.bf16 %v3122_v10, %v3121_v2  ;;  %v2973_v32 = vpop.f32.mrb[80].mxu1  ;;  %v3075_v28 = vmax.f32 %v4840_v17, %v2932_v27  ;;  %v2934_v18 = vpop.f32.mrb[81].mxu0 }
 0x17f   :  { %v3077_v47 = vmax.f32 %v4852_v38, %v2973_v32  ;;  %v2975_v29 = vpop.f32.mrb[81].mxu1  ;;  %3220 = vst [vmem:[%s4948_s3 + $0x28] sm:$0x77] %v3591_v22  ;;  %v3076_v34 = vmax.f32 %v4847_v20, %v2934_v18  ;;  %v2936_v3 = vpop.f32.mrb[82].mxu0 }
 0x180   :  { %3221 = vst [vmem:[%s4948_s3 + $0x30] sm:$0x77] %v3592_v5  ;;  %v3078_v49 = vmax.f32 %v4859_v40, %v2975_v29  ;;  %v2977_v35 = vpop.f32.mrb[82].mxu1  ;;  %v3102_v17 = vadd.f32 %v4863_v63, %v3075_v28  ;;  %v2937_v9 = vpop.f32.mrb[83].mxu0 }
 0x181   :  { %v3104_v38 = vadd.f32 %v4863_v63, %v3077_v47  ;;  %v2978_v42 = vpop.f32.mrb[83].mxu1  ;;  %v3103_v37 = vadd.f32 %v4863_v63, %v3076_v34 }
 0x182   :  { %v3105_v7 = vadd.f32 %v4863_v63, %v3078_v49  ;;  %v3123_v45 = vmax.f32 %v3102_v17, 0.0 }
 0x183   :  { %v3125_v50 = vmax.f32 %v3104_v38, 0.0  ;;  %v3124_v52 = vmax.f32 %v3103_v37, 0.0 }
 0x184   :  { %v3126_v36 = vmax.f32 %v3105_v7, 0.0 }
 0x185   :  { %v3593_v53 = vpack.c.bf16 %v3124_v52, %v3123_v45  ;;  %v3014_v43 = vpop.f32.mrb[84].mxu0 }
 0x186   :  { %v3594_v20 = vpack.c.bf16 %v3126_v36, %v3125_v50  ;;  %v3055_v40 = vpop.f32.mrb[84].mxu1  ;;  %v3079_v61 = vmax.f32 %v4854_v24, %v3014_v43  ;;  %v3016_v55 = vpop.f32.mrb[85].mxu0 }
 0x187   :  { %v3081_v60 = vmax.f32 %v4868_v57, %v3055_v40  ;;  %v3639_v23 = vpop.f32.mrb[85].mxu1  ;;  %3222 = vst [vmem:[%s4948_s3 + $0x38] sm:$0x77] %v3593_v53  ;;  %v3080_v62 = vmax.f32 %v4861_v26, %v3016_v55  ;;  %v3018_v46 = vpop.f32.mrb[86].mxu0 }
 0x188   :  { %3223 = vst [vmem:[%s4948_s3 + $0x40] sm:$0x77] %v3594_v20  ;;  %v3058_v31 = vpop.f32.mrb[86].mxu1  ;;  %v3106_v13 = vadd.f32 %v4863_v63, %v3079_v61  ;;  %v3019_v48 = vpop.f32.mrb[87].mxu0 }
 0x189   :  { %v3108_v24 = vadd.f32 %v4863_v63, %v3081_v60  ;;  %v3640_v57 = vpop.f32.mrb[87].mxu1  ;;  %v3107_v33 = vadd.f32 %v4863_v63, %v3080_v62 }
 0x18a   :  { %v3127_v16 = vmax.f32 %v3106_v13, 0.0 }
 0x18b   :  { %v3129_v21 = vmax.f32 %v3108_v24, 0.0  ;;  %v3128_v4 = vmax.f32 %v3107_v33, 0.0 }
 0x18d   :  { %v3596_v58 = vpack.c.bf16 %v3129_v21, %v3129_v21  ;;  %v3595_v11 = vpack.c.bf16 %v3128_v4, %v3127_v16 }
 0x18f   :  { %3226 = vst.msk [vmem:[%s4948_s3 + $0x50] sm:$0x7] %vm3225_vm4, %v3596_v58  ;;  %3224 = vst [vmem:[%s4948_s3 + $0x48] sm:$0x77] %v3595_v11 }

// kernel: net2_forward.4
= control target key start
LH: loop header
LB: loop body
LE: loop exit
PB: predicated region body
PF: predicated region fallthrough
CT: control target
= control target key end

     0   :  { %vm254_vm0 = vcmask 179200   ;;  %vm258_vm1 = vcmask 1042432   ;;  %v1959_v47 = vmov 0   ;;  %s2504_s1 = inlined_call_operand.vmem [shape: bf16[4,150,512], index: 1, kind: input, shape index: {}]   ;;  %s2505_s0 = inlined_call_operand.vmem [shape: bf16[16,150], index: 0, kind: input, shape index: {}]   ;;  %s2506_s2 = inlined_call_operand.vmem [shape: f32[16,1], index: 2, kind: input, shape index: {}]   ;;  %s2507_s3 = inlined_call_operand.vmem [shape: bf16[16,512], index: 3, kind: output, shape index: {}]  }
   0x1   :  { %v1724_v0 = vld [vmem:[%s2504_s1 + $0x4] ss:$16 sps:$4 sm:$0xff]   ;;  %v1726_v1 = vld [vmem:[%s2504_s1 + $0xc] ss:$16 sps:$4 sm:$0xff]   ;;  %v1728_v2 = vld [vmem:[%s2504_s1] ss:$16 sps:$4 sm:$0xff]   ;;  %1723 = vset.pattern.permute.xlu0 %v1959_v47 }
   0x2   :  { %271 = vmatprep.subr.bf16.mxu0 %v1724_v0  ;;  %v1729_v3 = vld [vmem:[%s2504_s1 + $0x8] ss:$16 sps:$4 sm:$0xff]   ;;  %314 = vmatprep.subr.bf16.mxu1 %v1726_v1  ;;  %v1730_v4 = vld [vmem:[%s2504_s1 + $0x24] ss:$16 sps:$4 sm:$0xff]   ;;  %v1732_v5 = vld [vmem:[%s2504_s1 + $0x2c] ss:$16 sps:$4 sm:$0xff]  }
   0x3   :  { %272 = vmatpush1.bf16.msra.mxu0 %v1728_v2  ;;  %315 = vmatpush1.bf16.msra.mxu1 %v1729_v3  ;;  %v1734_v6 = vld [vmem:[%s2504_s1 + $0x20] ss:$16 sps:$4 sm:$0xff]   ;;  %v1735_v7 = vld [vmem:[%s2504_s1 + $0x28] ss:$16 sps:$4 sm:$0xff]   ;;  %v1736_v8 = vld [vmem:[%s2504_s1 + $0x44] ss:$16 sps:$4 sm:$0xff]  }
   0x4   :  { %273 = vmatprep.subr.bf16.mxu0 %v1730_v4  ;;  %316 = vmatprep.subr.bf16.mxu1 %v1732_v5  ;;  %v1738_v9 = vld [vmem:[%s2504_s1 + $0x4c] ss:$16 sps:$4 sm:$0xff]   ;;  %v1740_v10 = vld [vmem:[%s2504_s1 + $0x40] ss:$16 sps:$4 sm:$0xff]   ;;  %v1741_v11 = vld [vmem:[%s2504_s1 + $0x48] ss:$16 sps:$4 sm:$0xff]  }
   0x5   :  { %v1742_v12 = vld [vmem:[%s2504_s1 + $0x64] ss:$16 sps:$4 sm:$0xff]   ;;  %v1744_v13 = vld [vmem:[%s2504_s1 + $0x6c] ss:$16 sps:$4 sm:$0xff]   ;;  %v1746_v14 = vld [vmem:[%s2504_s1 + $0x60] ss:$16 sps:$4 sm:$0xff]  }
   0x6   :  { %v1747_v15 = vld [vmem:[%s2504_s1 + $0x68] ss:$16 sps:$4 sm:$0xff]   ;;  %v1748_v16 = vld [vmem:[%s2504_s1 + $0x84] ss:$16 sps:$4 sm:$0xff]   ;;  %v1750_v17 = vld [vmem:[%s2504_s1 + $0x8c] ss:$16 sps:$4 sm:$0xff]  }
   0x7   :  { %274 = vmatpush1.bf16.msra.mxu0 %v1734_v6  ;;  %317 = vmatpush1.bf16.msra.mxu1 %v1735_v7  ;;  %v1752_v18 = vld [vmem:[%s2504_s1 + $0x80] ss:$16 sps:$4 sm:$0xff]   ;;  %v1753_v19 = vld [vmem:[%s2504_s1 + $0x88] ss:$16 sps:$4 sm:$0xff]   ;;  %v1754_v20 = vld [vmem:[%s2504_s1 + $0xa4] ss:$16 sps:$4 sm:$0xff]  }
   0x8   :  { %275 = vmatprep.subr.bf16.mxu0 %v1736_v8  ;;  %318 = vmatprep.subr.bf16.mxu1 %v1738_v9  ;;  %v1756_v21 = vld [vmem:[%s2504_s1 + $0xac] ss:$16 sps:$4 sm:$0xff]   ;;  %v1758_v22 = vld [vmem:[%s2504_s1 + $0xa0] ss:$16 sps:$4 sm:$0xff]   ;;  %v1759_v23 = vld [vmem:[%s2504_s1 + $0xa8] ss:$16 sps:$4 sm:$0xff]  }
   0x9   :  { %v1760_v24 = vld [vmem:[%s2504_s1 + $0xc4] ss:$16 sps:$4 sm:$0xff]   ;;  %v1762_v25 = vld [vmem:[%s2504_s1 + $0xcc] ss:$16 sps:$4 sm:$0xff]   ;;  %v1764_v26 = vld [vmem:[%s2504_s1 + $0xc0] ss:$16 sps:$4 sm:$0xff]  }
   0xa   :  { %v1765_v27 = vld [vmem:[%s2504_s1 + $0xc8] ss:$16 sps:$4 sm:$0xff]   ;;  %v1766_v28 = vld [vmem:[%s2504_s1 + $0xe4] ss:$16 sps:$4 sm:$0xff]   ;;  %v1768_v29 = vld [vmem:[%s2504_s1 + $0xec] ss:$16 sps:$4 sm:$0xff]  }
   0xb   :  { %276 = vmatpush1.bf16.msra.mxu0 %v1740_v10  ;;  %319 = vmatpush1.bf16.msra.mxu1 %v1741_v11  ;;  %v2073_v30 = vld [vmem:[%s2505_s0 + $0x4] ss:$8 sps:$4 sm:$0xff]   ;;  %v1770_v31 = vld [vmem:[%s2504_s1 + $0xe0] ss:$16 sps:$4 sm:$0xff]   ;;  %v1771_v32 = vld [vmem:[%s2504_s1 + $0xe8] ss:$16 sps:$4 sm:$0xff]  }
   0xc   :  { %277 = vmatprep.subr.bf16.mxu0 %v1742_v12  ;;  %320 = vmatprep.subr.bf16.mxu1 %v1744_v13  ;;  %v1772_v33 = vld [vmem:[%s2504_s1 + $0x104] ss:$16 sps:$4 sm:$0xff]   ;;  %v1774_v34 = vld [vmem:[%s2504_s1 + $0x10c] ss:$16 sps:$4 sm:$0xff]   ;;  %v1776_v37 = vld [vmem:[%s2504_s1 + $0x100] ss:$16 sps:$4 sm:$0xff]  }
   0xd   :  { %1465 = vmatprep.mubr.msk.bf16.mxu0 %vm254_vm0, %v2073_v30  ;;  %1467 = vmatprep.mubr.msk.bf16.mxu1 %vm254_vm0, %v2073_v30  ;;  %v53_v35 = vld [vmem:[%s2504_s1 + $0x120] sm:$0x77]  ;;  %v54_v36 = vld [vmem:[%s2504_s1 + $0x128] sm:$0x77] }
   0xe   :  { %v1777_v38 = vld [vmem:[%s2504_s1 + $0x108] ss:$16 sps:$4 sm:$0xff]   ;;  %v1460_v39 = vcombine.low %v53_v35, %v53_v35  ;;  %v1461_v40 = vcombine.high %v53_v35, %v53_v35  ;;  %v1463_v41 = vcombine.high %v54_v36, %v54_v36  ;;  %v1462_v42 = vcombine.low %v54_v36, %v54_v36  ;;  %v1787_v45 = vld [vmem:[%s2504_s1 + $0x134] ss:$16 sps:$4 sm:$0xff]   ;;  %v1790_v46 = vld [vmem:[%s2504_s1 + $0x13c] ss:$16 sps:$4 sm:$0xff]  }
   0xf   :  { %278 = vmatpush1.bf16.msra.mxu0 %v1746_v14  ;;  %321 = vmatpush1.bf16.msra.mxu1 %v1747_v15  ;;  %v2116_v48 = vld [vmem:[%s2505_s0] ss:$8 sps:$4 sm:$0xff]   ;;  %v1793_v51 = vld [vmem:[%s2504_s1 + $0x154] ss:$16 sps:$4 sm:$0xff]   ;;  %v1796_v52 = vld [vmem:[%s2504_s1 + $0x15c] ss:$16 sps:$4 sm:$0xff]  }
  0x10   :  { %279 = vmatprep.subr.bf16.mxu0 %v1748_v16  ;;  %322 = vmatprep.subr.bf16.mxu1 %v1750_v17  ;;  %v260_v43 = vsel %vm258_vm1, %v1460_v39, 0  ;;  %v266_v44 = vsel %vm258_vm1, %v1462_v42, 0  ;;  %v1785_v49 = vld [vmem:[%s2504_s1 + $0x130] ss:$16 sps:$4 sm:$0xff]   ;;  %v1788_v50 = vld [vmem:[%s2504_s1 + $0x138] ss:$16 sps:$4 sm:$0xff]  }
  0x11   :  { %v1791_v53 = vld [vmem:[%s2504_s1 + $0x150] ss:$16 sps:$4 sm:$0xff]   ;;  %v1794_v54 = vld [vmem:[%s2504_s1 + $0x158] ss:$16 sps:$4 sm:$0xff]   ;;  %v1799_v55 = vld [vmem:[%s2504_s1 + $0x174] ss:$16 sps:$4 sm:$0xff]  }
  0x12   :  { %v1802_v56 = vld [vmem:[%s2504_s1 + $0x17c] ss:$16 sps:$4 sm:$0xff]   ;;  %v1797_v57 = vld [vmem:[%s2504_s1 + $0x170] ss:$16 sps:$4 sm:$0xff]   ;;  %v1800_v58 = vld [vmem:[%s2504_s1 + $0x178] ss:$16 sps:$4 sm:$0xff]  }
  0x13   :  { %280 = vmatpush1.bf16.msra.mxu0 %v1752_v18  ;;  %323 = vmatpush1.bf16.msra.mxu1 %v1753_v19  ;;  %v1805_v59 = vld [vmem:[%s2504_s1 + $0x194] ss:$16 sps:$4 sm:$0xff]   ;;  %v1808_v60 = vld [vmem:[%s2504_s1 + $0x19c] ss:$16 sps:$4 sm:$0xff]   ;;  %v1803_v61 = vld [vmem:[%s2504_s1 + $0x190] ss:$16 sps:$4 sm:$0xff]  }
  0x14   :  { %281 = vmatprep.subr.bf16.mxu0 %v1754_v20  ;;  %324 = vmatprep.subr.bf16.mxu1 %v1756_v21  ;;  %v1806_v62 = vld [vmem:[%s2504_s1 + $0x198] ss:$16 sps:$4 sm:$0xff]   ;;  %v1811_v63 = vld [vmem:[%s2504_s1 + $0x1b4] ss:$16 sps:$4 sm:$0xff]   ;;  %v1814_v0 = vld [vmem:[%s2504_s1 + $0x1bc] ss:$16 sps:$4 sm:$0xff]  }
  0x15   :  { %v1809_v1 = vld [vmem:[%s2504_s1 + $0x1b0] ss:$16 sps:$4 sm:$0xff]   ;;  %v1812_v2 = vld [vmem:[%s2504_s1 + $0x1b8] ss:$16 sps:$4 sm:$0xff]   ;;  %v1817_v3 = vld [vmem:[%s2504_s1 + $0x1d4] ss:$16 sps:$4 sm:$0xff]  }
  0x16   :  { %v1820_v4 = vld [vmem:[%s2504_s1 + $0x1dc] ss:$16 sps:$4 sm:$0xff]   ;;  %v1815_v5 = vld [vmem:[%s2504_s1 + $0x1d0] ss:$16 sps:$4 sm:$0xff]   ;;  %v1818_v6 = vld [vmem:[%s2504_s1 + $0x1d8] ss:$16 sps:$4 sm:$0xff]  }
  0x17   :  { %282 = vmatpush1.bf16.msra.mxu0 %v1758_v22  ;;  %325 = vmatpush1.bf16.msra.mxu1 %v1759_v23  ;;  %v1823_v7 = vld [vmem:[%s2504_s1 + $0x1f4] ss:$16 sps:$4 sm:$0xff]   ;;  %v1826_v8 = vld [vmem:[%s2504_s1 + $0x1fc] ss:$16 sps:$4 sm:$0xff]   ;;  %v1821_v9 = vld [vmem:[%s2504_s1 + $0x1f0] ss:$16 sps:$4 sm:$0xff]  }
  0x18   :  { %283 = vmatprep.subr.bf16.mxu0 %v1760_v24  ;;  %326 = vmatprep.subr.bf16.mxu1 %v1762_v25  ;;  %v1824_v10 = vld [vmem:[%s2504_s1 + $0x1f8] ss:$16 sps:$4 sm:$0xff]   ;;  %v1829_v11 = vld [vmem:[%s2504_s1 + $0x214] ss:$16 sps:$4 sm:$0xff]   ;;  %v1832_v12 = vld [vmem:[%s2504_s1 + $0x21c] ss:$16 sps:$4 sm:$0xff]  }
  0x19   :  { %v1827_v13 = vld [vmem:[%s2504_s1 + $0x210] ss:$16 sps:$4 sm:$0xff]   ;;  %v1830_v14 = vld [vmem:[%s2504_s1 + $0x218] ss:$16 sps:$4 sm:$0xff]   ;;  %v1835_v15 = vld [vmem:[%s2504_s1 + $0x234] ss:$16 sps:$4 sm:$0xff]  }
  0x1a   :  { %v1838_v16 = vld [vmem:[%s2504_s1 + $0x23c] ss:$16 sps:$4 sm:$0xff]   ;;  %v1504_v17 = vld [vmem:[%s2504_s1 + $0x250] sm:$0x77]  ;;  %v1836_v20 = vld [vmem:[%s2504_s1 + $0x238] ss:$16 sps:$4 sm:$0xff]  }
  0x1b   :  { %284 = vmatpush1.bf16.msra.mxu0 %v1764_v26  ;;  %327 = vmatpush1.bf16.msra.mxu1 %v1765_v27  ;;  %v1505_v18 = vld [vmem:[%s2504_s1 + $0x258] sm:$0x77]  ;;  %v1833_v19 = vld [vmem:[%s2504_s1 + $0x230] ss:$16 sps:$4 sm:$0xff]   ;;  %v1543_v21 = vcombine.high %v1504_v17, %v1504_v17  ;;  %v1542_v23 = vcombine.low %v1504_v17, %v1504_v17  ;;  %v1845_v25 = vld [vmem:[%s2504_s1 + $0x264] ss:$16 sps:$4 sm:$0xff]  }
  0x1c   :  { %285 = vmatprep.subr.bf16.mxu0 %v1766_v28  ;;  %328 = vmatprep.subr.bf16.mxu1 %v1768_v29  ;;  %v1545_v22 = vcombine.high %v1505_v18, %v1505_v18  ;;  %v1544_v24 = vcombine.low %v1505_v18, %v1505_v18  ;;  %v1848_v28 = vld [vmem:[%s2504_s1 + $0x26c] ss:$16 sps:$4 sm:$0xff]   ;;  %v1843_v29 = vld [vmem:[%s2504_s1 + $0x260] ss:$16 sps:$4 sm:$0xff]   ;;  %v1852_v35 = vld [vmem:[%s2504_s1 + $0x288] ss:$16 sps:$4 sm:$0xff]  }
  0x1d   :  { %v587_v26 = vsel %vm258_vm1, %v1542_v23, 0  ;;  %v1857_v36 = vld [vmem:[%s2504_s1 + $0x2a4] ss:$16 sps:$4 sm:$0xff]   ;;  %v1858_v39 = vld [vmem:[%s2504_s1 + $0x2a8] ss:$16 sps:$4 sm:$0xff]  }
  0x1e   :  { %v593_v27 = vsel %vm258_vm1, %v1544_v24, 0  ;;  %v1861_v42 = vld [vmem:[%s2504_s1 + $0x2c0] ss:$16 sps:$4 sm:$0xff]   ;;  %v1870_v47 = vld [vmem:[%s2504_s1 + $0x2e8] ss:$16 sps:$4 sm:$0xff]  }
  0x1f   :  { %286 = vmatpush1.bf16.msra.mxu0 %v1770_v31  ;;  %329 = vmatpush1.bf16.msra.mxu1 %v1771_v32  ;;  %v1846_v31 = vld [vmem:[%s2504_s1 + $0x268] ss:$16 sps:$4 sm:$0xff]   ;;  %v1851_v32 = vld [vmem:[%s2504_s1 + $0x284] ss:$16 sps:$4 sm:$0xff]   ;;  %v1907_v17 = vld [vmem:[%s2504_s1 + $0x3b0] ss:$16 sps:$4 sm:$0xff]  }
  0x20   :  { %287 = vmatprep.subr.bf16.mxu0 %v1772_v33  ;;  %330 = vmatprep.subr.bf16.mxu1 %v1774_v34  ;;  %v1854_v33 = vld [vmem:[%s2504_s1 + $0x28c] ss:$16 sps:$4 sm:$0xff]   ;;  %v1849_v34 = vld [vmem:[%s2504_s1 + $0x280] ss:$16 sps:$4 sm:$0xff]   ;;  %v1910_v18 = vld [vmem:[%s2504_s1 + $0x3b8] ss:$16 sps:$4 sm:$0xff]  }
  0x21   :  { %v1921_v23 = vld [vmem:[%s2504_s1 + $0x3f4] ss:$16 sps:$4 sm:$0xff]   ;;  %v1919_v24 = vld [vmem:[%s2504_s1 + $0x3f0] ss:$16 sps:$4 sm:$0xff]  }
  0x23   :  { %288 = vmatpush1.bf16.msra.mxu0 %v1776_v37  ;;  %331 = vmatpush1.bf16.msra.mxu1 %v1777_v38  ;;  %v1860_v37 = vld [vmem:[%s2504_s1 + $0x2ac] ss:$16 sps:$4 sm:$0xff]   ;;  %v1855_v38 = vld [vmem:[%s2504_s1 + $0x2a0] ss:$16 sps:$4 sm:$0xff]  }
  0x24   :  { %1464 = vmatprep.subr.msk.bf16.mxu0 %vm258_vm1, %v1461_v40  ;;  %1466 = vmatprep.subr.msk.bf16.mxu1 %vm258_vm1, %v1463_v41  ;;  %v1863_v40 = vld [vmem:[%s2504_s1 + $0x2c4] ss:$16 sps:$4 sm:$0xff]   ;;  %v1866_v41 = vld [vmem:[%s2504_s1 + $0x2cc] ss:$16 sps:$4 sm:$0xff]  }
  0x27   :  { %290 = vmatpush1.bf16.msra.mxu0 %v260_v43  ;;  %333 = vmatpush1.bf16.msra.mxu1 %v266_v44  ;;  %v1864_v43 = vld [vmem:[%s2504_s1 + $0x2c8] ss:$16 sps:$4 sm:$0xff]   ;;  %v1869_v44 = vld [vmem:[%s2504_s1 + $0x2e4] ss:$16 sps:$4 sm:$0xff]  }
  0x28   :  { %598 = vmatprep.subr.bf16.mxu0 %v1787_v45  ;;  %641 = vmatprep.subr.bf16.mxu1 %v1790_v46  ;;  %v1872_v45 = vld [vmem:[%s2504_s1 + $0x2ec] ss:$16 sps:$4 sm:$0xff]   ;;  %v1867_v46 = vld [vmem:[%s2504_s1 + $0x2e0] ss:$16 sps:$4 sm:$0xff]  }
  0x2a   :  { %304 = vmatmul.mubr.bf16.vlgmr.msra.gmra.mrb[0].mxu0 %v2116_v48  ;;  %347 = vmatmul.mubr.bf16.vlgmr.msra.gmra.mrb[0].mxu1 %v2116_v48 }
  0x2b   :  { %599 = vmatpush1.bf16.msra.mxu0 %v1785_v49  ;;  %642 = vmatpush1.bf16.msra.mxu1 %v1788_v50  ;;  %v1875_v49 = vld [vmem:[%s2504_s1 + $0x304] ss:$16 sps:$4 sm:$0xff]   ;;  %v1878_v50 = vld [vmem:[%s2504_s1 + $0x30c] ss:$16 sps:$4 sm:$0xff]  }
  0x2c   :  { %600 = vmatprep.subr.bf16.mxu0 %v1793_v51  ;;  %643 = vmatprep.subr.bf16.mxu1 %v1796_v52  ;;  %v1873_v51 = vld [vmem:[%s2504_s1 + $0x300] ss:$16 sps:$4 sm:$0xff]   ;;  %v1876_v52 = vld [vmem:[%s2504_s1 + $0x308] ss:$16 sps:$4 sm:$0xff]  }
  0x2d   :  { %1547 = vmatprep.mubr.msk.bf16.mxu0 %vm254_vm0, %v2073_v30  ;;  %1549 = vmatprep.mubr.msk.bf16.mxu1 %vm254_vm0, %v2073_v30 }
  0x2f   :  { %601 = vmatpush1.bf16.msra.mxu0 %v1791_v53  ;;  %644 = vmatpush1.bf16.msra.mxu1 %v1794_v54  ;;  %v1362_v53 = vld [vmem:[%s2506_s2] sm:$0xff] }
  0x30   :  { %602 = vmatprep.subr.bf16.mxu0 %v1799_v55  ;;  %645 = vmatprep.subr.bf16.mxu1 %v1802_v56  ;;  %v1881_v54 = vld [vmem:[%s2504_s1 + $0x324] ss:$16 sps:$4 sm:$0xff]   ;;  %v1884_v55 = vld [vmem:[%s2504_s1 + $0x32c] ss:$16 sps:$4 sm:$0xff]  }
  0x31   :  { %1366 = vperm.xlu0 %1723, %v1362_v53   ;;  %v1363_v56 = vld [vmem:[%s2506_s2 + $0x8] sm:$0xff] }
  0x33   :  { %603 = vmatpush1.bf16.msra.mxu0 %v1797_v57  ;;  %646 = vmatpush1.bf16.msra.mxu1 %v1800_v58  ;;  %v1879_v57 = vld [vmem:[%s2504_s1 + $0x320] ss:$16 sps:$4 sm:$0xff]   ;;  %v1882_v58 = vld [vmem:[%s2504_s1 + $0x328] ss:$16 sps:$4 sm:$0xff]  }
  0x34   :  { %604 = vmatprep.subr.bf16.mxu0 %v1805_v59  ;;  %647 = vmatprep.subr.bf16.mxu1 %v1808_v60  ;;  %v1887_v59 = vld [vmem:[%s2504_s1 + $0x344] ss:$16 sps:$4 sm:$0xff]   ;;  %v1890_v60 = vld [vmem:[%s2504_s1 + $0x34c] ss:$16 sps:$4 sm:$0xff]  }
  0x35   :  { %1371 = vperm.xlu0 %1723, %v1363_v56  }
  0x37   :  { %605 = vmatpush1.bf16.msra.mxu0 %v1803_v61  ;;  %648 = vmatpush1.bf16.msra.mxu1 %v1806_v62  ;;  %v1885_v61 = vld [vmem:[%s2504_s1 + $0x340] ss:$16 sps:$4 sm:$0xff]   ;;  %v1888_v62 = vld [vmem:[%s2504_s1 + $0x348] ss:$16 sps:$4 sm:$0xff]  }
  0x38   :  { %606 = vmatprep.subr.bf16.mxu0 %v1811_v63  ;;  %649 = vmatprep.subr.bf16.mxu1 %v1814_v0  ;;  %v1893_v63 = vld [vmem:[%s2504_s1 + $0x364] ss:$16 sps:$4 sm:$0xff]   ;;  %v1896_v0 = vld [vmem:[%s2504_s1 + $0x36c] ss:$16 sps:$4 sm:$0xff]  }
  0x3b   :  { %607 = vmatpush1.bf16.msra.mxu0 %v1809_v1  ;;  %650 = vmatpush1.bf16.msra.mxu1 %v1812_v2  ;;  %v1586_v1 = vld [vmem:[%s2504_s1 + $0x380] sm:$0x77]  ;;  %v1587_v2 = vld [vmem:[%s2504_s1 + $0x388] sm:$0x77] }
  0x3c   :  { %608 = vmatprep.subr.bf16.mxu0 %v1817_v3  ;;  %651 = vmatprep.subr.bf16.mxu1 %v1820_v4  ;;  %v1891_v3 = vld [vmem:[%s2504_s1 + $0x360] ss:$16 sps:$4 sm:$0xff]   ;;  %v1894_v4 = vld [vmem:[%s2504_s1 + $0x368] ss:$16 sps:$4 sm:$0xff]  }
  0x3f   :  { %609 = vmatpush1.bf16.msra.mxu0 %v1815_v5  ;;  %652 = vmatpush1.bf16.msra.mxu1 %v1818_v6  ;;  %v1625_v5 = vcombine.high %v1586_v1, %v1586_v1  ;;  %v1627_v6 = vcombine.high %v1587_v2, %v1587_v2 }
  0x40   :  { %610 = vmatprep.subr.bf16.mxu0 %v1823_v7  ;;  %653 = vmatprep.subr.bf16.mxu1 %v1826_v8  ;;  %v1624_v7 = vcombine.low %v1586_v1, %v1586_v1  ;;  %v1626_v8 = vcombine.low %v1587_v2, %v1587_v2 }
  0x43   :  { %611 = vmatpush1.bf16.msra.mxu0 %v1821_v9  ;;  %654 = vmatpush1.bf16.msra.mxu1 %v1824_v10  ;;  %v922_v9 = vsel %vm258_vm1, %v1624_v7, 0  ;;  %v928_v10 = vsel %vm258_vm1, %v1626_v8, 0 }
  0x44   :  { %612 = vmatprep.subr.bf16.mxu0 %v1829_v11  ;;  %655 = vmatprep.subr.bf16.mxu1 %v1832_v12  ;;  %v1903_v11 = vld [vmem:[%s2504_s1 + $0x394] ss:$16 sps:$4 sm:$0xff]   ;;  %v1906_v12 = vld [vmem:[%s2504_s1 + $0x39c] ss:$16 sps:$4 sm:$0xff]  }
  0x47   :  { %613 = vmatpush1.bf16.msra.mxu0 %v1827_v13  ;;  %656 = vmatpush1.bf16.msra.mxu1 %v1830_v14  ;;  %v1901_v13 = vld [vmem:[%s2504_s1 + $0x390] ss:$16 sps:$4 sm:$0xff]   ;;  %v1904_v14 = vld [vmem:[%s2504_s1 + $0x398] ss:$16 sps:$4 sm:$0xff]  }
  0x48   :  { %614 = vmatprep.subr.bf16.mxu0 %v1835_v15  ;;  %657 = vmatprep.subr.bf16.mxu1 %v1838_v16  ;;  %v1909_v15 = vld [vmem:[%s2504_s1 + $0x3b4] ss:$16 sps:$4 sm:$0xff]   ;;  %v1912_v16 = vld [vmem:[%s2504_s1 + $0x3bc] ss:$16 sps:$4 sm:$0xff]  }
  0x4b   :  { %615 = vmatpush1.bf16.msra.mxu0 %v1833_v19  ;;  %658 = vmatpush1.bf16.msra.mxu1 %v1836_v20  ;;  %v1915_v19 = vld [vmem:[%s2504_s1 + $0x3d4] ss:$16 sps:$4 sm:$0xff]   ;;  %v1918_v20 = vld [vmem:[%s2504_s1 + $0x3dc] ss:$16 sps:$4 sm:$0xff]  }
  0x4c   :  { %1546 = vmatprep.subr.msk.bf16.mxu0 %vm258_vm1, %v1543_v21  ;;  %1548 = vmatprep.subr.msk.bf16.mxu1 %vm258_vm1, %v1545_v22  ;;  %v1913_v21 = vld [vmem:[%s2504_s1 + $0x3d0] ss:$16 sps:$4 sm:$0xff]   ;;  %v1916_v22 = vld [vmem:[%s2504_s1 + $0x3d8] ss:$16 sps:$4 sm:$0xff]  }
  0x4f   :  { %617 = vmatpush1.bf16.msra.mxu0 %v587_v26  ;;  %660 = vmatpush1.bf16.msra.mxu1 %v593_v27  ;;  %v1927_v26 = vld [vmem:[%s2504_s1 + $0x414] ss:$16 sps:$4 sm:$0xff]   ;;  %v1930_v27 = vld [vmem:[%s2504_s1 + $0x41c] ss:$16 sps:$4 sm:$0xff]  }
  0x50   :  { %933 = vmatprep.subr.bf16.mxu0 %v1845_v25  ;;  %976 = vmatprep.subr.bf16.mxu1 %v1848_v28  ;;  %v1922_v25 = vld [vmem:[%s2504_s1 + $0x3f8] ss:$16 sps:$4 sm:$0xff]   ;;  %v1925_v28 = vld [vmem:[%s2504_s1 + $0x410] ss:$16 sps:$4 sm:$0xff]  }
  0x52   :  { %631 = vmatmul.mubr.bf16.vlgmr.msra.gmra.mrb[4].mxu0 %v2116_v48  ;;  %674 = vmatmul.mubr.bf16.vlgmr.msra.gmra.mrb[4].mxu1 %v2116_v48 }
  0x53   :  { %934 = vmatpush1.bf16.msra.mxu0 %v1843_v29  ;;  %977 = vmatpush1.bf16.msra.mxu1 %v1846_v31  ;;  %v1928_v29 = vld [vmem:[%s2504_s1 + $0x418] ss:$16 sps:$4 sm:$0xff]   ;;  %v1933_v31 = vld [vmem:[%s2504_s1 + $0x434] ss:$16 sps:$4 sm:$0xff]  }
  0x54   :  { %935 = vmatprep.subr.bf16.mxu0 %v1851_v32  ;;  %978 = vmatprep.subr.bf16.mxu1 %v1854_v33  ;;  %v1936_v32 = vld [vmem:[%s2504_s1 + $0x43c] ss:$16 sps:$4 sm:$0xff]   ;;  %v1931_v33 = vld [vmem:[%s2504_s1 + $0x430] ss:$16 sps:$4 sm:$0xff]  }
  0x55   :  { %1629 = vmatprep.mubr.msk.bf16.mxu0 %vm254_vm0, %v2073_v30  ;;  %1631 = vmatprep.mubr.msk.bf16.mxu1 %vm254_vm0, %v2073_v30 }
  0x57   :  { %936 = vmatpush1.bf16.msra.mxu0 %v1849_v34  ;;  %979 = vmatpush1.bf16.msra.mxu1 %v1852_v35  ;;  %v1934_v34 = vld [vmem:[%s2504_s1 + $0x438] ss:$16 sps:$4 sm:$0xff]   ;;  %v1939_v35 = vld [vmem:[%s2504_s1 + $0x454] ss:$16 sps:$4 sm:$0xff]  }
  0x58   :  { %937 = vmatprep.subr.bf16.mxu0 %v1857_v36  ;;  %980 = vmatprep.subr.bf16.mxu1 %v1860_v37  ;;  %v1942_v36 = vld [vmem:[%s2504_s1 + $0x45c] ss:$16 sps:$4 sm:$0xff]   ;;  %v1937_v37 = vld [vmem:[%s2504_s1 + $0x450] ss:$16 sps:$4 sm:$0xff]  }
  0x5b   :  { %938 = vmatpush1.bf16.msra.mxu0 %v1855_v38  ;;  %981 = vmatpush1.bf16.msra.mxu1 %v1858_v39  ;;  %v1940_v38 = vld [vmem:[%s2504_s1 + $0x458] ss:$16 sps:$4 sm:$0xff]   ;;  %v1945_v39 = vld [vmem:[%s2504_s1 + $0x474] ss:$16 sps:$4 sm:$0xff]  }
  0x5c   :  { %939 = vmatprep.subr.bf16.mxu0 %v1863_v40  ;;  %982 = vmatprep.subr.bf16.mxu1 %v1866_v41  ;;  %v1948_v40 = vld [vmem:[%s2504_s1 + $0x47c] ss:$16 sps:$4 sm:$0xff]   ;;  %v1943_v41 = vld [vmem:[%s2504_s1 + $0x470] ss:$16 sps:$4 sm:$0xff]  }
  0x5f   :  { %940 = vmatpush1.bf16.msra.mxu0 %v1861_v42  ;;  %983 = vmatpush1.bf16.msra.mxu1 %v1864_v43  ;;  %v1946_v42 = vld [vmem:[%s2504_s1 + $0x478] ss:$16 sps:$4 sm:$0xff]   ;;  %v1951_v43 = vld [vmem:[%s2504_s1 + $0x494] ss:$16 sps:$4 sm:$0xff]  }
  0x60   :  { %941 = vmatprep.subr.bf16.mxu0 %v1869_v44  ;;  %984 = vmatprep.subr.bf16.mxu1 %v1872_v45  ;;  %v1954_v44 = vld [vmem:[%s2504_s1 + $0x49c] ss:$16 sps:$4 sm:$0xff]   ;;  %v1668_v45 = vld [vmem:[%s2504_s1 + $0x4b0] sm:$0x77] }
  0x63   :  { %942 = vmatpush1.bf16.msra.mxu0 %v1867_v46  ;;  %985 = vmatpush1.bf16.msra.mxu1 %v1870_v47  ;;  %v1669_v46 = vld [vmem:[%s2504_s1 + $0x4b8] sm:$0x77]  ;;  %v1949_v47 = vld [vmem:[%s2504_s1 + $0x490] ss:$16 sps:$4 sm:$0xff]  }
  0x64   :  { %943 = vmatprep.subr.bf16.mxu0 %v1875_v49  ;;  %986 = vmatprep.subr.bf16.mxu1 %v1878_v50  ;;  %v1952_v49 = vld [vmem:[%s2504_s1 + $0x498] ss:$16 sps:$4 sm:$0xff]   ;;  %v1707_v50 = vcombine.high %v1668_v45, %v1668_v45  ;;  %v1708_v53 = vcombine.low %v1669_v46, %v1669_v46 }
  0x67   :  { %944 = vmatpush1.bf16.msra.mxu0 %v1873_v51  ;;  %987 = vmatpush1.bf16.msra.mxu1 %v1876_v52  ;;  %v1709_v51 = vcombine.high %v1669_v46, %v1669_v46  ;;  %v1706_v52 = vcombine.low %v1668_v45, %v1668_v45 }
  0x68   :  { %945 = vmatprep.subr.bf16.mxu0 %v1881_v54  ;;  %988 = vmatprep.subr.bf16.mxu1 %v1884_v55  ;;  %v1263_v55 = vsel %vm258_vm1, %v1708_v53, 0 }
  0x69   :  { %v1257_v54 = vsel %vm258_vm1, %v1706_v52, 0 }
  0x6b   :  { %946 = vmatpush1.bf16.msra.mxu0 %v1879_v57  ;;  %989 = vmatpush1.bf16.msra.mxu1 %v1882_v58 }
  0x6c   :  { %947 = vmatprep.subr.bf16.mxu0 %v1887_v59  ;;  %990 = vmatprep.subr.bf16.mxu1 %v1890_v60 }
  0x6f   :  { %948 = vmatpush1.bf16.msra.mxu0 %v1885_v61  ;;  %991 = vmatpush1.bf16.msra.mxu1 %v1888_v62 }
  0x70   :  { %949 = vmatprep.subr.bf16.mxu0 %v1893_v63  ;;  %992 = vmatprep.subr.bf16.mxu1 %v1896_v0 }
  0x73   :  { %950 = vmatpush1.bf16.msra.mxu0 %v1891_v3  ;;  %993 = vmatpush1.bf16.msra.mxu1 %v1894_v4 }
  0x74   :  { %1628 = vmatprep.subr.msk.bf16.mxu0 %vm258_vm1, %v1625_v5  ;;  %1630 = vmatprep.subr.msk.bf16.mxu1 %vm258_vm1, %v1627_v6 }
  0x77   :  { %952 = vmatpush1.bf16.msra.mxu0 %v922_v9  ;;  %995 = vmatpush1.bf16.msra.mxu1 %v928_v10 }
  0x78   :  { %1268 = vmatprep.subr.bf16.mxu0 %v1903_v11  ;;  %1311 = vmatprep.subr.bf16.mxu1 %v1906_v12 }
  0x7a   :  { %966 = vmatmul.mubr.bf16.vlgmr.msra.gmra.mrb[8].mxu0 %v2116_v48  ;;  %1009 = vmatmul.mubr.bf16.vlgmr.msra.gmra.mrb[8].mxu1 %v2116_v48 }
  0x7b   :  { %1269 = vmatpush1.bf16.msra.mxu0 %v1901_v13  ;;  %1312 = vmatpush1.bf16.msra.mxu1 %v1904_v14 }
  0x7c   :  { %1270 = vmatprep.subr.bf16.mxu0 %v1909_v15  ;;  %1313 = vmatprep.subr.bf16.mxu1 %v1912_v16 }
  0x7d   :  { %1711 = vmatprep.mubr.msk.bf16.mxu0 %vm254_vm0, %v2073_v30  ;;  %1713 = vmatprep.mubr.msk.bf16.mxu1 %vm254_vm0, %v2073_v30  ;;  %v1924_v30 = vld [vmem:[%s2504_s1 + $0x3fc] ss:$16 sps:$4 sm:$0xff]  }
  0x7f   :  { %1271 = vmatpush1.bf16.msra.mxu0 %v1907_v17  ;;  %1314 = vmatpush1.bf16.msra.mxu1 %v1910_v18 }
  0x80   :  { %1272 = vmatprep.subr.bf16.mxu0 %v1915_v19  ;;  %1315 = vmatprep.subr.bf16.mxu1 %v1918_v20 }
  0x83   :  { %1273 = vmatpush1.bf16.msra.mxu0 %v1913_v21  ;;  %1316 = vmatpush1.bf16.msra.mxu1 %v1916_v22 }
  0x84   :  { %1274 = vmatprep.subr.bf16.mxu0 %v1921_v23  ;;  %1317 = vmatprep.subr.bf16.mxu1 %v1924_v30 }
  0x87   :  { %1275 = vmatpush1.bf16.msra.mxu0 %v1919_v24  ;;  %1318 = vmatpush1.bf16.msra.mxu1 %v1922_v25 }
  0x88   :  { %1276 = vmatprep.subr.bf16.mxu0 %v1927_v26  ;;  %1319 = vmatprep.subr.bf16.mxu1 %v1930_v27 }
  0x8b   :  { %1277 = vmatpush1.bf16.msra.mxu0 %v1925_v28  ;;  %1320 = vmatpush1.bf16.msra.mxu1 %v1928_v29 }
  0x8c   :  { %1278 = vmatprep.subr.bf16.mxu0 %v1933_v31  ;;  %1321 = vmatprep.subr.bf16.mxu1 %v1936_v32 }
  0x8f   :  { %1279 = vmatpush1.bf16.msra.mxu0 %v1931_v33  ;;  %1322 = vmatpush1.bf16.msra.mxu1 %v1934_v34 }
  0x90   :  { %1280 = vmatprep.subr.bf16.mxu0 %v1939_v35  ;;  %1323 = vmatprep.subr.bf16.mxu1 %v1942_v36 }
  0x93   :  { %1281 = vmatpush1.bf16.msra.mxu0 %v1937_v37  ;;  %1324 = vmatpush1.bf16.msra.mxu1 %v1940_v38 }
  0x94   :  { %1282 = vmatprep.subr.bf16.mxu0 %v1945_v39  ;;  %1325 = vmatprep.subr.bf16.mxu1 %v1948_v40 }
  0x97   :  { %1283 = vmatpush1.bf16.msra.mxu0 %v1943_v41  ;;  %1326 = vmatpush1.bf16.msra.mxu1 %v1946_v42 }
  0x98   :  { %1284 = vmatprep.subr.bf16.mxu0 %v1951_v43  ;;  %1327 = vmatprep.subr.bf16.mxu1 %v1954_v44 }
  0x9b   :  { %1285 = vmatpush1.bf16.msra.mxu0 %v1949_v47  ;;  %1328 = vmatpush1.bf16.msra.mxu1 %v1952_v49 }
  0x9c   :  { %1710 = vmatprep.subr.msk.bf16.mxu0 %vm258_vm1, %v1707_v50  ;;  %1712 = vmatprep.subr.msk.bf16.mxu1 %vm258_vm1, %v1709_v51 }
  0x9f   :  { %1287 = vmatpush1.bf16.msra.mxu0 %v1257_v54  ;;  %1330 = vmatpush1.bf16.msra.mxu1 %v1263_v55 }
  0xa2   :  { %1301 = vmatmul.mubr.bf16.vlgmr.msra.gmra.mrb[12].mxu0 %v2116_v48  ;;  %1344 = vmatmul.mubr.bf16.vlgmr.msra.gmra.mrb[12].mxu1 %v2116_v48 }
  0xb0   :  { %v1367_v31 = vpop.permute.xlu0 %1366 }
  0xb4   :  { %v1372_v49 = vpop.permute.xlu0 %1371 }
  0xfd   :  { %v305_v56 = vpop.f32.mrb[0].mxu0  ;;  %v348_v57 = vpop.f32.mrb[0].mxu1 }
  0xfe   :  { %v307_v58 = vpop.f32.mrb[1].mxu0  ;;  %v350_v59 = vpop.f32.mrb[1].mxu1 }
  0xff   :  { %v309_v60 = vpop.f32.mrb[2].mxu0  ;;  %v352_v61 = vpop.f32.mrb[2].mxu1 }
 0x100   :  { %v311_v62 = vpop.f32.mrb[3].mxu0  ;;  %v354_v63 = vpop.f32.mrb[3].mxu1 }
 0x125   :  { %v632_v0 = vpop.f32.mrb[4].mxu0  ;;  %v675_v1 = vpop.f32.mrb[4].mxu1 }
 0x126   :  { %v684_v2 = vmax.f32 %v305_v56, %v632_v0  ;;  %v686_v3 = vmax.f32 %v348_v57, %v675_v1  ;;  %v634_v4 = vpop.f32.mrb[5].mxu0  ;;  %v677_v5 = vpop.f32.mrb[5].mxu1 }
 0x127   :  { %v685_v6 = vmax.f32 %v307_v58, %v634_v4  ;;  %v687_v7 = vmax.f32 %v350_v59, %v677_v5  ;;  %v636_v8 = vpop.f32.mrb[6].mxu0  ;;  %v679_v9 = vpop.f32.mrb[6].mxu1 }
 0x128   :  { %v688_v10 = vmax.f32 %v309_v60, %v636_v8  ;;  %v690_v48 = vmax.f32 %v352_v61, %v679_v9  ;;  %v638_v11 = vpop.f32.mrb[7].mxu0  ;;  %v681_v12 = vpop.f32.mrb[7].mxu1 }
 0x129   :  { %v689_v13 = vmax.f32 %v311_v62, %v638_v11  ;;  %v691_v14 = vmax.f32 %v354_v63, %v681_v12 }
 0x14d   :  { %v967_v15 = vpop.f32.mrb[8].mxu0  ;;  %v1010_v16 = vpop.f32.mrb[8].mxu1 }
 0x14e   :  { %v1019_v17 = vmax.f32 %v684_v2, %v967_v15  ;;  %v1021_v18 = vmax.f32 %v686_v3, %v1010_v16  ;;  %v969_v19 = vpop.f32.mrb[9].mxu0  ;;  %v1012_v20 = vpop.f32.mrb[9].mxu1 }
 0x14f   :  { %v1020_v21 = vmax.f32 %v685_v6, %v969_v19  ;;  %v1022_v22 = vmax.f32 %v687_v7, %v1012_v20  ;;  %v971_v23 = vpop.f32.mrb[10].mxu0  ;;  %v1014_v30 = vpop.f32.mrb[10].mxu1 }
 0x150   :  { %v1023_v24 = vmax.f32 %v688_v10, %v971_v23  ;;  %v1025_v25 = vmax.f32 %v690_v48, %v1014_v30  ;;  %v973_v26 = vpop.f32.mrb[11].mxu0  ;;  %v1016_v27 = vpop.f32.mrb[11].mxu1 }
 0x151   :  { %v1024_v28 = vmax.f32 %v689_v13, %v973_v26  ;;  %v1026_v29 = vmax.f32 %v691_v14, %v1016_v27 }
 0x175   :  { %v1302_v32 = vpop.f32.mrb[12].mxu0  ;;  %v1345_v33 = vpop.f32.mrb[12].mxu1 }
 0x176   :  { %v1354_v34 = vmax.f32 %v1019_v17, %v1302_v32  ;;  %v1356_v35 = vmax.f32 %v1021_v18, %v1345_v33  ;;  %v1304_v36 = vpop.f32.mrb[13].mxu0  ;;  %v1347_v37 = vpop.f32.mrb[13].mxu1 }
 0x177   :  { %v1355_v38 = vmax.f32 %v1020_v21, %v1304_v36  ;;  %v1357_v39 = vmax.f32 %v1022_v22, %v1347_v37  ;;  %v1306_v40 = vpop.f32.mrb[14].mxu0  ;;  %v1349_v41 = vpop.f32.mrb[14].mxu1 }
 0x178   :  { %v1374_v42 = vadd.f32 %v1367_v31, %v1354_v34  ;;  %v1376_v43 = vadd.f32 %v1367_v31, %v1356_v35  ;;  %v1358_v44 = vmax.f32 %v1023_v24, %v1306_v40  ;;  %v1360_v45 = vmax.f32 %v1025_v25, %v1349_v41  ;;  %v1308_v46 = vpop.f32.mrb[15].mxu0  ;;  %v1351_v47 = vpop.f32.mrb[15].mxu1 }
 0x179   :  { %v1375_v50 = vadd.f32 %v1367_v31, %v1355_v38  ;;  %v1377_v51 = vadd.f32 %v1367_v31, %v1357_v39  ;;  %v1359_v52 = vmax.f32 %v1024_v28, %v1308_v46  ;;  %v1361_v53 = vmax.f32 %v1026_v29, %v1351_v47 }
 0x17a   :  { %v1382_v54 = vmax.f32 %v1374_v42, 0.0  ;;  %v1384_v55 = vmax.f32 %v1376_v43, 0.0  ;;  %v1378_v56 = vadd.f32 %v1372_v49, %v1358_v44  ;;  %v1380_v57 = vadd.f32 %v1372_v49, %v1360_v45 }
 0x17b   :  { %v1383_v58 = vmax.f32 %v1375_v50, 0.0  ;;  %v1385_v59 = vmax.f32 %v1377_v51, 0.0  ;;  %v1379_v60 = vadd.f32 %v1372_v49, %v1359_v52  ;;  %v1381_v61 = vadd.f32 %v1372_v49, %v1361_v53 }
 0x17c   :  { %v1386_v62 = vmax.f32 %v1378_v56, 0.0  ;;  %v1388_v63 = vmax.f32 %v1380_v57, 0.0 }
 0x17d   :  { %v1718_v0 = vpack.c.bf16 %v1383_v58, %v1382_v54  ;;  %v1719_v1 = vpack.c.bf16 %v1385_v59, %v1384_v55  ;;  %v1387_v2 = vmax.f32 %v1379_v60, 0.0  ;;  %v1389_v3 = vmax.f32 %v1381_v61, 0.0 }
 0x17f   :  { %1414 = vst [vmem:[%s2507_s3] sm:$0xff] %v1718_v0  ;;  %1415 = vst [vmem:[%s2507_s3 + $0x8] sm:$0xff] %v1719_v1  ;;  %v1720_v4 = vpack.c.bf16 %v1387_v2, %v1386_v62  ;;  %v1721_v5 = vpack.c.bf16 %v1389_v3, %v1388_v63 }
 0x181   :  { %1416 = vst [vmem:[%s2507_s3 + $0x10] sm:$0xff] %v1720_v4  ;;  %1417 = vst [vmem:[%s2507_s3 + $0x18] sm:$0xff] %v1721_v5 }

// kernel: net2_forward.5
= control target key start
LH: loop header
LB: loop body
LE: loop exit
PB: predicated region body
PF: predicated region fallthrough
CT: control target
= control target key end

     0   :  { %v545_v36 = vlaneseq  ;;  %v5713_v37 = vmov 1966171168   ;;  %s7598_s0 = inlined_call_operand.vmem [shape: bf16[2,4096], index: 0, kind: input, shape index: {}]   ;;  %s7599_s1 = inlined_call_operand.vmem [shape: bf16[4096,256], index: 1, kind: input, shape index: {}]   ;;  %s7600_s2 = inlined_call_operand.vmem [shape: f32[1,256], index: 2, kind: input, shape index: {}]   ;;  %s7601_s3 = inlined_call_operand.vmem [shape: f32[256,64], index: 3, kind: input, shape index: {}]   ;;  %s7602_s4 = inlined_call_operand.vmem [shape: f32[1,64], index: 4, kind: input, shape index: {}]   ;;  %s7603_s5 = inlined_call_operand.vmem [shape: f32[64,36], index: 5, kind: input, shape index: {}]   ;;  %s7604_s6 = inlined_call_operand.vmem [shape: f32[1,36], index: 6, kind: input, shape index: {}]   ;;  %s7605_s7 = inlined_call_operand.hbm [shape: f32[2,36], index: 7, kind: output, shape index: {}]  }
   0x1   :  { %v4913_v0 = vld [vmem:[%s7599_s1 + $0x4] ss:$8 sps:$4 sm:$0xff]   ;;  %v4917_v2 = vld [vmem:[%s7599_s1] ss:$8 sps:$4 sm:$0xff]   ;;  %v4919_v4 = vld [vmem:[%s7599_s1 + $0x14] ss:$8 sps:$4 sm:$0xff]   ;;  %v561_v38 = vunpack.c.l.s4 %v5713_v37 }
   0x2   :  { %v4915_v1 = vld [vmem:[%s7599_s1 + $0x804] ss:$8 sps:$4 sm:$0xff]   ;;  %3347 = vmatprep.subr.bf16.mxu1 %v4913_v0  ;;  %v4918_v3 = vld [vmem:[%s7599_s1 + $0x800] ss:$8 sps:$4 sm:$0xff]   ;;  %v4921_v5 = vld [vmem:[%s7599_s1 + $0x814] ss:$8 sps:$4 sm:$0xff]  }
   0x3   :  { %3675 = vmatprep.subr.bf16.mxu0 %v4915_v1  ;;  %3348 = vmatpush1.bf16.msra.mxu1 %v4917_v2  ;;  %v4923_v6 = vld [vmem:[%s7599_s1 + $0x10] ss:$8 sps:$4 sm:$0xff]   ;;  %v4925_v8 = vld [vmem:[%s7599_s1 + $0x24] ss:$8 sps:$4 sm:$0xff]   ;;  %v4929_v10 = vld [vmem:[%s7599_s1 + $0x20] ss:$8 sps:$4 sm:$0xff]   ;;  %v562_v43 = vunpack.c.0.s8 %v561_v38 }
   0x4   :  { %3676 = vmatpush1.bf16.msra.mxu0 %v4918_v3  ;;  %3349 = vmatprep.subr.bf16.mxu1 %v4919_v4  ;;  %v4924_v7 = vld [vmem:[%s7599_s1 + $0x810] ss:$8 sps:$4 sm:$0xff]   ;;  %v4927_v9 = vld [vmem:[%s7599_s1 + $0x824] ss:$8 sps:$4 sm:$0xff]   ;;  %v4930_v11 = vld [vmem:[%s7599_s1 + $0x820] ss:$8 sps:$4 sm:$0xff]  }
   0x5   :  { %3677 = vmatprep.subr.bf16.mxu0 %v4921_v5  ;;  %v4931_v12 = vld [vmem:[%s7599_s1 + $0x34] ss:$8 sps:$4 sm:$0xff]   ;;  %v4935_v14 = vld [vmem:[%s7599_s1 + $0x30] ss:$8 sps:$4 sm:$0xff]   ;;  %v4937_v16 = vld [vmem:[%s7599_s1 + $0x44] ss:$8 sps:$4 sm:$0xff]  }
   0x6   :  { %v4933_v13 = vld [vmem:[%s7599_s1 + $0x834] ss:$8 sps:$4 sm:$0xff]   ;;  %v4936_v15 = vld [vmem:[%s7599_s1 + $0x830] ss:$8 sps:$4 sm:$0xff]   ;;  %v4939_v17 = vld [vmem:[%s7599_s1 + $0x844] ss:$8 sps:$4 sm:$0xff]  }
   0x7   :  { %3350 = vmatpush1.bf16.msra.mxu1 %v4923_v6  ;;  %v4941_v18 = vld [vmem:[%s7599_s1 + $0x40] ss:$8 sps:$4 sm:$0xff]   ;;  %v4943_v20 = vld [vmem:[%s7599_s1 + $0x54] ss:$8 sps:$4 sm:$0xff]   ;;  %v4947_v22 = vld [vmem:[%s7599_s1 + $0x50] ss:$8 sps:$4 sm:$0xff]  }
   0x8   :  { %3678 = vmatpush1.bf16.msra.mxu0 %v4924_v7  ;;  %3351 = vmatprep.subr.bf16.mxu1 %v4925_v8  ;;  %v4942_v19 = vld [vmem:[%s7599_s1 + $0x840] ss:$8 sps:$4 sm:$0xff]   ;;  %v4945_v21 = vld [vmem:[%s7599_s1 + $0x854] ss:$8 sps:$4 sm:$0xff]   ;;  %v4948_v23 = vld [vmem:[%s7599_s1 + $0x850] ss:$8 sps:$4 sm:$0xff]  }
   0x9   :  { %3679 = vmatprep.subr.bf16.mxu0 %v4927_v9  ;;  %v4949_v24 = vld [vmem:[%s7599_s1 + $0x64] ss:$8 sps:$4 sm:$0xff]   ;;  %v4953_v26 = vld [vmem:[%s7599_s1 + $0x60] ss:$8 sps:$4 sm:$0xff]   ;;  %v4955_v28 = vld [vmem:[%s7599_s1 + $0x74] ss:$8 sps:$4 sm:$0xff]  }
   0xa   :  { %v4951_v25 = vld [vmem:[%s7599_s1 + $0x864] ss:$8 sps:$4 sm:$0xff]   ;;  %v4954_v27 = vld [vmem:[%s7599_s1 + $0x860] ss:$8 sps:$4 sm:$0xff]   ;;  %v4957_v29 = vld [vmem:[%s7599_s1 + $0x874] ss:$8 sps:$4 sm:$0xff]  }
   0xb   :  { %3352 = vmatpush1.bf16.msra.mxu1 %v4929_v10  ;;  %v4959_v30 = vld [vmem:[%s7599_s1 + $0x70] ss:$8 sps:$4 sm:$0xff]   ;;  %v4961_v32 = vld [vmem:[%s7599_s1 + $0x84] ss:$8 sps:$4 sm:$0xff]   ;;  %v4965_v34 = vld [vmem:[%s7599_s1 + $0x80] ss:$8 sps:$4 sm:$0xff]  }
   0xc   :  { %3680 = vmatpush1.bf16.msra.mxu0 %v4930_v11  ;;  %3353 = vmatprep.subr.bf16.mxu1 %v4931_v12  ;;  %v4960_v31 = vld [vmem:[%s7599_s1 + $0x870] ss:$8 sps:$4 sm:$0xff]   ;;  %v4963_v33 = vld [vmem:[%s7599_s1 + $0x884] ss:$8 sps:$4 sm:$0xff]   ;;  %v4966_v35 = vld [vmem:[%s7599_s1 + $0x880] ss:$8 sps:$4 sm:$0xff]  }
   0xd   :  { %3681 = vmatprep.subr.bf16.mxu0 %v4933_v13  ;;  %v4967_v39 = vld [vmem:[%s7599_s1 + $0x94] ss:$8 sps:$4 sm:$0xff]   ;;  %v4971_v41 = vld [vmem:[%s7599_s1 + $0x90] ss:$8 sps:$4 sm:$0xff]   ;;  %v5875_v42 = vshrl.u32 %v545_v36, 7  ;;  %v5904_v52 = vld [vmem:[%s7598_s0] sm:$0xff] }
   0xe   :  { %v4969_v40 = vld [vmem:[%s7599_s1 + $0x894] ss:$8 sps:$4 sm:$0xff]   ;;  %v4972_v44 = vld [vmem:[%s7599_s1 + $0x890] ss:$8 sps:$4 sm:$0xff]   ;;  %v4973_v45 = vld [vmem:[%s7599_s1 + $0xa4] ss:$8 sps:$4 sm:$0xff]  }
   0xf   :  { %3354 = vmatpush1.bf16.msra.mxu1 %v4935_v14  ;;  %v4975_v46 = vld [vmem:[%s7599_s1 + $0x8a4] ss:$8 sps:$4 sm:$0xff]   ;;  %v4977_v47 = vld [vmem:[%s7599_s1 + $0xa0] ss:$8 sps:$4 sm:$0xff]   ;;  %v5893_v49 = vsub.s32 %v562_v43, %v5875_v42  ;;  %v4979_v50 = vld [vmem:[%s7599_s1 + $0xb4] ss:$8 sps:$4 sm:$0xff]  }
  0x10   :  { %3682 = vmatpush1.bf16.msra.mxu0 %v4936_v15  ;;  %3355 = vmatprep.subr.bf16.mxu1 %v4937_v16  ;;  %v4978_v48 = vld [vmem:[%s7599_s1 + $0x8a0] ss:$8 sps:$4 sm:$0xff]   ;;  %v4981_v51 = vld [vmem:[%s7599_s1 + $0x8b4] ss:$8 sps:$4 sm:$0xff]   ;;  %v4983_v53 = vld [vmem:[%s7599_s1 + $0xb0] ss:$8 sps:$4 sm:$0xff]  }
  0x11   :  { %3683 = vmatprep.subr.bf16.mxu0 %v4939_v17  ;;  %v566_v54 = vrot.slane %v5904_v52, %v5893_v49  ;;  %v4984_v55 = vld [vmem:[%s7599_s1 + $0x8b0] ss:$8 sps:$4 sm:$0xff]   ;;  %v4985_v57 = vld [vmem:[%s7599_s1 + $0xc4] ss:$8 sps:$4 sm:$0xff]   ;;  %v4989_v63 = vld [vmem:[%s7599_s1 + $0xc0] ss:$8 sps:$4 sm:$0xff]  }
  0x12   :  { %v5917_v56 = vld [vmem:[%s7598_s0 + $0x10] sm:$0xff]  ;;  %v4987_v58 = vld [vmem:[%s7599_s1 + $0x8c4] ss:$8 sps:$4 sm:$0xff]   ;;  %v4990_v0 = vld [vmem:[%s7599_s1 + $0x8c0] ss:$8 sps:$4 sm:$0xff]  }
  0x13   :  { %3356 = vmatpush1.bf16.msra.mxu1 %v4941_v18  ;;  %v574_v59 = vcombine.high %v566_v54, %v566_v54  ;;  %v664_v60 = vrot.slane %v5917_v56, %v5893_v49  ;;  %v4991_v1 = vld [vmem:[%s7599_s1 + $0xd4] ss:$8 sps:$4 sm:$0xff]   ;;  %v4995_v4 = vld [vmem:[%s7599_s1 + $0xd0] ss:$8 sps:$4 sm:$0xff]   ;;  %v4997_v6 = vld [vmem:[%s7599_s1 + $0xe4] ss:$8 sps:$4 sm:$0xff]   ;;  %v5978_v16 = vrot.slane %v566_v54, %v5893_v49 }
  0x14   :  { %3684 = vmatpush1.bf16.msra.mxu0 %v4942_v19  ;;  %3357 = vmatprep.subr.bf16.mxu1 %v4943_v20  ;;  %v4993_v2 = vld [vmem:[%s7599_s1 + $0x8d4] ss:$8 sps:$4 sm:$0xff]   ;;  %v4996_v5 = vld [vmem:[%s7599_s1 + $0x8d0] ss:$8 sps:$4 sm:$0xff]   ;;  %v4999_v7 = vld [vmem:[%s7599_s1 + $0x8e4] ss:$8 sps:$4 sm:$0xff]  }
  0x15   :  { %3685 = vmatprep.subr.bf16.mxu0 %v4945_v21  ;;  %v596_v61 = vrot.slane %v574_v59, %v5893_v49  ;;  %v672_v62 = vcombine.high %v664_v60, %v664_v60  ;;  %v5001_v8 = vld [vmem:[%s7599_s1 + $0xe0] ss:$8 sps:$4 sm:$0xff]   ;;  %v5003_v10 = vld [vmem:[%s7599_s1 + $0xf4] ss:$8 sps:$4 sm:$0xff]   ;;  %v5007_v12 = vld [vmem:[%s7599_s1 + $0xf0] ss:$8 sps:$4 sm:$0xff]   ;;  %v5981_v17 = vrot.slane %v664_v60, %v5893_v49 }
  0x16   :  { %v5002_v9 = vld [vmem:[%s7599_s1 + $0x8e0] ss:$8 sps:$4 sm:$0xff]   ;;  %v5005_v11 = vld [vmem:[%s7599_s1 + $0x8f4] ss:$8 sps:$4 sm:$0xff]   ;;  %v5008_v13 = vld [vmem:[%s7599_s1 + $0x8f0] ss:$8 sps:$4 sm:$0xff]  }
  0x17   :  { %3358 = vmatpush1.bf16.msra.mxu1 %v4947_v22  ;;  %v694_v3 = vrot.slane %v672_v62, %v5893_v49  ;;  %3379 = vmatprep.mubr.bf16.mxu1 %v596_v61  ;;  %v5012_v14 = vld [vmem:[%s7599_s1 + $0x104] ss:$8 sps:$4 sm:$0xff]   ;;  %v5010_v18 = vld [vmem:[%s7599_s1 + $0x100] ss:$8 sps:$4 sm:$0xff]   ;;  %v5019_v20 = vld [vmem:[%s7599_s1 + $0x114] ss:$8 sps:$4 sm:$0xff]   ;;  %v606_v22 = vcombine.high %v596_v61, %v596_v61 }
  0x18   :  { %3686 = vmatpush1.bf16.msra.mxu0 %v4948_v23  ;;  %3359 = vmatprep.subr.bf16.mxu1 %v4949_v24  ;;  %v5016_v15 = vld [vmem:[%s7599_s1 + $0x904] ss:$8 sps:$4 sm:$0xff]   ;;  %v5014_v19 = vld [vmem:[%s7599_s1 + $0x900] ss:$8 sps:$4 sm:$0xff]   ;;  %v5022_v21 = vld [vmem:[%s7599_s1 + $0x914] ss:$8 sps:$4 sm:$0xff]  }
  0x19   :  { %3687 = vmatprep.subr.bf16.mxu0 %v4951_v25  ;;  %3707 = vmatprep.mubr.bf16.mxu0 %v694_v3  ;;  %v704_v23 = vcombine.high %v694_v3, %v694_v3  ;;  %v5017_v24 = vld [vmem:[%s7599_s1 + $0x110] ss:$8 sps:$4 sm:$0xff]   ;;  %v5035_v36 = vld [vmem:[%s7599_s1 + $0x140] ss:$8 sps:$4 sm:$0xff]   ;;  %v5043_v38 = vld [vmem:[%s7599_s1 + $0x154] ss:$8 sps:$4 sm:$0xff]  }
  0x1a   :  { %v5020_v25 = vld [vmem:[%s7599_s1 + $0x910] ss:$8 sps:$4 sm:$0xff]   ;;  %v5038_v37 = vld [vmem:[%s7599_s1 + $0x940] ss:$8 sps:$4 sm:$0xff]   ;;  %v5049_v43 = vld [vmem:[%s7599_s1 + $0x164] ss:$8 sps:$4 sm:$0xff]  }
  0x1b   :  { %3360 = vmatpush1.bf16.msra.mxu1 %v4953_v26  ;;  %v5025_v26 = vld [vmem:[%s7599_s1 + $0x124] ss:$8 sps:$4 sm:$0xff]   ;;  %v5070_v59 = vld [vmem:[%s7599_s1 + $0x994] ss:$8 sps:$4 sm:$0xff]   ;;  %v5065_v60 = vld [vmem:[%s7599_s1 + $0x190] ss:$8 sps:$4 sm:$0xff]  }
  0x1c   :  { %3688 = vmatpush1.bf16.msra.mxu0 %v4954_v27  ;;  %3361 = vmatprep.subr.bf16.mxu1 %v4955_v28  ;;  %v5028_v27 = vld [vmem:[%s7599_s1 + $0x924] ss:$8 sps:$4 sm:$0xff]   ;;  %v5023_v28 = vld [vmem:[%s7599_s1 + $0x120] ss:$8 sps:$4 sm:$0xff]   ;;  %v5068_v61 = vld [vmem:[%s7599_s1 + $0x990] ss:$8 sps:$4 sm:$0xff]  }
  0x1d   :  { %3689 = vmatprep.subr.bf16.mxu0 %v4957_v29  ;;  %v5026_v29 = vld [vmem:[%s7599_s1 + $0x920] ss:$8 sps:$4 sm:$0xff]   ;;  %v5064_v54 = vld [vmem:[%s7599_s1 + $0x984] ss:$8 sps:$4 sm:$0xff]   ;;  %v5082_v3 = vld [vmem:[%s7599_s1 + $0x9b4] ss:$8 sps:$4 sm:$0xff]  }
  0x1e   :  { %v5073_v62 = vld [vmem:[%s7599_s1 + $0x1a4] ss:$8 sps:$4 sm:$0xff]  }
  0x1f   :  { %3362 = vmatpush1.bf16.msra.mxu1 %v4959_v30  ;;  %v5031_v30 = vld [vmem:[%s7599_s1 + $0x134] ss:$8 sps:$4 sm:$0xff]  }
  0x20   :  { %3690 = vmatpush1.bf16.msra.mxu0 %v4960_v31  ;;  %3363 = vmatprep.subr.bf16.mxu1 %v4961_v32  ;;  %v5034_v31 = vld [vmem:[%s7599_s1 + $0x934] ss:$8 sps:$4 sm:$0xff]   ;;  %v5029_v32 = vld [vmem:[%s7599_s1 + $0x130] ss:$8 sps:$4 sm:$0xff]  }
  0x21   :  { %3691 = vmatprep.subr.bf16.mxu0 %v4963_v33  ;;  %v5032_v33 = vld [vmem:[%s7599_s1 + $0x930] ss:$8 sps:$4 sm:$0xff]  }
  0x23   :  { %3364 = vmatpush1.bf16.msra.mxu1 %v4965_v34  ;;  %v5037_v34 = vld [vmem:[%s7599_s1 + $0x144] ss:$8 sps:$4 sm:$0xff]  }
  0x24   :  { %3692 = vmatpush1.bf16.msra.mxu0 %v4966_v35  ;;  %3365 = vmatprep.subr.bf16.mxu1 %v4967_v39  ;;  %v5040_v35 = vld [vmem:[%s7599_s1 + $0x944] ss:$8 sps:$4 sm:$0xff]   ;;  %v5046_v39 = vld [vmem:[%s7599_s1 + $0x954] ss:$8 sps:$4 sm:$0xff]  }
  0x25   :  { %3693 = vmatprep.subr.bf16.mxu0 %v4969_v40  ;;  %v5041_v40 = vld [vmem:[%s7599_s1 + $0x150] ss:$8 sps:$4 sm:$0xff]  }
  0x27   :  { %3366 = vmatpush1.bf16.msra.mxu1 %v4971_v41  ;;  %v5044_v41 = vld [vmem:[%s7599_s1 + $0x950] ss:$8 sps:$4 sm:$0xff]  }
  0x28   :  { %3694 = vmatpush1.bf16.msra.mxu0 %v4972_v44  ;;  %3367 = vmatprep.subr.bf16.mxu1 %v4973_v45  ;;  %v5052_v44 = vld [vmem:[%s7599_s1 + $0x964] ss:$8 sps:$4 sm:$0xff]   ;;  %v5047_v45 = vld [vmem:[%s7599_s1 + $0x160] ss:$8 sps:$4 sm:$0xff]  }
  0x29   :  { %3695 = vmatprep.subr.bf16.mxu0 %v4975_v46  ;;  %v5050_v46 = vld [vmem:[%s7599_s1 + $0x960] ss:$8 sps:$4 sm:$0xff]  }
  0x2b   :  { %3368 = vmatpush1.bf16.msra.mxu1 %v4977_v47  ;;  %v5055_v47 = vld [vmem:[%s7599_s1 + $0x174] ss:$8 sps:$4 sm:$0xff]  }
  0x2c   :  { %3696 = vmatpush1.bf16.msra.mxu0 %v4978_v48  ;;  %3369 = vmatprep.subr.bf16.mxu1 %v4979_v50  ;;  %v5058_v48 = vld [vmem:[%s7599_s1 + $0x974] ss:$8 sps:$4 sm:$0xff]   ;;  %v5053_v50 = vld [vmem:[%s7599_s1 + $0x170] ss:$8 sps:$4 sm:$0xff]  }
  0x2d   :  { %3697 = vmatprep.subr.bf16.mxu0 %v4981_v51  ;;  %v5056_v51 = vld [vmem:[%s7599_s1 + $0x970] ss:$8 sps:$4 sm:$0xff]  }
  0x2f   :  { %3370 = vmatpush1.bf16.msra.mxu1 %v4983_v53  ;;  %v5061_v53 = vld [vmem:[%s7599_s1 + $0x184] ss:$8 sps:$4 sm:$0xff]  }
  0x30   :  { %3698 = vmatpush1.bf16.msra.mxu0 %v4984_v55  ;;  %3371 = vmatprep.subr.bf16.mxu1 %v4985_v57  ;;  %v5059_v55 = vld [vmem:[%s7599_s1 + $0x180] ss:$8 sps:$4 sm:$0xff]  }
  0x31   :  { %3699 = vmatprep.subr.bf16.mxu0 %v4987_v58  ;;  %v5062_v57 = vld [vmem:[%s7599_s1 + $0x980] ss:$8 sps:$4 sm:$0xff]   ;;  %v5067_v58 = vld [vmem:[%s7599_s1 + $0x194] ss:$8 sps:$4 sm:$0xff]  }
  0x33   :  { %3372 = vmatpush1.bf16.msra.mxu1 %v4989_v63  ;;  %v5076_v63 = vld [vmem:[%s7599_s1 + $0x9a4] ss:$8 sps:$4 sm:$0xff]  }
  0x34   :  { %3700 = vmatpush1.bf16.msra.mxu0 %v4990_v0  ;;  %3373 = vmatprep.subr.bf16.mxu1 %v4991_v1  ;;  %v5071_v0 = vld [vmem:[%s7599_s1 + $0x1a0] ss:$8 sps:$4 sm:$0xff]  }
  0x35   :  { %3701 = vmatprep.subr.bf16.mxu0 %v4993_v2  ;;  %v5074_v1 = vld [vmem:[%s7599_s1 + $0x9a0] ss:$8 sps:$4 sm:$0xff]   ;;  %v5079_v2 = vld [vmem:[%s7599_s1 + $0x1b4] ss:$8 sps:$4 sm:$0xff]  }
  0x37   :  { %3374 = vmatpush1.bf16.msra.mxu1 %v4995_v4  ;;  %v5077_v4 = vld [vmem:[%s7599_s1 + $0x1b0] ss:$8 sps:$4 sm:$0xff]  }
  0x38   :  { %3702 = vmatpush1.bf16.msra.mxu0 %v4996_v5  ;;  %3375 = vmatprep.subr.bf16.mxu1 %v4997_v6  ;;  %v5080_v5 = vld [vmem:[%s7599_s1 + $0x9b0] ss:$8 sps:$4 sm:$0xff]   ;;  %v5085_v6 = vld [vmem:[%s7599_s1 + $0x1c4] ss:$8 sps:$4 sm:$0xff]  }
  0x39   :  { %3703 = vmatprep.subr.bf16.mxu0 %v4999_v7  ;;  %v5088_v7 = vld [vmem:[%s7599_s1 + $0x9c4] ss:$8 sps:$4 sm:$0xff]  }
  0x3b   :  { %3376 = vmatpush1.bf16.msra.mxu1 %v5001_v8  ;;  %v5083_v8 = vld [vmem:[%s7599_s1 + $0x1c0] ss:$8 sps:$4 sm:$0xff]  }
  0x3c   :  { %3704 = vmatpush1.bf16.msra.mxu0 %v5002_v9  ;;  %3377 = vmatprep.subr.bf16.mxu1 %v5003_v10  ;;  %v5086_v9 = vld [vmem:[%s7599_s1 + $0x9c0] ss:$8 sps:$4 sm:$0xff]   ;;  %v5091_v10 = vld [vmem:[%s7599_s1 + $0x1d4] ss:$8 sps:$4 sm:$0xff]  }
  0x3d   :  { %3705 = vmatprep.subr.bf16.mxu0 %v5005_v11  ;;  %v5094_v11 = vld [vmem:[%s7599_s1 + $0x9d4] ss:$8 sps:$4 sm:$0xff]  }
  0x3f   :  { %3378 = vmatpush1.bf16.msra.mxu1 %v5007_v12  ;;  %v5089_v12 = vld [vmem:[%s7599_s1 + $0x1d0] ss:$8 sps:$4 sm:$0xff]  }
  0x40   :  { %3706 = vmatpush1.bf16.msra.mxu0 %v5008_v13  ;;  %3388 = vmatprep.subr.bf16.mxu1 %v5012_v14  ;;  %v5092_v13 = vld [vmem:[%s7599_s1 + $0x9d0] ss:$8 sps:$4 sm:$0xff]   ;;  %v5097_v14 = vld [vmem:[%s7599_s1 + $0x1e4] ss:$8 sps:$4 sm:$0xff]  }
  0x41   :  { %3716 = vmatprep.subr.bf16.mxu0 %v5016_v15  ;;  %v5100_v15 = vld [vmem:[%s7599_s1 + $0x9e4] ss:$8 sps:$4 sm:$0xff]  }
  0x42   :  { %3380 = vmatmul.mubr.bf16.vlgmr.msra.gmra.mrb[0].mxu1 %v5978_v16 }
  0x43   :  { %3708 = vmatmul.mubr.bf16.vlgmr.msra.gmra.mrb[0].mxu0 %v5981_v17  ;;  %3389 = vmatpush1.bf16.msra.mxu1 %v5010_v18  ;;  %v559_v18 = vcombine.high %v5904_v52, %v5904_v52  ;;  %v5106_v52 = vld [vmem:[%s7599_s1 + $0x9f4] ss:$8 sps:$4 sm:$0xff]  }
  0x44   :  { %3717 = vmatpush1.bf16.msra.mxu0 %v5014_v19  ;;  %3390 = vmatprep.subr.bf16.mxu1 %v5019_v20  ;;  %v657_v19 = vcombine.high %v5917_v56, %v5917_v56  ;;  %v5095_v20 = vld [vmem:[%s7599_s1 + $0x1e0] ss:$8 sps:$4 sm:$0xff]  }
  0x45   :  { %3718 = vmatprep.subr.bf16.mxu0 %v5022_v21  ;;  %3420 = vmatprep.mubr.bf16.mxu1 %v606_v22  ;;  %v5098_v21 = vld [vmem:[%s7599_s1 + $0x9e0] ss:$8 sps:$4 sm:$0xff]   ;;  %v5103_v22 = vld [vmem:[%s7599_s1 + $0x1f4] ss:$8 sps:$4 sm:$0xff]   ;;  %v6170_v56 = vrot.slane %v559_v18, %v5893_v49  ;;  %v5173_v18 = vld [vmem:[%s7599_s1 + $0x2b0] ss:$8 sps:$4 sm:$0xff]  }
  0x46   :  { %3748 = vmatprep.mubr.bf16.mxu0 %v704_v23  ;;  %v6173_v23 = vrot.slane %v657_v19, %v5893_v49  ;;  %v5176_v19 = vld [vmem:[%s7599_s1 + $0xab0] ss:$8 sps:$4 sm:$0xff]  }
  0x47   :  { %3391 = vmatpush1.bf16.msra.mxu1 %v5017_v24  ;;  %v5101_v24 = vld [vmem:[%s7599_s1 + $0x1f0] ss:$8 sps:$4 sm:$0xff]  }
  0x48   :  { %3719 = vmatpush1.bf16.msra.mxu0 %v5020_v25  ;;  %3392 = vmatprep.subr.bf16.mxu1 %v5025_v26  ;;  %v5104_v25 = vld [vmem:[%s7599_s1 + $0x9f0] ss:$8 sps:$4 sm:$0xff]   ;;  %v5109_v26 = vld [vmem:[%s7599_s1 + $0x204] ss:$8 sps:$4 sm:$0xff]  }
  0x49   :  { %3720 = vmatprep.subr.bf16.mxu0 %v5028_v27  ;;  %v5112_v27 = vld [vmem:[%s7599_s1 + $0xa04] ss:$8 sps:$4 sm:$0xff]  }
  0x4b   :  { %3393 = vmatpush1.bf16.msra.mxu1 %v5023_v28  ;;  %v575_v28 = vcombine.high %v6170_v56, %v6170_v56 }
  0x4c   :  { %3721 = vmatpush1.bf16.msra.mxu0 %v5026_v29  ;;  %3394 = vmatprep.subr.bf16.mxu1 %v5031_v30  ;;  %v673_v29 = vcombine.high %v6173_v23, %v6173_v23  ;;  %v604_v30 = vcombine.high %v5978_v16, %v5978_v16  ;;  %v5118_v16 = vld [vmem:[%s7599_s1 + $0xa14] ss:$8 sps:$4 sm:$0xff]  }
  0x4d   :  { %3722 = vmatprep.subr.bf16.mxu0 %v5034_v31  ;;  %v702_v31 = vcombine.high %v5981_v17, %v5981_v17  ;;  %v6208_v17 = vrot.slane %v575_v28, %v5893_v49  ;;  %v5193_v28 = vld [vmem:[%s7599_s1 + $0x2e4] ss:$8 sps:$4 sm:$0xff]  }
  0x4f   :  { %3395 = vmatpush1.bf16.msra.mxu1 %v5029_v32  ;;  %v5107_v32 = vld [vmem:[%s7599_s1 + $0x200] ss:$8 sps:$4 sm:$0xff]  }
  0x50   :  { %3723 = vmatpush1.bf16.msra.mxu0 %v5032_v33  ;;  %3396 = vmatprep.subr.bf16.mxu1 %v5037_v34  ;;  %v5110_v33 = vld [vmem:[%s7599_s1 + $0xa00] ss:$8 sps:$4 sm:$0xff]   ;;  %v5115_v34 = vld [vmem:[%s7599_s1 + $0x214] ss:$8 sps:$4 sm:$0xff]  }
  0x51   :  { %3724 = vmatprep.subr.bf16.mxu0 %v5040_v35  ;;  %v6211_v35 = vrot.slane %v673_v29, %v5893_v49  ;;  %v5196_v29 = vld [vmem:[%s7599_s1 + $0xae4] ss:$8 sps:$4 sm:$0xff]  }
  0x53   :  { %3397 = vmatpush1.bf16.msra.mxu1 %v5035_v36  ;;  %v5113_v36 = vld [vmem:[%s7599_s1 + $0x210] ss:$8 sps:$4 sm:$0xff]  }
  0x54   :  { %3725 = vmatpush1.bf16.msra.mxu0 %v5038_v37  ;;  %3398 = vmatprep.subr.bf16.mxu1 %v5043_v38  ;;  %v5116_v37 = vld [vmem:[%s7599_s1 + $0xa10] ss:$8 sps:$4 sm:$0xff]   ;;  %v5121_v38 = vld [vmem:[%s7599_s1 + $0x224] ss:$8 sps:$4 sm:$0xff]  }
  0x55   :  { %3726 = vmatprep.subr.bf16.mxu0 %v5046_v39  ;;  %v5124_v39 = vld [vmem:[%s7599_s1 + $0xa24] ss:$8 sps:$4 sm:$0xff]  }
  0x57   :  { %3399 = vmatpush1.bf16.msra.mxu1 %v5041_v40  ;;  %v5119_v40 = vld [vmem:[%s7599_s1 + $0x220] ss:$8 sps:$4 sm:$0xff]  }
  0x58   :  { %3727 = vmatpush1.bf16.msra.mxu0 %v5044_v41  ;;  %3400 = vmatprep.subr.bf16.mxu1 %v5049_v43  ;;  %v5122_v41 = vld [vmem:[%s7599_s1 + $0xa20] ss:$8 sps:$4 sm:$0xff]   ;;  %v5127_v43 = vld [vmem:[%s7599_s1 + $0x234] ss:$8 sps:$4 sm:$0xff]  }
  0x59   :  { %3728 = vmatprep.subr.bf16.mxu0 %v5052_v44  ;;  %v5130_v44 = vld [vmem:[%s7599_s1 + $0xa34] ss:$8 sps:$4 sm:$0xff]  }
  0x5b   :  { %3401 = vmatpush1.bf16.msra.mxu1 %v5047_v45  ;;  %v5125_v45 = vld [vmem:[%s7599_s1 + $0x230] ss:$8 sps:$4 sm:$0xff]  }
  0x5c   :  { %3729 = vmatpush1.bf16.msra.mxu0 %v5050_v46  ;;  %3402 = vmatprep.subr.bf16.mxu1 %v5055_v47  ;;  %v5128_v46 = vld [vmem:[%s7599_s1 + $0xa30] ss:$8 sps:$4 sm:$0xff]   ;;  %v5133_v47 = vld [vmem:[%s7599_s1 + $0x244] ss:$8 sps:$4 sm:$0xff]  }
  0x5d   :  { %3730 = vmatprep.subr.bf16.mxu0 %v5058_v48  ;;  %v5136_v48 = vld [vmem:[%s7599_s1 + $0xa44] ss:$8 sps:$4 sm:$0xff]  }
  0x5f   :  { %3403 = vmatpush1.bf16.msra.mxu1 %v5053_v50  ;;  %v5131_v50 = vld [vmem:[%s7599_s1 + $0x240] ss:$8 sps:$4 sm:$0xff]  }
  0x60   :  { %3731 = vmatpush1.bf16.msra.mxu0 %v5056_v51  ;;  %3404 = vmatprep.subr.bf16.mxu1 %v5061_v53  ;;  %v5134_v51 = vld [vmem:[%s7599_s1 + $0xa40] ss:$8 sps:$4 sm:$0xff]   ;;  %v5139_v53 = vld [vmem:[%s7599_s1 + $0x254] ss:$8 sps:$4 sm:$0xff]  }
  0x61   :  { %3732 = vmatprep.subr.bf16.mxu0 %v5064_v54  ;;  %v5142_v54 = vld [vmem:[%s7599_s1 + $0xa54] ss:$8 sps:$4 sm:$0xff]  }
  0x63   :  { %3405 = vmatpush1.bf16.msra.mxu1 %v5059_v55  ;;  %v5137_v55 = vld [vmem:[%s7599_s1 + $0x250] ss:$8 sps:$4 sm:$0xff]  }
  0x64   :  { %3733 = vmatpush1.bf16.msra.mxu0 %v5062_v57  ;;  %3406 = vmatprep.subr.bf16.mxu1 %v5067_v58  ;;  %v5140_v57 = vld [vmem:[%s7599_s1 + $0xa50] ss:$8 sps:$4 sm:$0xff]   ;;  %v5145_v58 = vld [vmem:[%s7599_s1 + $0x264] ss:$8 sps:$4 sm:$0xff]  }
  0x65   :  { %3734 = vmatprep.subr.bf16.mxu0 %v5070_v59  ;;  %v5148_v59 = vld [vmem:[%s7599_s1 + $0xa64] ss:$8 sps:$4 sm:$0xff]  }
  0x67   :  { %3407 = vmatpush1.bf16.msra.mxu1 %v5065_v60  ;;  %v5143_v60 = vld [vmem:[%s7599_s1 + $0x260] ss:$8 sps:$4 sm:$0xff]  }
  0x68   :  { %3735 = vmatpush1.bf16.msra.mxu0 %v5068_v61  ;;  %3408 = vmatprep.subr.bf16.mxu1 %v5073_v62  ;;  %v5146_v61 = vld [vmem:[%s7599_s1 + $0xa60] ss:$8 sps:$4 sm:$0xff]   ;;  %v5151_v62 = vld [vmem:[%s7599_s1 + $0x274] ss:$8 sps:$4 sm:$0xff]  }
  0x69   :  { %3736 = vmatprep.subr.bf16.mxu0 %v5076_v63  ;;  %v5154_v63 = vld [vmem:[%s7599_s1 + $0xa74] ss:$8 sps:$4 sm:$0xff]  }
  0x6b   :  { %3409 = vmatpush1.bf16.msra.mxu1 %v5071_v0  ;;  %v5149_v0 = vld [vmem:[%s7599_s1 + $0x270] ss:$8 sps:$4 sm:$0xff]  }
  0x6c   :  { %3737 = vmatpush1.bf16.msra.mxu0 %v5074_v1  ;;  %3410 = vmatprep.subr.bf16.mxu1 %v5079_v2  ;;  %v5152_v1 = vld [vmem:[%s7599_s1 + $0xa70] ss:$8 sps:$4 sm:$0xff]   ;;  %v5157_v2 = vld [vmem:[%s7599_s1 + $0x284] ss:$8 sps:$4 sm:$0xff]  }
  0x6d   :  { %3738 = vmatprep.subr.bf16.mxu0 %v5082_v3  ;;  %v5160_v3 = vld [vmem:[%s7599_s1 + $0xa84] ss:$8 sps:$4 sm:$0xff]  }
  0x6f   :  { %3411 = vmatpush1.bf16.msra.mxu1 %v5077_v4  ;;  %v5155_v4 = vld [vmem:[%s7599_s1 + $0x280] ss:$8 sps:$4 sm:$0xff]  }
  0x70   :  { %3739 = vmatpush1.bf16.msra.mxu0 %v5080_v5  ;;  %3412 = vmatprep.subr.bf16.mxu1 %v5085_v6  ;;  %v5158_v5 = vld [vmem:[%s7599_s1 + $0xa80] ss:$8 sps:$4 sm:$0xff]   ;;  %v5163_v6 = vld [vmem:[%s7599_s1 + $0x294] ss:$8 sps:$4 sm:$0xff]  }
  0x71   :  { %3740 = vmatprep.subr.bf16.mxu0 %v5088_v7  ;;  %v5166_v7 = vld [vmem:[%s7599_s1 + $0xa94] ss:$8 sps:$4 sm:$0xff]  }
  0x73   :  { %3413 = vmatpush1.bf16.msra.mxu1 %v5083_v8  ;;  %v5161_v8 = vld [vmem:[%s7599_s1 + $0x290] ss:$8 sps:$4 sm:$0xff]  }
  0x74   :  { %3741 = vmatpush1.bf16.msra.mxu0 %v5086_v9  ;;  %3414 = vmatprep.subr.bf16.mxu1 %v5091_v10  ;;  %v5164_v9 = vld [vmem:[%s7599_s1 + $0xa90] ss:$8 sps:$4 sm:$0xff]   ;;  %v5169_v10 = vld [vmem:[%s7599_s1 + $0x2a4] ss:$8 sps:$4 sm:$0xff]  }
  0x75   :  { %3742 = vmatprep.subr.bf16.mxu0 %v5094_v11  ;;  %v5172_v11 = vld [vmem:[%s7599_s1 + $0xaa4] ss:$8 sps:$4 sm:$0xff]  }
  0x77   :  { %3415 = vmatpush1.bf16.msra.mxu1 %v5089_v12  ;;  %v5167_v12 = vld [vmem:[%s7599_s1 + $0x2a0] ss:$8 sps:$4 sm:$0xff]  }
  0x78   :  { %3743 = vmatpush1.bf16.msra.mxu0 %v5092_v13  ;;  %3416 = vmatprep.subr.bf16.mxu1 %v5097_v14  ;;  %v5170_v13 = vld [vmem:[%s7599_s1 + $0xaa0] ss:$8 sps:$4 sm:$0xff]   ;;  %v5175_v14 = vld [vmem:[%s7599_s1 + $0x2b4] ss:$8 sps:$4 sm:$0xff]  }
  0x79   :  { %3744 = vmatprep.subr.bf16.mxu0 %v5100_v15  ;;  %v5178_v15 = vld [vmem:[%s7599_s1 + $0xab4] ss:$8 sps:$4 sm:$0xff]  }
  0x7b   :  { %3417 = vmatpush1.bf16.msra.mxu1 %v5095_v20  ;;  %v5181_v20 = vld [vmem:[%s7599_s1 + $0x2c4] ss:$8 sps:$4 sm:$0xff]  }
  0x7c   :  { %3745 = vmatpush1.bf16.msra.mxu0 %v5098_v21  ;;  %3418 = vmatprep.subr.bf16.mxu1 %v5103_v22  ;;  %v5184_v21 = vld [vmem:[%s7599_s1 + $0xac4] ss:$8 sps:$4 sm:$0xff]   ;;  %v5179_v22 = vld [vmem:[%s7599_s1 + $0x2c0] ss:$8 sps:$4 sm:$0xff]  }
  0x7d   :  { %3746 = vmatprep.subr.bf16.mxu0 %v5106_v52  ;;  %v5182_v52 = vld [vmem:[%s7599_s1 + $0xac0] ss:$8 sps:$4 sm:$0xff]  }
  0x7f   :  { %3419 = vmatpush1.bf16.msra.mxu1 %v5101_v24  ;;  %v5187_v24 = vld [vmem:[%s7599_s1 + $0x2d4] ss:$8 sps:$4 sm:$0xff]  }
  0x80   :  { %3747 = vmatpush1.bf16.msra.mxu0 %v5104_v25  ;;  %3429 = vmatprep.subr.bf16.mxu1 %v5109_v26  ;;  %v5190_v25 = vld [vmem:[%s7599_s1 + $0xad4] ss:$8 sps:$4 sm:$0xff]   ;;  %v5185_v26 = vld [vmem:[%s7599_s1 + $0x2d0] ss:$8 sps:$4 sm:$0xff]  }
  0x81   :  { %3757 = vmatprep.subr.bf16.mxu0 %v5112_v27  ;;  %v5188_v27 = vld [vmem:[%s7599_s1 + $0xad0] ss:$8 sps:$4 sm:$0xff]  }
  0x82   :  { %3421 = vmatmul.mubr.bf16.vlgmr.msra.gmra.mrb[0].mxu1 %v604_v30  ;;  %v5191_v30 = vld [vmem:[%s7599_s1 + $0x2e0] ss:$8 sps:$4 sm:$0xff]  }
  0x83   :  { %3749 = vmatmul.mubr.bf16.vlgmr.msra.gmra.mrb[0].mxu0 %v702_v31  ;;  %3430 = vmatpush1.bf16.msra.mxu1 %v5107_v32  ;;  %v5194_v31 = vld [vmem:[%s7599_s1 + $0xae0] ss:$8 sps:$4 sm:$0xff]   ;;  %v5199_v32 = vld [vmem:[%s7599_s1 + $0x2f4] ss:$8 sps:$4 sm:$0xff]  }
  0x84   :  { %3758 = vmatpush1.bf16.msra.mxu0 %v5110_v33  ;;  %3431 = vmatprep.subr.bf16.mxu1 %v5115_v34  ;;  %v5202_v33 = vld [vmem:[%s7599_s1 + $0xaf4] ss:$8 sps:$4 sm:$0xff]   ;;  %v5197_v34 = vld [vmem:[%s7599_s1 + $0x2f0] ss:$8 sps:$4 sm:$0xff]  }
  0x85   :  { %3759 = vmatprep.subr.bf16.mxu0 %v5118_v16  ;;  %3461 = vmatprep.mubr.bf16.mxu1 %v6208_v17  ;;  %v5200_v16 = vld [vmem:[%s7599_s1 + $0xaf0] ss:$8 sps:$4 sm:$0xff]  }
  0x86   :  { %3789 = vmatprep.mubr.bf16.mxu0 %v6211_v35 }
  0x87   :  { %3432 = vmatpush1.bf16.msra.mxu1 %v5113_v36  ;;  %v5205_v36 = vld [vmem:[%s7599_s1 + $0x304] ss:$8 sps:$4 sm:$0xff]  }
  0x88   :  { %3760 = vmatpush1.bf16.msra.mxu0 %v5116_v37  ;;  %3433 = vmatprep.subr.bf16.mxu1 %v5121_v38  ;;  %v5208_v37 = vld [vmem:[%s7599_s1 + $0xb04] ss:$8 sps:$4 sm:$0xff]   ;;  %v6397_v38 = vrot.slane %v6170_v56, %v5893_v49  ;;  %v5211_v56 = vld [vmem:[%s7599_s1 + $0x314] ss:$8 sps:$4 sm:$0xff]  }
  0x89   :  { %3761 = vmatprep.subr.bf16.mxu0 %v5124_v39  ;;  %v6401_v39 = vrot.slane %v6173_v23, %v5893_v49  ;;  %v5214_v23 = vld [vmem:[%s7599_s1 + $0xb14] ss:$8 sps:$4 sm:$0xff]  }
  0x8b   :  { %3434 = vmatpush1.bf16.msra.mxu1 %v5119_v40  ;;  %v5203_v40 = vld [vmem:[%s7599_s1 + $0x300] ss:$8 sps:$4 sm:$0xff]  }
  0x8c   :  { %3762 = vmatpush1.bf16.msra.mxu0 %v5122_v41  ;;  %3435 = vmatprep.subr.bf16.mxu1 %v5127_v43  ;;  %v5206_v41 = vld [vmem:[%s7599_s1 + $0xb00] ss:$8 sps:$4 sm:$0xff]   ;;  %v607_v43 = vcombine.high %v6208_v17, %v6208_v17  ;;  %v5217_v17 = vld [vmem:[%s7599_s1 + $0x324] ss:$8 sps:$4 sm:$0xff]  }
  0x8d   :  { %3763 = vmatprep.subr.bf16.mxu0 %v5130_v44  ;;  %v705_v44 = vcombine.high %v6211_v35, %v6211_v35  ;;  %v5220_v35 = vld [vmem:[%s7599_s1 + $0xb24] ss:$8 sps:$4 sm:$0xff]  }
  0x8f   :  { %3436 = vmatpush1.bf16.msra.mxu1 %v5125_v45  ;;  %v5209_v45 = vld [vmem:[%s7599_s1 + $0x310] ss:$8 sps:$4 sm:$0xff]  }
  0x90   :  { %3764 = vmatpush1.bf16.msra.mxu0 %v5128_v46  ;;  %3437 = vmatprep.subr.bf16.mxu1 %v5133_v47  ;;  %v5212_v46 = vld [vmem:[%s7599_s1 + $0xb10] ss:$8 sps:$4 sm:$0xff]   ;;  %v5215_v47 = vld [vmem:[%s7599_s1 + $0x320] ss:$8 sps:$4 sm:$0xff]  }
  0x91   :  { %3765 = vmatprep.subr.bf16.mxu0 %v5136_v48  ;;  %v5218_v48 = vld [vmem:[%s7599_s1 + $0xb20] ss:$8 sps:$4 sm:$0xff]  }
  0x93   :  { %3438 = vmatpush1.bf16.msra.mxu1 %v5131_v50  ;;  %v5223_v50 = vld [vmem:[%s7599_s1 + $0x334] ss:$8 sps:$4 sm:$0xff]  }
  0x94   :  { %3766 = vmatpush1.bf16.msra.mxu0 %v5134_v51  ;;  %3439 = vmatprep.subr.bf16.mxu1 %v5139_v53  ;;  %v5226_v51 = vld [vmem:[%s7599_s1 + $0xb34] ss:$8 sps:$4 sm:$0xff]   ;;  %v5221_v53 = vld [vmem:[%s7599_s1 + $0x330] ss:$8 sps:$4 sm:$0xff]  }
  0x95   :  { %3767 = vmatprep.subr.bf16.mxu0 %v5142_v54  ;;  %v5224_v54 = vld [vmem:[%s7599_s1 + $0xb30] ss:$8 sps:$4 sm:$0xff]  }
  0x97   :  { %3440 = vmatpush1.bf16.msra.mxu1 %v5137_v55  ;;  %v5229_v55 = vld [vmem:[%s7599_s1 + $0x344] ss:$8 sps:$4 sm:$0xff]  }
  0x98   :  { %3768 = vmatpush1.bf16.msra.mxu0 %v5140_v57  ;;  %3441 = vmatprep.subr.bf16.mxu1 %v5145_v58  ;;  %v5232_v57 = vld [vmem:[%s7599_s1 + $0xb44] ss:$8 sps:$4 sm:$0xff]   ;;  %v5227_v58 = vld [vmem:[%s7599_s1 + $0x340] ss:$8 sps:$4 sm:$0xff]  }
  0x99   :  { %3769 = vmatprep.subr.bf16.mxu0 %v5148_v59  ;;  %v5230_v59 = vld [vmem:[%s7599_s1 + $0xb40] ss:$8 sps:$4 sm:$0xff]  }
  0x9b   :  { %3442 = vmatpush1.bf16.msra.mxu1 %v5143_v60  ;;  %v5235_v60 = vld [vmem:[%s7599_s1 + $0x354] ss:$8 sps:$4 sm:$0xff]  }
  0x9c   :  { %3770 = vmatpush1.bf16.msra.mxu0 %v5146_v61  ;;  %3443 = vmatprep.subr.bf16.mxu1 %v5151_v62  ;;  %v5238_v61 = vld [vmem:[%s7599_s1 + $0xb54] ss:$8 sps:$4 sm:$0xff]   ;;  %v5233_v62 = vld [vmem:[%s7599_s1 + $0x350] ss:$8 sps:$4 sm:$0xff]  }
  0x9d   :  { %3771 = vmatprep.subr.bf16.mxu0 %v5154_v63  ;;  %v5236_v63 = vld [vmem:[%s7599_s1 + $0xb50] ss:$8 sps:$4 sm:$0xff]  }
  0x9f   :  { %3444 = vmatpush1.bf16.msra.mxu1 %v5149_v0  ;;  %v5241_v0 = vld [vmem:[%s7599_s1 + $0x364] ss:$8 sps:$4 sm:$0xff]  }
  0xa0   :  { %3772 = vmatpush1.bf16.msra.mxu0 %v5152_v1  ;;  %3445 = vmatprep.subr.bf16.mxu1 %v5157_v2  ;;  %v5244_v1 = vld [vmem:[%s7599_s1 + $0xb64] ss:$8 sps:$4 sm:$0xff]   ;;  %v5239_v2 = vld [vmem:[%s7599_s1 + $0x360] ss:$8 sps:$4 sm:$0xff]  }
  0xa1   :  { %3773 = vmatprep.subr.bf16.mxu0 %v5160_v3  ;;  %v5242_v3 = vld [vmem:[%s7599_s1 + $0xb60] ss:$8 sps:$4 sm:$0xff]  }
  0xa3   :  { %3446 = vmatpush1.bf16.msra.mxu1 %v5155_v4  ;;  %v5247_v4 = vld [vmem:[%s7599_s1 + $0x374] ss:$8 sps:$4 sm:$0xff]  }
  0xa4   :  { %3774 = vmatpush1.bf16.msra.mxu0 %v5158_v5  ;;  %3447 = vmatprep.subr.bf16.mxu1 %v5163_v6  ;;  %v5250_v5 = vld [vmem:[%s7599_s1 + $0xb74] ss:$8 sps:$4 sm:$0xff]   ;;  %v5245_v6 = vld [vmem:[%s7599_s1 + $0x370] ss:$8 sps:$4 sm:$0xff]  }
  0xa5   :  { %3775 = vmatprep.subr.bf16.mxu0 %v5166_v7  ;;  %v5248_v7 = vld [vmem:[%s7599_s1 + $0xb70] ss:$8 sps:$4 sm:$0xff]  }
  0xa7   :  { %3448 = vmatpush1.bf16.msra.mxu1 %v5161_v8  ;;  %v5253_v8 = vld [vmem:[%s7599_s1 + $0x384] ss:$8 sps:$4 sm:$0xff]  }
  0xa8   :  { %3776 = vmatpush1.bf16.msra.mxu0 %v5164_v9  ;;  %3449 = vmatprep.subr.bf16.mxu1 %v5169_v10  ;;  %v5256_v9 = vld [vmem:[%s7599_s1 + $0xb84] ss:$8 sps:$4 sm:$0xff]   ;;  %v5251_v10 = vld [vmem:[%s7599_s1 + $0x380] ss:$8 sps:$4 sm:$0xff]  }
  0xa9   :  { %3777 = vmatprep.subr.bf16.mxu0 %v5172_v11  ;;  %v5254_v11 = vld [vmem:[%s7599_s1 + $0xb80] ss:$8 sps:$4 sm:$0xff]  }
  0xab   :  { %3450 = vmatpush1.bf16.msra.mxu1 %v5167_v12  ;;  %v5259_v12 = vld [vmem:[%s7599_s1 + $0x394] ss:$8 sps:$4 sm:$0xff]  }
  0xac   :  { %3778 = vmatpush1.bf16.msra.mxu0 %v5170_v13  ;;  %3451 = vmatprep.subr.bf16.mxu1 %v5175_v14  ;;  %v5262_v13 = vld [vmem:[%s7599_s1 + $0xb94] ss:$8 sps:$4 sm:$0xff]   ;;  %v5257_v14 = vld [vmem:[%s7599_s1 + $0x390] ss:$8 sps:$4 sm:$0xff]  }
  0xad   :  { %3779 = vmatprep.subr.bf16.mxu0 %v5178_v15  ;;  %v5260_v15 = vld [vmem:[%s7599_s1 + $0xb90] ss:$8 sps:$4 sm:$0xff]  }
  0xaf   :  { %3452 = vmatpush1.bf16.msra.mxu1 %v5173_v18  ;;  %v5265_v18 = vld [vmem:[%s7599_s1 + $0x3a4] ss:$8 sps:$4 sm:$0xff]  }
  0xb0   :  { %3780 = vmatpush1.bf16.msra.mxu0 %v5176_v19  ;;  %3453 = vmatprep.subr.bf16.mxu1 %v5181_v20  ;;  %v5268_v19 = vld [vmem:[%s7599_s1 + $0xba4] ss:$8 sps:$4 sm:$0xff]   ;;  %v5263_v20 = vld [vmem:[%s7599_s1 + $0x3a0] ss:$8 sps:$4 sm:$0xff]  }
  0xb1   :  { %3781 = vmatprep.subr.bf16.mxu0 %v5184_v21  ;;  %v5266_v21 = vld [vmem:[%s7599_s1 + $0xba0] ss:$8 sps:$4 sm:$0xff]  }
  0xb3   :  { %3454 = vmatpush1.bf16.msra.mxu1 %v5179_v22  ;;  %v5271_v22 = vld [vmem:[%s7599_s1 + $0x3b4] ss:$8 sps:$4 sm:$0xff]  }
  0xb4   :  { %3782 = vmatpush1.bf16.msra.mxu0 %v5182_v52  ;;  %3455 = vmatprep.subr.bf16.mxu1 %v5187_v24  ;;  %v5274_v52 = vld [vmem:[%s7599_s1 + $0xbb4] ss:$8 sps:$4 sm:$0xff]   ;;  %v5269_v24 = vld [vmem:[%s7599_s1 + $0x3b0] ss:$8 sps:$4 sm:$0xff]  }
  0xb5   :  { %3783 = vmatprep.subr.bf16.mxu0 %v5190_v25  ;;  %v5272_v25 = vld [vmem:[%s7599_s1 + $0xbb0] ss:$8 sps:$4 sm:$0xff]  }
  0xb7   :  { %3456 = vmatpush1.bf16.msra.mxu1 %v5185_v26  ;;  %v5277_v26 = vld [vmem:[%s7599_s1 + $0x3c4] ss:$8 sps:$4 sm:$0xff]  }
  0xb8   :  { %3784 = vmatpush1.bf16.msra.mxu0 %v5188_v27  ;;  %3457 = vmatprep.subr.bf16.mxu1 %v5193_v28  ;;  %v5280_v27 = vld [vmem:[%s7599_s1 + $0xbc4] ss:$8 sps:$4 sm:$0xff]   ;;  %v5275_v28 = vld [vmem:[%s7599_s1 + $0x3c0] ss:$8 sps:$4 sm:$0xff]  }
  0xb9   :  { %3785 = vmatprep.subr.bf16.mxu0 %v5196_v29  ;;  %v5278_v29 = vld [vmem:[%s7599_s1 + $0xbc0] ss:$8 sps:$4 sm:$0xff]  }
  0xbb   :  { %3458 = vmatpush1.bf16.msra.mxu1 %v5191_v30  ;;  %v5283_v30 = vld [vmem:[%s7599_s1 + $0x3d4] ss:$8 sps:$4 sm:$0xff]  }
  0xbc   :  { %3786 = vmatpush1.bf16.msra.mxu0 %v5194_v31  ;;  %3459 = vmatprep.subr.bf16.mxu1 %v5199_v32  ;;  %v5286_v31 = vld [vmem:[%s7599_s1 + $0xbd4] ss:$8 sps:$4 sm:$0xff]   ;;  %v5281_v32 = vld [vmem:[%s7599_s1 + $0x3d0] ss:$8 sps:$4 sm:$0xff]  }
  0xbd   :  { %3787 = vmatprep.subr.bf16.mxu0 %v5202_v33  ;;  %v5284_v33 = vld [vmem:[%s7599_s1 + $0xbd0] ss:$8 sps:$4 sm:$0xff]  }
  0xbf   :  { %3460 = vmatpush1.bf16.msra.mxu1 %v5197_v34  ;;  %v5289_v34 = vld [vmem:[%s7599_s1 + $0x3e4] ss:$8 sps:$4 sm:$0xff]  }
  0xc0   :  { %3788 = vmatpush1.bf16.msra.mxu0 %v5200_v16  ;;  %3470 = vmatprep.subr.bf16.mxu1 %v5205_v36  ;;  %v5292_v16 = vld [vmem:[%s7599_s1 + $0xbe4] ss:$8 sps:$4 sm:$0xff]   ;;  %v5287_v36 = vld [vmem:[%s7599_s1 + $0x3e0] ss:$8 sps:$4 sm:$0xff]  }
  0xc1   :  { %3798 = vmatprep.subr.bf16.mxu0 %v5208_v37  ;;  %v5290_v37 = vld [vmem:[%s7599_s1 + $0xbe0] ss:$8 sps:$4 sm:$0xff]  }
  0xc2   :  { %3462 = vmatmul.mubr.bf16.vlgmr.msra.gmra.mrb[0].mxu1 %v6397_v38 }
  0xc3   :  { %3790 = vmatmul.mubr.bf16.vlgmr.msra.gmra.mrb[0].mxu0 %v6401_v39  ;;  %3471 = vmatpush1.bf16.msra.mxu1 %v5203_v40  ;;  %v6586_v40 = vld [vmem:[%s7598_s0 + $0x8] sm:$0xff] }
  0xc4   :  { %3799 = vmatpush1.bf16.msra.mxu0 %v5206_v41  ;;  %3472 = vmatprep.subr.bf16.mxu1 %v5211_v56  ;;  %v6591_v41 = vld [vmem:[%s7598_s0 + $0x18] sm:$0xff] }
  0xc5   :  { %3800 = vmatprep.subr.bf16.mxu0 %v5214_v23  ;;  %3502 = vmatprep.mubr.bf16.mxu1 %v607_v43  ;;  %v5295_v56 = vld [vmem:[%s7599_s1 + $0x3f4] ss:$8 sps:$4 sm:$0xff]   ;;  %v6601_v43 = vrot.slane %v6586_v40, %v5893_v49 }
  0xc6   :  { %3830 = vmatprep.mubr.bf16.mxu0 %v705_v44  ;;  %v5298_v23 = vld [vmem:[%s7599_s1 + $0xbf4] ss:$8 sps:$4 sm:$0xff]   ;;  %v6605_v44 = vrot.slane %v6591_v41, %v5893_v49 }
  0xc7   :  { %3473 = vmatpush1.bf16.msra.mxu1 %v5209_v45  ;;  %v5293_v45 = vld [vmem:[%s7599_s1 + $0x3f0] ss:$8 sps:$4 sm:$0xff]  }
  0xc8   :  { %3801 = vmatpush1.bf16.msra.mxu0 %v5212_v46  ;;  %3474 = vmatprep.subr.bf16.mxu1 %v5217_v17  ;;  %v5296_v46 = vld [vmem:[%s7599_s1 + $0xbf0] ss:$8 sps:$4 sm:$0xff]   ;;  %v5301_v17 = vld [vmem:[%s7599_s1 + $0x404] ss:$8 sps:$4 sm:$0xff]  }
  0xc9   :  { %3802 = vmatprep.subr.bf16.mxu0 %v5220_v35  ;;  %v5304_v35 = vld [vmem:[%s7599_s1 + $0xc04] ss:$8 sps:$4 sm:$0xff]  }
  0xcb   :  { %3475 = vmatpush1.bf16.msra.mxu1 %v5215_v47  ;;  %v623_v47 = vcombine.high %v6601_v43, %v6601_v43 }
  0xcc   :  { %3803 = vmatpush1.bf16.msra.mxu0 %v5218_v48  ;;  %3476 = vmatprep.subr.bf16.mxu1 %v5223_v50  ;;  %v721_v48 = vcombine.high %v6605_v44, %v6605_v44  ;;  %v5299_v50 = vld [vmem:[%s7599_s1 + $0x400] ss:$8 sps:$4 sm:$0xff]  }
  0xcd   :  { %3804 = vmatprep.subr.bf16.mxu0 %v5226_v51  ;;  %v5302_v51 = vld [vmem:[%s7599_s1 + $0xc00] ss:$8 sps:$4 sm:$0xff]  }
  0xcf   :  { %3477 = vmatpush1.bf16.msra.mxu1 %v5221_v53  ;;  %v605_v53 = vcombine.high %v6397_v38, %v6397_v38  ;;  %v6643_v38 = vrot.slane %v721_v48, %v5893_v49  ;;  %v5380_v48 = vld [vmem:[%s7599_s1 + $0xcd0] ss:$8 sps:$4 sm:$0xff]  }
  0xd0   :  { %3805 = vmatpush1.bf16.msra.mxu0 %v5224_v54  ;;  %3478 = vmatprep.subr.bf16.mxu1 %v5229_v55  ;;  %v703_v54 = vcombine.high %v6401_v39, %v6401_v39  ;;  %v5307_v55 = vld [vmem:[%s7599_s1 + $0x414] ss:$8 sps:$4 sm:$0xff]   ;;  %v5305_v39 = vld [vmem:[%s7599_s1 + $0x410] ss:$8 sps:$4 sm:$0xff]  }
  0xd1   :  { %3806 = vmatprep.subr.bf16.mxu0 %v5232_v57  ;;  %v5310_v57 = vld [vmem:[%s7599_s1 + $0xc14] ss:$8 sps:$4 sm:$0xff]  }
  0xd3   :  { %3479 = vmatpush1.bf16.msra.mxu1 %v5227_v58  ;;  %v6640_v58 = vrot.slane %v623_v47, %v5893_v49  ;;  %v5377_v47 = vld [vmem:[%s7599_s1 + $0x4d0] ss:$8 sps:$4 sm:$0xff]  }
  0xd4   :  { %3807 = vmatpush1.bf16.msra.mxu0 %v5230_v59  ;;  %3480 = vmatprep.subr.bf16.mxu1 %v5235_v60  ;;  %v5308_v59 = vld [vmem:[%s7599_s1 + $0xc10] ss:$8 sps:$4 sm:$0xff]   ;;  %v5313_v60 = vld [vmem:[%s7599_s1 + $0x424] ss:$8 sps:$4 sm:$0xff]  }
  0xd5   :  { %3808 = vmatprep.subr.bf16.mxu0 %v5238_v61  ;;  %v5316_v61 = vld [vmem:[%s7599_s1 + $0xc24] ss:$8 sps:$4 sm:$0xff]  }
  0xd7   :  { %3481 = vmatpush1.bf16.msra.mxu1 %v5233_v62  ;;  %v5311_v62 = vld [vmem:[%s7599_s1 + $0x420] ss:$8 sps:$4 sm:$0xff]  }
  0xd8   :  { %3809 = vmatpush1.bf16.msra.mxu0 %v5236_v63  ;;  %3482 = vmatprep.subr.bf16.mxu1 %v5241_v0  ;;  %v5314_v63 = vld [vmem:[%s7599_s1 + $0xc20] ss:$8 sps:$4 sm:$0xff]   ;;  %v5319_v0 = vld [vmem:[%s7599_s1 + $0x434] ss:$8 sps:$4 sm:$0xff]  }
  0xd9   :  { %3810 = vmatprep.subr.bf16.mxu0 %v5244_v1  ;;  %v5322_v1 = vld [vmem:[%s7599_s1 + $0xc34] ss:$8 sps:$4 sm:$0xff]  }
  0xdb   :  { %3483 = vmatpush1.bf16.msra.mxu1 %v5239_v2  ;;  %v5317_v2 = vld [vmem:[%s7599_s1 + $0x430] ss:$8 sps:$4 sm:$0xff]  }
  0xdc   :  { %3811 = vmatpush1.bf16.msra.mxu0 %v5242_v3  ;;  %3484 = vmatprep.subr.bf16.mxu1 %v5247_v4  ;;  %v5320_v3 = vld [vmem:[%s7599_s1 + $0xc30] ss:$8 sps:$4 sm:$0xff]   ;;  %v5325_v4 = vld [vmem:[%s7599_s1 + $0x444] ss:$8 sps:$4 sm:$0xff]  }
  0xdd   :  { %3812 = vmatprep.subr.bf16.mxu0 %v5250_v5  ;;  %v5328_v5 = vld [vmem:[%s7599_s1 + $0xc44] ss:$8 sps:$4 sm:$0xff]  }
  0xdf   :  { %3485 = vmatpush1.bf16.msra.mxu1 %v5245_v6  ;;  %v5323_v6 = vld [vmem:[%s7599_s1 + $0x440] ss:$8 sps:$4 sm:$0xff]  }
  0xe0   :  { %3813 = vmatpush1.bf16.msra.mxu0 %v5248_v7  ;;  %3486 = vmatprep.subr.bf16.mxu1 %v5253_v8  ;;  %v5326_v7 = vld [vmem:[%s7599_s1 + $0xc40] ss:$8 sps:$4 sm:$0xff]   ;;  %v5331_v8 = vld [vmem:[%s7599_s1 + $0x454] ss:$8 sps:$4 sm:$0xff]  }
  0xe1   :  { %3814 = vmatprep.subr.bf16.mxu0 %v5256_v9  ;;  %v5334_v9 = vld [vmem:[%s7599_s1 + $0xc54] ss:$8 sps:$4 sm:$0xff]  }
  0xe3   :  { %3487 = vmatpush1.bf16.msra.mxu1 %v5251_v10  ;;  %v5329_v10 = vld [vmem:[%s7599_s1 + $0x450] ss:$8 sps:$4 sm:$0xff]  }
  0xe4   :  { %3815 = vmatpush1.bf16.msra.mxu0 %v5254_v11  ;;  %3488 = vmatprep.subr.bf16.mxu1 %v5259_v12  ;;  %v5332_v11 = vld [vmem:[%s7599_s1 + $0xc50] ss:$8 sps:$4 sm:$0xff]   ;;  %v5337_v12 = vld [vmem:[%s7599_s1 + $0x464] ss:$8 sps:$4 sm:$0xff]  }
  0xe5   :  { %3816 = vmatprep.subr.bf16.mxu0 %v5262_v13  ;;  %v5340_v13 = vld [vmem:[%s7599_s1 + $0xc64] ss:$8 sps:$4 sm:$0xff]  }
  0xe7   :  { %3489 = vmatpush1.bf16.msra.mxu1 %v5257_v14  ;;  %v5335_v14 = vld [vmem:[%s7599_s1 + $0x460] ss:$8 sps:$4 sm:$0xff]  }
  0xe8   :  { %3817 = vmatpush1.bf16.msra.mxu0 %v5260_v15  ;;  %3490 = vmatprep.subr.bf16.mxu1 %v5265_v18  ;;  %v5338_v15 = vld [vmem:[%s7599_s1 + $0xc60] ss:$8 sps:$4 sm:$0xff]   ;;  %v5343_v18 = vld [vmem:[%s7599_s1 + $0x474] ss:$8 sps:$4 sm:$0xff]  }
  0xe9   :  { %3818 = vmatprep.subr.bf16.mxu0 %v5268_v19  ;;  %v5346_v19 = vld [vmem:[%s7599_s1 + $0xc74] ss:$8 sps:$4 sm:$0xff]  }
  0xeb   :  { %3491 = vmatpush1.bf16.msra.mxu1 %v5263_v20  ;;  %v5341_v20 = vld [vmem:[%s7599_s1 + $0x470] ss:$8 sps:$4 sm:$0xff]  }
  0xec   :  { %3819 = vmatpush1.bf16.msra.mxu0 %v5266_v21  ;;  %3492 = vmatprep.subr.bf16.mxu1 %v5271_v22  ;;  %v5344_v21 = vld [vmem:[%s7599_s1 + $0xc70] ss:$8 sps:$4 sm:$0xff]   ;;  %v5349_v22 = vld [vmem:[%s7599_s1 + $0x484] ss:$8 sps:$4 sm:$0xff]  }
  0xed   :  { %3820 = vmatprep.subr.bf16.mxu0 %v5274_v52  ;;  %v5352_v52 = vld [vmem:[%s7599_s1 + $0xc84] ss:$8 sps:$4 sm:$0xff]  }
  0xef   :  { %3493 = vmatpush1.bf16.msra.mxu1 %v5269_v24  ;;  %v5347_v24 = vld [vmem:[%s7599_s1 + $0x480] ss:$8 sps:$4 sm:$0xff]  }
  0xf0   :  { %3821 = vmatpush1.bf16.msra.mxu0 %v5272_v25  ;;  %3494 = vmatprep.subr.bf16.mxu1 %v5277_v26  ;;  %v5350_v25 = vld [vmem:[%s7599_s1 + $0xc80] ss:$8 sps:$4 sm:$0xff]   ;;  %v5355_v26 = vld [vmem:[%s7599_s1 + $0x494] ss:$8 sps:$4 sm:$0xff]  }
  0xf1   :  { %3822 = vmatprep.subr.bf16.mxu0 %v5280_v27  ;;  %v5358_v27 = vld [vmem:[%s7599_s1 + $0xc94] ss:$8 sps:$4 sm:$0xff]  }
  0xf3   :  { %3495 = vmatpush1.bf16.msra.mxu1 %v5275_v28  ;;  %v5353_v28 = vld [vmem:[%s7599_s1 + $0x490] ss:$8 sps:$4 sm:$0xff]  }
  0xf4   :  { %3823 = vmatpush1.bf16.msra.mxu0 %v5278_v29  ;;  %3496 = vmatprep.subr.bf16.mxu1 %v5283_v30  ;;  %v5356_v29 = vld [vmem:[%s7599_s1 + $0xc90] ss:$8 sps:$4 sm:$0xff]   ;;  %v5361_v30 = vld [vmem:[%s7599_s1 + $0x4a4] ss:$8 sps:$4 sm:$0xff]  }
  0xf5   :  { %3824 = vmatprep.subr.bf16.mxu0 %v5286_v31  ;;  %v5364_v31 = vld [vmem:[%s7599_s1 + $0xca4] ss:$8 sps:$4 sm:$0xff]  }
  0xf7   :  { %3497 = vmatpush1.bf16.msra.mxu1 %v5281_v32  ;;  %v5359_v32 = vld [vmem:[%s7599_s1 + $0x4a0] ss:$8 sps:$4 sm:$0xff]  }
  0xf8   :  { %3825 = vmatpush1.bf16.msra.mxu0 %v5284_v33  ;;  %3498 = vmatprep.subr.bf16.mxu1 %v5289_v34  ;;  %v5362_v33 = vld [vmem:[%s7599_s1 + $0xca0] ss:$8 sps:$4 sm:$0xff]   ;;  %v5367_v34 = vld [vmem:[%s7599_s1 + $0x4b4] ss:$8 sps:$4 sm:$0xff]  }
  0xf9   :  { %3826 = vmatprep.subr.bf16.mxu0 %v5292_v16  ;;  %v5370_v16 = vld [vmem:[%s7599_s1 + $0xcb4] ss:$8 sps:$4 sm:$0xff]  }
  0xfb   :  { %3499 = vmatpush1.bf16.msra.mxu1 %v5287_v36  ;;  %v5365_v36 = vld [vmem:[%s7599_s1 + $0x4b0] ss:$8 sps:$4 sm:$0xff]  }
  0xfc   :  { %3827 = vmatpush1.bf16.msra.mxu0 %v5290_v37  ;;  %3500 = vmatprep.subr.bf16.mxu1 %v5295_v56  ;;  %v5368_v37 = vld [vmem:[%s7599_s1 + $0xcb0] ss:$8 sps:$4 sm:$0xff]   ;;  %v5373_v56 = vld [vmem:[%s7599_s1 + $0x4c4] ss:$8 sps:$4 sm:$0xff]  }
  0xfd   :  { %3828 = vmatprep.subr.bf16.mxu0 %v5298_v23  ;;  %v5376_v23 = vld [vmem:[%s7599_s1 + $0xcc4] ss:$8 sps:$4 sm:$0xff]  }
  0xff   :  { %3501 = vmatpush1.bf16.msra.mxu1 %v5293_v45  ;;  %v5371_v45 = vld [vmem:[%s7599_s1 + $0x4c0] ss:$8 sps:$4 sm:$0xff]  }
 0x100   :  { %3829 = vmatpush1.bf16.msra.mxu0 %v5296_v46  ;;  %3511 = vmatprep.subr.bf16.mxu1 %v5301_v17  ;;  %v5374_v46 = vld [vmem:[%s7599_s1 + $0xcc0] ss:$8 sps:$4 sm:$0xff]   ;;  %v5379_v17 = vld [vmem:[%s7599_s1 + $0x4d4] ss:$8 sps:$4 sm:$0xff]  }
 0x101   :  { %3839 = vmatprep.subr.bf16.mxu0 %v5304_v35  ;;  %v5382_v35 = vld [vmem:[%s7599_s1 + $0xcd4] ss:$8 sps:$4 sm:$0xff]  }
 0x102   :  { %3503 = vmatmul.mubr.bf16.vlgmr.msra.gmra.mrb[0].mxu1 %v605_v53  ;;  %v5383_v53 = vld [vmem:[%s7599_s1 + $0x4e0] ss:$8 sps:$4 sm:$0xff]  }
 0x103   :  { %3831 = vmatmul.mubr.bf16.vlgmr.msra.gmra.mrb[0].mxu0 %v703_v54  ;;  %3512 = vmatpush1.bf16.msra.mxu1 %v5299_v50  ;;  %v5385_v50 = vld [vmem:[%s7599_s1 + $0x4e4] ss:$8 sps:$4 sm:$0xff]   ;;  %v5386_v54 = vld [vmem:[%s7599_s1 + $0xce0] ss:$8 sps:$4 sm:$0xff]  }
 0x104   :  { %3840 = vmatpush1.bf16.msra.mxu0 %v5302_v51  ;;  %3513 = vmatprep.subr.bf16.mxu1 %v5307_v55  ;;  %v5388_v51 = vld [vmem:[%s7599_s1 + $0xce4] ss:$8 sps:$4 sm:$0xff]   ;;  %v5391_v55 = vld [vmem:[%s7599_s1 + $0x4f4] ss:$8 sps:$4 sm:$0xff]  }
 0x105   :  { %3841 = vmatprep.subr.bf16.mxu0 %v5310_v57  ;;  %3543 = vmatprep.mubr.bf16.mxu1 %v6640_v58  ;;  %v5394_v57 = vld [vmem:[%s7599_s1 + $0xcf4] ss:$8 sps:$4 sm:$0xff]  }
 0x106   :  { %3871 = vmatprep.mubr.bf16.mxu0 %v6643_v38 }
 0x107   :  { %3514 = vmatpush1.bf16.msra.mxu1 %v5305_v39  ;;  %v5389_v39 = vld [vmem:[%s7599_s1 + $0x4f0] ss:$8 sps:$4 sm:$0xff]  }
 0x108   :  { %3842 = vmatpush1.bf16.msra.mxu0 %v5308_v59  ;;  %3515 = vmatprep.subr.bf16.mxu1 %v5313_v60  ;;  %v5392_v59 = vld [vmem:[%s7599_s1 + $0xcf0] ss:$8 sps:$4 sm:$0xff]   ;;  %v5397_v60 = vld [vmem:[%s7599_s1 + $0x504] ss:$8 sps:$4 sm:$0xff]  }
 0x109   :  { %3843 = vmatprep.subr.bf16.mxu0 %v5316_v61  ;;  %v5400_v61 = vld [vmem:[%s7599_s1 + $0xd04] ss:$8 sps:$4 sm:$0xff]  }
 0x10b   :  { %3516 = vmatpush1.bf16.msra.mxu1 %v5311_v62  ;;  %v6829_v62 = vrot.slane %v6601_v43, %v5893_v49  ;;  %v5403_v43 = vld [vmem:[%s7599_s1 + $0x514] ss:$8 sps:$4 sm:$0xff]  }
 0x10c   :  { %3844 = vmatpush1.bf16.msra.mxu0 %v5314_v63  ;;  %3517 = vmatprep.subr.bf16.mxu1 %v5319_v0  ;;  %v6833_v63 = vrot.slane %v6605_v44, %v5893_v49  ;;  %v5395_v0 = vld [vmem:[%s7599_s1 + $0x500] ss:$8 sps:$4 sm:$0xff]   ;;  %v5406_v44 = vld [vmem:[%s7599_s1 + $0xd14] ss:$8 sps:$4 sm:$0xff]  }
 0x10d   :  { %3845 = vmatprep.subr.bf16.mxu0 %v5322_v1  ;;  %v5398_v1 = vld [vmem:[%s7599_s1 + $0xd00] ss:$8 sps:$4 sm:$0xff]  }
 0x10f   :  { %3518 = vmatpush1.bf16.msra.mxu1 %v5317_v2  ;;  %v655_v2 = vcombine.high %v6640_v58, %v6640_v58 }
 0x110   :  { %3846 = vmatpush1.bf16.msra.mxu0 %v5320_v3  ;;  %3519 = vmatprep.subr.bf16.mxu1 %v5325_v4  ;;  %v753_v3 = vcombine.high %v6643_v38, %v6643_v38 }
 0x111   :  { %3847 = vmatprep.subr.bf16.mxu0 %v5328_v5 }
 0x113   :  { %3520 = vmatpush1.bf16.msra.mxu1 %v5323_v6 }
 0x114   :  { %3848 = vmatpush1.bf16.msra.mxu0 %v5326_v7  ;;  %3521 = vmatprep.subr.bf16.mxu1 %v5331_v8 }
 0x115   :  { %3849 = vmatprep.subr.bf16.mxu0 %v5334_v9 }
 0x117   :  { %3522 = vmatpush1.bf16.msra.mxu1 %v5329_v10 }
 0x118   :  { %3850 = vmatpush1.bf16.msra.mxu0 %v5332_v11  ;;  %3523 = vmatprep.subr.bf16.mxu1 %v5337_v12 }
 0x119   :  { %3851 = vmatprep.subr.bf16.mxu0 %v5340_v13 }
 0x11b   :  { %3524 = vmatpush1.bf16.msra.mxu1 %v5335_v14 }
 0x11c   :  { %3852 = vmatpush1.bf16.msra.mxu0 %v5338_v15  ;;  %3525 = vmatprep.subr.bf16.mxu1 %v5343_v18 }
 0x11d   :  { %3853 = vmatprep.subr.bf16.mxu0 %v5346_v19 }
 0x11f   :  { %3526 = vmatpush1.bf16.msra.mxu1 %v5341_v20 }
 0x120   :  { %3854 = vmatpush1.bf16.msra.mxu0 %v5344_v21  ;;  %3527 = vmatprep.subr.bf16.mxu1 %v5349_v22 }
 0x121   :  { %3855 = vmatprep.subr.bf16.mxu0 %v5352_v52 }
 0x123   :  { %3528 = vmatpush1.bf16.msra.mxu1 %v5347_v24 }
 0x124   :  { %3856 = vmatpush1.bf16.msra.mxu0 %v5350_v25  ;;  %3529 = vmatprep.subr.bf16.mxu1 %v5355_v26 }
 0x125   :  { %3857 = vmatprep.subr.bf16.mxu0 %v5358_v27 }
 0x127   :  { %3530 = vmatpush1.bf16.msra.mxu1 %v5353_v28 }
 0x128   :  { %3858 = vmatpush1.bf16.msra.mxu0 %v5356_v29  ;;  %3531 = vmatprep.subr.bf16.mxu1 %v5361_v30 }
 0x129   :  { %3859 = vmatprep.subr.bf16.mxu0 %v5364_v31 }
 0x12b   :  { %3532 = vmatpush1.bf16.msra.mxu1 %v5359_v32 }
 0x12c   :  { %3860 = vmatpush1.bf16.msra.mxu0 %v5362_v33  ;;  %3533 = vmatprep.subr.bf16.mxu1 %v5367_v34 }
 0x12d   :  { %3861 = vmatprep.subr.bf16.mxu0 %v5370_v16 }
 0x12f   :  { %3534 = vmatpush1.bf16.msra.mxu1 %v5365_v36 }
 0x130   :  { %3862 = vmatpush1.bf16.msra.mxu0 %v5368_v37  ;;  %3535 = vmatprep.subr.bf16.mxu1 %v5373_v56 }
 0x131   :  { %3863 = vmatprep.subr.bf16.mxu0 %v5376_v23 }
 0x133   :  { %3536 = vmatpush1.bf16.msra.mxu1 %v5371_v45 }
 0x134   :  { %3864 = vmatpush1.bf16.msra.mxu0 %v5374_v46  ;;  %3537 = vmatprep.subr.bf16.mxu1 %v5379_v17 }
 0x135   :  { %3865 = vmatprep.subr.bf16.mxu0 %v5382_v35 }
 0x137   :  { %3538 = vmatpush1.bf16.msra.mxu1 %v5377_v47 }
 0x138   :  { %3866 = vmatpush1.bf16.msra.mxu0 %v5380_v48  ;;  %3539 = vmatprep.subr.bf16.mxu1 %v5385_v50 }
 0x139   :  { %3867 = vmatprep.subr.bf16.mxu0 %v5388_v51 }
 0x13b   :  { %3540 = vmatpush1.bf16.msra.mxu1 %v5383_v53 }
 0x13c   :  { %3868 = vmatpush1.bf16.msra.mxu0 %v5386_v54  ;;  %3541 = vmatprep.subr.bf16.mxu1 %v5391_v55 }
 0x13d   :  { %3869 = vmatprep.subr.bf16.mxu0 %v5394_v57 }
 0x13f   :  { %3542 = vmatpush1.bf16.msra.mxu1 %v5389_v39 }
 0x140   :  { %3870 = vmatpush1.bf16.msra.mxu0 %v5392_v59  ;;  %3552 = vmatprep.subr.bf16.mxu1 %v5397_v60 }
 0x141   :  { %3880 = vmatprep.subr.bf16.mxu0 %v5400_v61 }
 0x142   :  { %12 = vsyncpa [#allocation3], 0  ;;  %3544 = vmatmul.mubr.bf16.vlgmr.msra.gmra.mrb[0].mxu1 %v6829_v62  ;;  %v5401_v4 = vld [vmem:[%s7599_s1 + $0x510] ss:$8 sps:$4 sm:$0xff]   ;;  %v5409_v58 = vld [vmem:[%s7599_s1 + $0x524] ss:$8 sps:$4 sm:$0xff]  }
 0x143   :  { %3872 = vmatmul.mubr.bf16.vlgmr.msra.gmra.mrb[0].mxu0 %v6833_v63  ;;  %3553 = vmatpush1.bf16.msra.mxu1 %v5395_v0  ;;  %v5404_v5 = vld [vmem:[%s7599_s1 + $0xd10] ss:$8 sps:$4 sm:$0xff]   ;;  %v5412_v38 = vld [vmem:[%s7599_s1 + $0xd24] ss:$8 sps:$4 sm:$0xff]   ;;  %v5407_v6 = vld [vmem:[%s7599_s1 + $0x520] ss:$8 sps:$4 sm:$0xff]   ;;  %v608_v0 = vcombine.high %v6586_v40, %v6586_v40 }
 0x144   :  { %3881 = vmatpush1.bf16.msra.mxu0 %v5398_v1  ;;  %3554 = vmatprep.subr.bf16.mxu1 %v5403_v43  ;;  %v5410_v7 = vld [vmem:[%s7599_s1 + $0xd20] ss:$8 sps:$4 sm:$0xff]   ;;  %v5415_v8 = vld [vmem:[%s7599_s1 + $0x534] ss:$8 sps:$4 sm:$0xff]   ;;  %v5413_v10 = vld [vmem:[%s7599_s1 + $0x530] ss:$8 sps:$4 sm:$0xff]   ;;  %v706_v1 = vcombine.high %v6591_v41, %v6591_v41 }
 0x145   :  { %3882 = vmatprep.subr.bf16.mxu0 %v5406_v44  ;;  %3584 = vmatprep.mubr.bf16.mxu1 %v655_v2  ;;  %v5418_v9 = vld [vmem:[%s7599_s1 + $0xd34] ss:$8 sps:$4 sm:$0xff]   ;;  %v5416_v11 = vld [vmem:[%s7599_s1 + $0xd30] ss:$8 sps:$4 sm:$0xff]   ;;  %v5421_v12 = vld [vmem:[%s7599_s1 + $0x544] ss:$8 sps:$4 sm:$0xff]   ;;  %v7026_v41 = vrot.slane %v608_v0, %v5893_v49 }
 0x146   :  { %3912 = vmatprep.mubr.bf16.mxu0 %v753_v3  ;;  %v5424_v13 = vld [vmem:[%s7599_s1 + $0xd44] ss:$8 sps:$4 sm:$0xff]   ;;  %v5419_v14 = vld [vmem:[%s7599_s1 + $0x540] ss:$8 sps:$4 sm:$0xff]   ;;  %v5427_v18 = vld [vmem:[%s7599_s1 + $0x554] ss:$8 sps:$4 sm:$0xff]   ;;  %v7029_v3 = vrot.slane %v706_v1, %v5893_v49 }
 0x147   :  { %3555 = vmatpush1.bf16.msra.mxu1 %v5401_v4  ;;  %v5422_v15 = vld [vmem:[%s7599_s1 + $0xd40] ss:$8 sps:$4 sm:$0xff]   ;;  %v5430_v19 = vld [vmem:[%s7599_s1 + $0xd54] ss:$8 sps:$4 sm:$0xff]   ;;  %v5425_v20 = vld [vmem:[%s7599_s1 + $0x550] ss:$8 sps:$4 sm:$0xff]  }
 0x148   :  { %3883 = vmatpush1.bf16.msra.mxu0 %v5404_v5  ;;  %3556 = vmatprep.subr.bf16.mxu1 %v5409_v58  ;;  %v5428_v21 = vld [vmem:[%s7599_s1 + $0xd50] ss:$8 sps:$4 sm:$0xff]   ;;  %v5433_v22 = vld [vmem:[%s7599_s1 + $0x564] ss:$8 sps:$4 sm:$0xff]   ;;  %v5431_v24 = vld [vmem:[%s7599_s1 + $0x560] ss:$8 sps:$4 sm:$0xff]  }
 0x149   :  { %3884 = vmatprep.subr.bf16.mxu0 %v5412_v38  ;;  %v5436_v52 = vld [vmem:[%s7599_s1 + $0xd64] ss:$8 sps:$4 sm:$0xff]   ;;  %v5434_v25 = vld [vmem:[%s7599_s1 + $0xd60] ss:$8 sps:$4 sm:$0xff]   ;;  %v5439_v26 = vld [vmem:[%s7599_s1 + $0x574] ss:$8 sps:$4 sm:$0xff]  }
 0x14a   :  { %v5442_v27 = vld [vmem:[%s7599_s1 + $0xd74] ss:$8 sps:$4 sm:$0xff]   ;;  %v5437_v28 = vld [vmem:[%s7599_s1 + $0x570] ss:$8 sps:$4 sm:$0xff]   ;;  %v5445_v30 = vld [vmem:[%s7599_s1 + $0x584] ss:$8 sps:$4 sm:$0xff]  }
 0x14b   :  { %3557 = vmatpush1.bf16.msra.mxu1 %v5407_v6  ;;  %v5440_v29 = vld [vmem:[%s7599_s1 + $0xd70] ss:$8 sps:$4 sm:$0xff]   ;;  %v5448_v31 = vld [vmem:[%s7599_s1 + $0xd84] ss:$8 sps:$4 sm:$0xff]   ;;  %v5443_v32 = vld [vmem:[%s7599_s1 + $0x580] ss:$8 sps:$4 sm:$0xff]   ;;  %v624_v6 = vcombine.high %v7026_v41, %v7026_v41 }
 0x14c   :  { %3885 = vmatpush1.bf16.msra.mxu0 %v5410_v7  ;;  %3558 = vmatprep.subr.bf16.mxu1 %v5415_v8  ;;  %v5446_v33 = vld [vmem:[%s7599_s1 + $0xd80] ss:$8 sps:$4 sm:$0xff]   ;;  %v5451_v34 = vld [vmem:[%s7599_s1 + $0x594] ss:$8 sps:$4 sm:$0xff]   ;;  %v5449_v36 = vld [vmem:[%s7599_s1 + $0x590] ss:$8 sps:$4 sm:$0xff]   ;;  %v722_v7 = vcombine.high %v7029_v3, %v7029_v3  ;;  %v653_v8 = vcombine.high %v6829_v62, %v6829_v62 }
 0x14d   :  { %3886 = vmatprep.subr.bf16.mxu0 %v5418_v9  ;;  %v5454_v16 = vld [vmem:[%s7599_s1 + $0xd94] ss:$8 sps:$4 sm:$0xff]   ;;  %v5452_v37 = vld [vmem:[%s7599_s1 + $0xd90] ss:$8 sps:$4 sm:$0xff]   ;;  %v5457_v56 = vld [vmem:[%s7599_s1 + $0x5a4] ss:$8 sps:$4 sm:$0xff]   ;;  %v751_v9 = vcombine.high %v6833_v63, %v6833_v63  ;;  %v7064_v63 = vrot.slane %v624_v6, %v5893_v49 }
 0x14e   :  { %v5460_v23 = vld [vmem:[%s7599_s1 + $0xda4] ss:$8 sps:$4 sm:$0xff]   ;;  %v5455_v45 = vld [vmem:[%s7599_s1 + $0x5a0] ss:$8 sps:$4 sm:$0xff]   ;;  %v5463_v17 = vld [vmem:[%s7599_s1 + $0x5b4] ss:$8 sps:$4 sm:$0xff]  }
 0x14f   :  { %3559 = vmatpush1.bf16.msra.mxu1 %v5413_v10  ;;  %v5458_v46 = vld [vmem:[%s7599_s1 + $0xda0] ss:$8 sps:$4 sm:$0xff]   ;;  %v5466_v35 = vld [vmem:[%s7599_s1 + $0xdb4] ss:$8 sps:$4 sm:$0xff]   ;;  %v5461_v47 = vld [vmem:[%s7599_s1 + $0x5b0] ss:$8 sps:$4 sm:$0xff]  }
 0x150   :  { %3887 = vmatpush1.bf16.msra.mxu0 %v5416_v11  ;;  %3560 = vmatprep.subr.bf16.mxu1 %v5421_v12  ;;  %v5464_v48 = vld [vmem:[%s7599_s1 + $0xdb0] ss:$8 sps:$4 sm:$0xff]   ;;  %v5469_v50 = vld [vmem:[%s7599_s1 + $0x5c4] ss:$8 sps:$4 sm:$0xff]   ;;  %v5467_v53 = vld [vmem:[%s7599_s1 + $0x5c0] ss:$8 sps:$4 sm:$0xff]  }
 0x151   :  { %3888 = vmatprep.subr.bf16.mxu0 %v5424_v13  ;;  %v5472_v51 = vld [vmem:[%s7599_s1 + $0xdc4] ss:$8 sps:$4 sm:$0xff]   ;;  %v5470_v54 = vld [vmem:[%s7599_s1 + $0xdc0] ss:$8 sps:$4 sm:$0xff]   ;;  %v5475_v55 = vld [vmem:[%s7599_s1 + $0x5d4] ss:$8 sps:$4 sm:$0xff]   ;;  %v7067_v13 = vrot.slane %v722_v7, %v5893_v49 }
 0x152   :  { %v5478_v57 = vld [vmem:[%s7599_s1 + $0xdd4] ss:$8 sps:$4 sm:$0xff]   ;;  %v5473_v39 = vld [vmem:[%s7599_s1 + $0x5d0] ss:$8 sps:$4 sm:$0xff]   ;;  %v5481_v60 = vld [vmem:[%s7599_s1 + $0x5e4] ss:$8 sps:$4 sm:$0xff]  }
 0x153   :  { %3561 = vmatpush1.bf16.msra.mxu1 %v5419_v14  ;;  %v5476_v59 = vld [vmem:[%s7599_s1 + $0xdd0] ss:$8 sps:$4 sm:$0xff]   ;;  %v5484_v61 = vld [vmem:[%s7599_s1 + $0xde4] ss:$8 sps:$4 sm:$0xff]   ;;  %v5479_v43 = vld [vmem:[%s7599_s1 + $0x5e0] ss:$8 sps:$4 sm:$0xff]  }
 0x154   :  { %3889 = vmatpush1.bf16.msra.mxu0 %v5422_v15  ;;  %3562 = vmatprep.subr.bf16.mxu1 %v5427_v18  ;;  %v5482_v44 = vld [vmem:[%s7599_s1 + $0xde0] ss:$8 sps:$4 sm:$0xff]   ;;  %v5487_v2 = vld [vmem:[%s7599_s1 + $0x5f4] ss:$8 sps:$4 sm:$0xff]   ;;  %v5485_v4 = vld [vmem:[%s7599_s1 + $0x5f0] ss:$8 sps:$4 sm:$0xff]  }
 0x155   :  { %3890 = vmatprep.subr.bf16.mxu0 %v5430_v19  ;;  %v5490_v40 = vld [vmem:[%s7599_s1 + $0xdf4] ss:$8 sps:$4 sm:$0xff]   ;;  %v5488_v5 = vld [vmem:[%s7599_s1 + $0xdf0] ss:$8 sps:$4 sm:$0xff]   ;;  %v5493_v58 = vld [vmem:[%s7599_s1 + $0x604] ss:$8 sps:$4 sm:$0xff]  }
 0x156   :  { %v5496_v38 = vld [vmem:[%s7599_s1 + $0xe04] ss:$8 sps:$4 sm:$0xff]   ;;  %v5491_v10 = vld [vmem:[%s7599_s1 + $0x600] ss:$8 sps:$4 sm:$0xff]   ;;  %v5499_v12 = vld [vmem:[%s7599_s1 + $0x614] ss:$8 sps:$4 sm:$0xff]  }
 0x157   :  { %3563 = vmatpush1.bf16.msra.mxu1 %v5425_v20  ;;  %v5494_v11 = vld [vmem:[%s7599_s1 + $0xe00] ss:$8 sps:$4 sm:$0xff]   ;;  %v5502_v62 = vld [vmem:[%s7599_s1 + $0xe14] ss:$8 sps:$4 sm:$0xff]   ;;  %v5497_v14 = vld [vmem:[%s7599_s1 + $0x610] ss:$8 sps:$4 sm:$0xff]  }
 0x158   :  { %3891 = vmatpush1.bf16.msra.mxu0 %v5428_v21  ;;  %3564 = vmatprep.subr.bf16.mxu1 %v5433_v22  ;;  %v5500_v15 = vld [vmem:[%s7599_s1 + $0xe10] ss:$8 sps:$4 sm:$0xff]   ;;  %v5505_v18 = vld [vmem:[%s7599_s1 + $0x624] ss:$8 sps:$4 sm:$0xff]   ;;  %v5503_v20 = vld [vmem:[%s7599_s1 + $0x620] ss:$8 sps:$4 sm:$0xff]  }
 0x159   :  { %3892 = vmatprep.subr.bf16.mxu0 %v5436_v52  ;;  %v5508_v19 = vld [vmem:[%s7599_s1 + $0xe24] ss:$8 sps:$4 sm:$0xff]   ;;  %v5506_v21 = vld [vmem:[%s7599_s1 + $0xe20] ss:$8 sps:$4 sm:$0xff]   ;;  %v5511_v22 = vld [vmem:[%s7599_s1 + $0x634] ss:$8 sps:$4 sm:$0xff]  }
 0x15a   :  { %v5514_v52 = vld [vmem:[%s7599_s1 + $0xe34] ss:$8 sps:$4 sm:$0xff]   ;;  %v5557_v0 = vld [vmem:[%s7599_s1 + $0x6b0] ss:$8 sps:$4 sm:$0xff]   ;;  %v5577_v6 = vld [vmem:[%s7599_s1 + $0x6e4] ss:$8 sps:$4 sm:$0xff]  }
 0x15b   :  { %3565 = vmatpush1.bf16.msra.mxu1 %v5431_v24  ;;  %v5509_v24 = vld [vmem:[%s7599_s1 + $0x630] ss:$8 sps:$4 sm:$0xff]   ;;  %v5580_v7 = vld [vmem:[%s7599_s1 + $0xee4] ss:$8 sps:$4 sm:$0xff]   ;;  %vm5715_vm0 = vmmov 0   ;;  %vm4130_vm1 = vcmask 523264  }
 0x15c   :  { %3893 = vmatpush1.bf16.msra.mxu0 %v5434_v25  ;;  %3566 = vmatprep.subr.bf16.mxu1 %v5439_v26  ;;  %v5512_v25 = vld [vmem:[%s7599_s1 + $0xe30] ss:$8 sps:$4 sm:$0xff]   ;;  %v5517_v26 = vld [vmem:[%s7599_s1 + $0x644] ss:$8 sps:$4 sm:$0xff]   ;;  %vm4210_vm2 = vcmask 287744  }
 0x15d   :  { %3894 = vmatprep.subr.bf16.mxu0 %v5442_v27  ;;  %v5520_v27 = vld [vmem:[%s7599_s1 + $0xe44] ss:$8 sps:$4 sm:$0xff]   ;;  %v5560_v1 = vld [vmem:[%s7599_s1 + $0xeb0] ss:$8 sps:$4 sm:$0xff]  }
 0x15f   :  { %3567 = vmatpush1.bf16.msra.mxu1 %v5437_v28  ;;  %v5515_v28 = vld [vmem:[%s7599_s1 + $0x640] ss:$8 sps:$4 sm:$0xff]  }
 0x160   :  { %3895 = vmatpush1.bf16.msra.mxu0 %v5440_v29  ;;  %3568 = vmatprep.subr.bf16.mxu1 %v5445_v30  ;;  %v5518_v29 = vld [vmem:[%s7599_s1 + $0xe40] ss:$8 sps:$4 sm:$0xff]   ;;  %v5523_v30 = vld [vmem:[%s7599_s1 + $0x654] ss:$8 sps:$4 sm:$0xff]  }
 0x161   :  { %3896 = vmatprep.subr.bf16.mxu0 %v5448_v31  ;;  %v5526_v31 = vld [vmem:[%s7599_s1 + $0xe54] ss:$8 sps:$4 sm:$0xff]  }
 0x163   :  { %3569 = vmatpush1.bf16.msra.mxu1 %v5443_v32  ;;  %v5521_v32 = vld [vmem:[%s7599_s1 + $0x650] ss:$8 sps:$4 sm:$0xff]  }
 0x164   :  { %3897 = vmatpush1.bf16.msra.mxu0 %v5446_v33  ;;  %3570 = vmatprep.subr.bf16.mxu1 %v5451_v34  ;;  %v5524_v33 = vld [vmem:[%s7599_s1 + $0xe50] ss:$8 sps:$4 sm:$0xff]   ;;  %v5529_v34 = vld [vmem:[%s7599_s1 + $0x664] ss:$8 sps:$4 sm:$0xff]  }
 0x165   :  { %3898 = vmatprep.subr.bf16.mxu0 %v5454_v16  ;;  %v5532_v16 = vld [vmem:[%s7599_s1 + $0xe64] ss:$8 sps:$4 sm:$0xff]  }
 0x167   :  { %3571 = vmatpush1.bf16.msra.mxu1 %v5449_v36  ;;  %v5527_v36 = vld [vmem:[%s7599_s1 + $0x660] ss:$8 sps:$4 sm:$0xff]  }
 0x168   :  { %3899 = vmatpush1.bf16.msra.mxu0 %v5452_v37  ;;  %3572 = vmatprep.subr.bf16.mxu1 %v5457_v56  ;;  %v5530_v37 = vld [vmem:[%s7599_s1 + $0xe60] ss:$8 sps:$4 sm:$0xff]   ;;  %v5535_v56 = vld [vmem:[%s7599_s1 + $0x674] ss:$8 sps:$4 sm:$0xff]  }
 0x169   :  { %3900 = vmatprep.subr.bf16.mxu0 %v5460_v23  ;;  %v5538_v23 = vld [vmem:[%s7599_s1 + $0xe74] ss:$8 sps:$4 sm:$0xff]  }
 0x16b   :  { %3573 = vmatpush1.bf16.msra.mxu1 %v5455_v45  ;;  %v5533_v45 = vld [vmem:[%s7599_s1 + $0x670] ss:$8 sps:$4 sm:$0xff]  }
 0x16c   :  { %3901 = vmatpush1.bf16.msra.mxu0 %v5458_v46  ;;  %3574 = vmatprep.subr.bf16.mxu1 %v5463_v17  ;;  %v5536_v46 = vld [vmem:[%s7599_s1 + $0xe70] ss:$8 sps:$4 sm:$0xff]   ;;  %v5541_v17 = vld [vmem:[%s7599_s1 + $0x684] ss:$8 sps:$4 sm:$0xff]  }
 0x16d   :  { %3902 = vmatprep.subr.bf16.mxu0 %v5466_v35  ;;  %v5544_v35 = vld [vmem:[%s7599_s1 + $0xe84] ss:$8 sps:$4 sm:$0xff]  }
 0x16f   :  { %3575 = vmatpush1.bf16.msra.mxu1 %v5461_v47  ;;  %v5539_v47 = vld [vmem:[%s7599_s1 + $0x680] ss:$8 sps:$4 sm:$0xff]  }
 0x170   :  { %3903 = vmatpush1.bf16.msra.mxu0 %v5464_v48  ;;  %3576 = vmatprep.subr.bf16.mxu1 %v5469_v50  ;;  %v5542_v48 = vld [vmem:[%s7599_s1 + $0xe80] ss:$8 sps:$4 sm:$0xff]   ;;  %v5547_v50 = vld [vmem:[%s7599_s1 + $0x694] ss:$8 sps:$4 sm:$0xff]  }
 0x171   :  { %3904 = vmatprep.subr.bf16.mxu0 %v5472_v51  ;;  %v5550_v51 = vld [vmem:[%s7599_s1 + $0xe94] ss:$8 sps:$4 sm:$0xff]  }
 0x173   :  { %3577 = vmatpush1.bf16.msra.mxu1 %v5467_v53  ;;  %v5545_v53 = vld [vmem:[%s7599_s1 + $0x690] ss:$8 sps:$4 sm:$0xff]  }
 0x174   :  { %3905 = vmatpush1.bf16.msra.mxu0 %v5470_v54  ;;  %3578 = vmatprep.subr.bf16.mxu1 %v5475_v55  ;;  %v5548_v54 = vld [vmem:[%s7599_s1 + $0xe90] ss:$8 sps:$4 sm:$0xff]   ;;  %v5553_v55 = vld [vmem:[%s7599_s1 + $0x6a4] ss:$8 sps:$4 sm:$0xff]  }
 0x175   :  { %3906 = vmatprep.subr.bf16.mxu0 %v5478_v57  ;;  %v5556_v57 = vld [vmem:[%s7599_s1 + $0xea4] ss:$8 sps:$4 sm:$0xff]  }
 0x177   :  { %3579 = vmatpush1.bf16.msra.mxu1 %v5473_v39  ;;  %v5551_v39 = vld [vmem:[%s7599_s1 + $0x6a0] ss:$8 sps:$4 sm:$0xff]  }
 0x178   :  { %3907 = vmatpush1.bf16.msra.mxu0 %v5476_v59  ;;  %3580 = vmatprep.subr.bf16.mxu1 %v5481_v60  ;;  %v5554_v59 = vld [vmem:[%s7599_s1 + $0xea0] ss:$8 sps:$4 sm:$0xff]   ;;  %v5559_v60 = vld [vmem:[%s7599_s1 + $0x6b4] ss:$8 sps:$4 sm:$0xff]  }
 0x179   :  { %3908 = vmatprep.subr.bf16.mxu0 %v5484_v61  ;;  %v5562_v61 = vld [vmem:[%s7599_s1 + $0xeb4] ss:$8 sps:$4 sm:$0xff]  }
 0x17b   :  { %3581 = vmatpush1.bf16.msra.mxu1 %v5479_v43  ;;  %v5565_v43 = vld [vmem:[%s7599_s1 + $0x6c4] ss:$8 sps:$4 sm:$0xff]  }
 0x17c   :  { %3909 = vmatpush1.bf16.msra.mxu0 %v5482_v44  ;;  %3582 = vmatprep.subr.bf16.mxu1 %v5487_v2  ;;  %v5568_v44 = vld [vmem:[%s7599_s1 + $0xec4] ss:$8 sps:$4 sm:$0xff]   ;;  %v5563_v2 = vld [vmem:[%s7599_s1 + $0x6c0] ss:$8 sps:$4 sm:$0xff]  }
 0x17d   :  { %3910 = vmatprep.subr.bf16.mxu0 %v5490_v40  ;;  %v5566_v40 = vld [vmem:[%s7599_s1 + $0xec0] ss:$8 sps:$4 sm:$0xff]  }
 0x17f   :  { %3583 = vmatpush1.bf16.msra.mxu1 %v5485_v4  ;;  %v5571_v4 = vld [vmem:[%s7599_s1 + $0x6d4] ss:$8 sps:$4 sm:$0xff]  }
 0x180   :  { %3911 = vmatpush1.bf16.msra.mxu0 %v5488_v5  ;;  %3593 = vmatprep.subr.bf16.mxu1 %v5493_v58  ;;  %v5574_v5 = vld [vmem:[%s7599_s1 + $0xed4] ss:$8 sps:$4 sm:$0xff]   ;;  %v5569_v58 = vld [vmem:[%s7599_s1 + $0x6d0] ss:$8 sps:$4 sm:$0xff]  }
 0x181   :  { %3921 = vmatprep.subr.bf16.mxu0 %v5496_v38  ;;  %v5572_v38 = vld [vmem:[%s7599_s1 + $0xed0] ss:$8 sps:$4 sm:$0xff]  }
 0x182   :  { %3585 = vmatmul.mubr.bf16.vlgmr.msra.gmra.mrb[0].mxu1 %v653_v8  ;;  %v5575_v8 = vld [vmem:[%s7599_s1 + $0x6e0] ss:$8 sps:$4 sm:$0xff]  }
 0x183   :  { %3913 = vmatmul.mubr.bf16.vlgmr.msra.gmra.mrb[0].mxu0 %v751_v9  ;;  %3594 = vmatpush1.bf16.msra.mxu1 %v5491_v10  ;;  %v5578_v9 = vld [vmem:[%s7599_s1 + $0xee0] ss:$8 sps:$4 sm:$0xff]   ;;  %v5583_v10 = vld [vmem:[%s7599_s1 + $0x6f4] ss:$8 sps:$4 sm:$0xff]  }
 0x184   :  { %3922 = vmatpush1.bf16.msra.mxu0 %v5494_v11  ;;  %3595 = vmatprep.subr.bf16.mxu1 %v5499_v12  ;;  %v5586_v11 = vld [vmem:[%s7599_s1 + $0xef4] ss:$8 sps:$4 sm:$0xff]   ;;  %v5581_v12 = vld [vmem:[%s7599_s1 + $0x6f0] ss:$8 sps:$4 sm:$0xff]  }
 0x185   :  { %3923 = vmatprep.subr.bf16.mxu0 %v5502_v62  ;;  %3625 = vmatprep.mubr.bf16.mxu1 %v7064_v63  ;;  %v5584_v62 = vld [vmem:[%s7599_s1 + $0xef0] ss:$8 sps:$4 sm:$0xff]  }
 0x186   :  { %3953 = vmatprep.mubr.bf16.mxu0 %v7067_v13 }
 0x187   :  { %3596 = vmatpush1.bf16.msra.mxu1 %v5497_v14  ;;  %v5590_v14 = vld [vmem:[%s7599_s1 + $0x704] ss:$8 sps:$4 sm:$0xff]  }
 0x188   :  { %3924 = vmatpush1.bf16.msra.mxu0 %v5500_v15  ;;  %3597 = vmatprep.subr.bf16.mxu1 %v5505_v18  ;;  %v5594_v15 = vld [vmem:[%s7599_s1 + $0xf04] ss:$8 sps:$4 sm:$0xff]   ;;  %v7253_v18 = vrot.slane %v7026_v41, %v5893_v49  ;;  %v5597_v41 = vld [vmem:[%s7599_s1 + $0x714] ss:$8 sps:$4 sm:$0xff]  }
 0x189   :  { %3925 = vmatprep.subr.bf16.mxu0 %v5508_v19  ;;  %v7257_v19 = vrot.slane %v7029_v3, %v5893_v49  ;;  %v5600_v49 = vld [vmem:[%s7599_s1 + $0xf14] ss:$8 sps:$4 sm:$0xff]   ;;  %v656_v3 = vcombine.high %v7064_v63, %v7064_v63  ;;  %v5603_v63 = vld [vmem:[%s7599_s1 + $0x724] ss:$8 sps:$4 sm:$0xff]  }
 0x18b   :  { %3598 = vmatpush1.bf16.msra.mxu1 %v5503_v20  ;;  %v5588_v20 = vld [vmem:[%s7599_s1 + $0x700] ss:$8 sps:$4 sm:$0xff]  }
 0x18c   :  { %3926 = vmatpush1.bf16.msra.mxu0 %v5506_v21  ;;  %3599 = vmatprep.subr.bf16.mxu1 %v5511_v22  ;;  %v5592_v21 = vld [vmem:[%s7599_s1 + $0xf00] ss:$8 sps:$4 sm:$0xff]   ;;  %v754_v22 = vcombine.high %v7067_v13, %v7067_v13  ;;  %v5606_v13 = vld [vmem:[%s7599_s1 + $0xf24] ss:$8 sps:$4 sm:$0xff]  }
 0x18d   :  { %3927 = vmatprep.subr.bf16.mxu0 %v5514_v52  ;;  %v5595_v52 = vld [vmem:[%s7599_s1 + $0x710] ss:$8 sps:$4 sm:$0xff]  }
 0x18f   :  { %3600 = vmatpush1.bf16.msra.mxu1 %v5509_v24  ;;  %v5598_v24 = vld [vmem:[%s7599_s1 + $0xf10] ss:$8 sps:$4 sm:$0xff]  }
 0x190   :  { %3928 = vmatpush1.bf16.msra.mxu0 %v5512_v25  ;;  %3601 = vmatprep.subr.bf16.mxu1 %v5517_v26  ;;  %v5601_v25 = vld [vmem:[%s7599_s1 + $0x720] ss:$8 sps:$4 sm:$0xff]  }
 0x191   :  { %3929 = vmatprep.subr.bf16.mxu0 %v5520_v27  ;;  %v5604_v26 = vld [vmem:[%s7599_s1 + $0xf20] ss:$8 sps:$4 sm:$0xff]   ;;  %v5609_v27 = vld [vmem:[%s7599_s1 + $0x734] ss:$8 sps:$4 sm:$0xff]  }
 0x193   :  { %3602 = vmatpush1.bf16.msra.mxu1 %v5515_v28  ;;  %v5612_v28 = vld [vmem:[%s7599_s1 + $0xf34] ss:$8 sps:$4 sm:$0xff]  }
 0x194   :  { %3930 = vmatpush1.bf16.msra.mxu0 %v5518_v29  ;;  %3603 = vmatprep.subr.bf16.mxu1 %v5523_v30  ;;  %v5607_v29 = vld [vmem:[%s7599_s1 + $0x730] ss:$8 sps:$4 sm:$0xff]  }
 0x195   :  { %3931 = vmatprep.subr.bf16.mxu0 %v5526_v31  ;;  %v5610_v30 = vld [vmem:[%s7599_s1 + $0xf30] ss:$8 sps:$4 sm:$0xff]   ;;  %v5615_v31 = vld [vmem:[%s7599_s1 + $0x744] ss:$8 sps:$4 sm:$0xff]  }
 0x197   :  { %3604 = vmatpush1.bf16.msra.mxu1 %v5521_v32  ;;  %v5618_v32 = vld [vmem:[%s7599_s1 + $0xf44] ss:$8 sps:$4 sm:$0xff]  }
 0x198   :  { %3932 = vmatpush1.bf16.msra.mxu0 %v5524_v33  ;;  %3605 = vmatprep.subr.bf16.mxu1 %v5529_v34  ;;  %v5613_v33 = vld [vmem:[%s7599_s1 + $0x740] ss:$8 sps:$4 sm:$0xff]  }
 0x199   :  { %3933 = vmatprep.subr.bf16.mxu0 %v5532_v16  ;;  %v5616_v34 = vld [vmem:[%s7599_s1 + $0xf40] ss:$8 sps:$4 sm:$0xff]   ;;  %v5621_v16 = vld [vmem:[%s7599_s1 + $0x754] ss:$8 sps:$4 sm:$0xff]  }
 0x19b   :  { %3606 = vmatpush1.bf16.msra.mxu1 %v5527_v36  ;;  %v5624_v36 = vld [vmem:[%s7599_s1 + $0xf54] ss:$8 sps:$4 sm:$0xff]  }
 0x19c   :  { %3934 = vmatpush1.bf16.msra.mxu0 %v5530_v37  ;;  %3607 = vmatprep.subr.bf16.mxu1 %v5535_v56  ;;  %v5619_v37 = vld [vmem:[%s7599_s1 + $0x750] ss:$8 sps:$4 sm:$0xff]  }
 0x19d   :  { %3935 = vmatprep.subr.bf16.mxu0 %v5538_v23  ;;  %v5622_v56 = vld [vmem:[%s7599_s1 + $0xf50] ss:$8 sps:$4 sm:$0xff]   ;;  %v5627_v23 = vld [vmem:[%s7599_s1 + $0x764] ss:$8 sps:$4 sm:$0xff]  }
 0x19f   :  { %3608 = vmatpush1.bf16.msra.mxu1 %v5533_v45  ;;  %v5630_v45 = vld [vmem:[%s7599_s1 + $0xf64] ss:$8 sps:$4 sm:$0xff]  }
 0x1a0   :  { %3936 = vmatpush1.bf16.msra.mxu0 %v5536_v46  ;;  %3609 = vmatprep.subr.bf16.mxu1 %v5541_v17  ;;  %v5625_v46 = vld [vmem:[%s7599_s1 + $0x760] ss:$8 sps:$4 sm:$0xff]  }
 0x1a1   :  { %3937 = vmatprep.subr.bf16.mxu0 %v5544_v35  ;;  %v5628_v17 = vld [vmem:[%s7599_s1 + $0xf60] ss:$8 sps:$4 sm:$0xff]   ;;  %v5633_v35 = vld [vmem:[%s7599_s1 + $0x774] ss:$8 sps:$4 sm:$0xff]  }
 0x1a3   :  { %3610 = vmatpush1.bf16.msra.mxu1 %v5539_v47  ;;  %v5636_v47 = vld [vmem:[%s7599_s1 + $0xf74] ss:$8 sps:$4 sm:$0xff]  }
 0x1a4   :  { %3938 = vmatpush1.bf16.msra.mxu0 %v5542_v48  ;;  %3611 = vmatprep.subr.bf16.mxu1 %v5547_v50  ;;  %v5631_v48 = vld [vmem:[%s7599_s1 + $0x770] ss:$8 sps:$4 sm:$0xff]  }
 0x1a5   :  { %3939 = vmatprep.subr.bf16.mxu0 %v5550_v51  ;;  %v5634_v50 = vld [vmem:[%s7599_s1 + $0xf70] ss:$8 sps:$4 sm:$0xff]   ;;  %v5639_v51 = vld [vmem:[%s7599_s1 + $0x784] ss:$8 sps:$4 sm:$0xff]  }
 0x1a7   :  { %3612 = vmatpush1.bf16.msra.mxu1 %v5545_v53  ;;  %v5642_v53 = vld [vmem:[%s7599_s1 + $0xf84] ss:$8 sps:$4 sm:$0xff]  }
 0x1a8   :  { %3940 = vmatpush1.bf16.msra.mxu0 %v5548_v54  ;;  %3613 = vmatprep.subr.bf16.mxu1 %v5553_v55  ;;  %v5637_v54 = vld [vmem:[%s7599_s1 + $0x780] ss:$8 sps:$4 sm:$0xff]  }
 0x1a9   :  { %3941 = vmatprep.subr.bf16.mxu0 %v5556_v57  ;;  %v5640_v55 = vld [vmem:[%s7599_s1 + $0xf80] ss:$8 sps:$4 sm:$0xff]   ;;  %v5645_v57 = vld [vmem:[%s7599_s1 + $0x794] ss:$8 sps:$4 sm:$0xff]  }
 0x1ab   :  { %3614 = vmatpush1.bf16.msra.mxu1 %v5551_v39  ;;  %v5648_v39 = vld [vmem:[%s7599_s1 + $0xf94] ss:$8 sps:$4 sm:$0xff]  }
 0x1ac   :  { %3942 = vmatpush1.bf16.msra.mxu0 %v5554_v59  ;;  %3615 = vmatprep.subr.bf16.mxu1 %v5559_v60  ;;  %v5643_v59 = vld [vmem:[%s7599_s1 + $0x790] ss:$8 sps:$4 sm:$0xff]  }
 0x1ad   :  { %3943 = vmatprep.subr.bf16.mxu0 %v5562_v61  ;;  %v5646_v60 = vld [vmem:[%s7599_s1 + $0xf90] ss:$8 sps:$4 sm:$0xff]   ;;  %v5651_v61 = vld [vmem:[%s7599_s1 + $0x7a4] ss:$8 sps:$4 sm:$0xff]  }
 0x1af   :  { %3616 = vmatpush1.bf16.msra.mxu1 %v5557_v0  ;;  %v5654_v0 = vld [vmem:[%s7599_s1 + $0xfa4] ss:$8 sps:$4 sm:$0xff]  }
 0x1b0   :  { %3944 = vmatpush1.bf16.msra.mxu0 %v5560_v1  ;;  %3617 = vmatprep.subr.bf16.mxu1 %v5565_v43  ;;  %v5649_v1 = vld [vmem:[%s7599_s1 + $0x7a0] ss:$8 sps:$4 sm:$0xff]  }
 0x1b1   :  { %3945 = vmatprep.subr.bf16.mxu0 %v5568_v44  ;;  %v5652_v43 = vld [vmem:[%s7599_s1 + $0xfa0] ss:$8 sps:$4 sm:$0xff]   ;;  %v5657_v44 = vld [vmem:[%s7599_s1 + $0x7b4] ss:$8 sps:$4 sm:$0xff]  }
 0x1b3   :  { %3618 = vmatpush1.bf16.msra.mxu1 %v5563_v2  ;;  %v5660_v2 = vld [vmem:[%s7599_s1 + $0xfb4] ss:$8 sps:$4 sm:$0xff]  }
 0x1b4   :  { %3946 = vmatpush1.bf16.msra.mxu0 %v5566_v40  ;;  %3619 = vmatprep.subr.bf16.mxu1 %v5571_v4  ;;  %v5655_v40 = vld [vmem:[%s7599_s1 + $0x7b0] ss:$8 sps:$4 sm:$0xff]  }
 0x1b5   :  { %3947 = vmatprep.subr.bf16.mxu0 %v5574_v5  ;;  %v5658_v4 = vld [vmem:[%s7599_s1 + $0xfb0] ss:$8 sps:$4 sm:$0xff]   ;;  %v5663_v5 = vld [vmem:[%s7599_s1 + $0x7c4] ss:$8 sps:$4 sm:$0xff]  }
 0x1b7   :  { %3620 = vmatpush1.bf16.msra.mxu1 %v5569_v58  ;;  %v5666_v58 = vld [vmem:[%s7599_s1 + $0xfc4] ss:$8 sps:$4 sm:$0xff]  }
 0x1b8   :  { %3948 = vmatpush1.bf16.msra.mxu0 %v5572_v38  ;;  %3621 = vmatprep.subr.bf16.mxu1 %v5577_v6  ;;  %v5661_v38 = vld [vmem:[%s7599_s1 + $0x7c0] ss:$8 sps:$4 sm:$0xff]  }
 0x1b9   :  { %3949 = vmatprep.subr.bf16.mxu0 %v5580_v7  ;;  %v5664_v6 = vld [vmem:[%s7599_s1 + $0xfc0] ss:$8 sps:$4 sm:$0xff]   ;;  %v5669_v7 = vld [vmem:[%s7599_s1 + $0x7d4] ss:$8 sps:$4 sm:$0xff]  }
 0x1bb   :  { %3622 = vmatpush1.bf16.msra.mxu1 %v5575_v8  ;;  %v5672_v8 = vld [vmem:[%s7599_s1 + $0xfd4] ss:$8 sps:$4 sm:$0xff]  }
 0x1bc   :  { %3950 = vmatpush1.bf16.msra.mxu0 %v5578_v9  ;;  %3623 = vmatprep.subr.bf16.mxu1 %v5583_v10  ;;  %v5667_v9 = vld [vmem:[%s7599_s1 + $0x7d0] ss:$8 sps:$4 sm:$0xff]  }
 0x1bd   :  { %3951 = vmatprep.subr.bf16.mxu0 %v5586_v11  ;;  %v5670_v10 = vld [vmem:[%s7599_s1 + $0xfd0] ss:$8 sps:$4 sm:$0xff]   ;;  %v5675_v11 = vld [vmem:[%s7599_s1 + $0x7e4] ss:$8 sps:$4 sm:$0xff]  }
 0x1bf   :  { %3624 = vmatpush1.bf16.msra.mxu1 %v5581_v12  ;;  %v5678_v12 = vld [vmem:[%s7599_s1 + $0xfe4] ss:$8 sps:$4 sm:$0xff]  }
 0x1c0   :  { %3952 = vmatpush1.bf16.msra.mxu0 %v5584_v62  ;;  %3634 = vmatprep.subr.bf16.mxu1 %v5590_v14  ;;  %v5673_v62 = vld [vmem:[%s7599_s1 + $0x7e0] ss:$8 sps:$4 sm:$0xff]  }
 0x1c1   :  { %3962 = vmatprep.subr.bf16.mxu0 %v5594_v15  ;;  %v5676_v14 = vld [vmem:[%s7599_s1 + $0xfe0] ss:$8 sps:$4 sm:$0xff]   ;;  %v5681_v15 = vld [vmem:[%s7599_s1 + $0x7f4] ss:$8 sps:$4 sm:$0xff]  }
 0x1c2   :  { %3626 = vmatmul.mubr.bf16.vlgmr.msra.gmra.mrb[0].mxu1 %v7253_v18 }
 0x1c3   :  { %3954 = vmatmul.mubr.bf16.vlgmr.msra.gmra.mrb[0].mxu0 %v7257_v19  ;;  %3635 = vmatpush1.bf16.msra.mxu1 %v5588_v20  ;;  %v5684_v20 = vld [vmem:[%s7599_s1 + $0xff4] ss:$8 sps:$4 sm:$0xff]  }
 0x1c4   :  { %3963 = vmatpush1.bf16.msra.mxu0 %v5592_v21  ;;  %3636 = vmatprep.subr.bf16.mxu1 %v5597_v41  ;;  %v4021_v21 = vld [vmem:[%s7601_s3 + $0x80] sm:$0xff]  ;;  %v4022_v41 = vld [vmem:[%s7601_s3 + $0x88] sm:$0xff] }
 0x1c5   :  { %3964 = vmatprep.subr.bf16.mxu0 %v5600_v49  ;;  %3666 = vmatprep.mubr.bf16.mxu1 %v656_v3  ;;  %v5679_v49 = vld [vmem:[%s7599_s1 + $0x7f0] ss:$8 sps:$4 sm:$0xff]  }
 0x1c6   :  { %3994 = vmatprep.mubr.bf16.mxu0 %v754_v22  ;;  %v5682_v3 = vld [vmem:[%s7599_s1 + $0xff0] ss:$8 sps:$4 sm:$0xff]   ;;  %v4804_v22 = vpack.c.bf16 %v4022_v41, %v4021_v21 }
 0x1c7   :  { %3637 = vmatpush1.bf16.msra.mxu1 %v5595_v52  ;;  %v4005_v52 = vld [vmem:[%s7601_s3] sm:$0xff] }
 0x1c8   :  { %3965 = vmatpush1.bf16.msra.mxu0 %v5598_v24  ;;  %3638 = vmatprep.subr.bf16.mxu1 %v5603_v63  ;;  %v4006_v24 = vld [vmem:[%s7601_s3 + $0x8] sm:$0xff]  ;;  %v4023_v63 = vld [vmem:[%s7601_s3 + $0x90] sm:$0xff] }
 0x1c9   :  { %3966 = vmatprep.subr.bf16.mxu0 %v5606_v13  ;;  %v4024_v13 = vld [vmem:[%s7601_s3 + $0x98] sm:$0xff] }
 0x1cb   :  { %3639 = vmatpush1.bf16.msra.mxu1 %v5601_v25  ;;  %v654_v25 = vcombine.high %v7253_v18, %v7253_v18  ;;  %v4025_v18 = vld [vmem:[%s7601_s3 + $0xa0] sm:$0xff] }
 0x1cc   :  { %3967 = vmatpush1.bf16.msra.mxu0 %v5604_v26  ;;  %3640 = vmatprep.subr.bf16.mxu1 %v5609_v27  ;;  %v752_v26 = vcombine.high %v7257_v19, %v7257_v19  ;;  %v4806_v27 = vpack.c.bf16 %v4006_v24, %v4005_v52  ;;  %v4026_v19 = vld [vmem:[%s7601_s3 + $0xa8] sm:$0xff] }
 0x1cd   :  { %3968 = vmatprep.subr.bf16.mxu0 %v5612_v28  ;;  %v4808_v28 = vpack.c.bf16 %v4024_v13, %v4023_v63 }
 0x1cf   :  { %3641 = vmatpush1.bf16.msra.mxu1 %v5607_v29  ;;  %v4007_v29 = vld [vmem:[%s7601_s3 + $0x10] sm:$0xff] }
 0x1d0   :  { %3969 = vmatpush1.bf16.msra.mxu0 %v5610_v30  ;;  %3642 = vmatprep.subr.bf16.mxu1 %v5615_v31  ;;  %v4008_v30 = vld [vmem:[%s7601_s3 + $0x18] sm:$0xff] }
 0x1d1   :  { %3970 = vmatprep.subr.bf16.mxu0 %v5618_v32  ;;  %v4810_v31 = vpack.c.bf16 %v4008_v30, %v4007_v29  ;;  %v4812_v32 = vpack.c.bf16 %v4026_v19, %v4025_v18  ;;  %v4120_v18 = vld [vmem:[%s7603_s5 + $0x28] sm:$0xff] }
 0x1d3   :  { %3643 = vmatpush1.bf16.msra.mxu1 %v5613_v33  ;;  %v4009_v33 = vld [vmem:[%s7601_s3 + $0x20] sm:$0xff] }
 0x1d4   :  { %3971 = vmatpush1.bf16.msra.mxu0 %v5616_v34  ;;  %3644 = vmatprep.subr.bf16.mxu1 %v5621_v16  ;;  %v4010_v34 = vld [vmem:[%s7601_s3 + $0x28] sm:$0xff]  ;;  %v4027_v16 = vld [vmem:[%s7601_s3 + $0xb0] sm:$0xff] }
 0x1d5   :  { %3972 = vmatprep.subr.bf16.mxu0 %v5624_v36  ;;  %v4028_v36 = vld [vmem:[%s7601_s3 + $0xb8] sm:$0xff] }
 0x1d7   :  { %3645 = vmatpush1.bf16.msra.mxu1 %v5619_v37  ;;  %v4814_v37 = vpack.c.bf16 %v4010_v34, %v4009_v33  ;;  %v5716_v34 = vmov 0.0  }
 0x1d8   :  { %3973 = vmatpush1.bf16.msra.mxu0 %v5622_v56  ;;  %3646 = vmatprep.subr.bf16.mxu1 %v5627_v23  ;;  %v4816_v56 = vpack.c.bf16 %v4028_v36, %v4027_v16  ;;  %v4011_v23 = vld [vmem:[%s7601_s3 + $0x30] sm:$0xff]  ;;  %v4738_v36 = vld [vmem:[%s7602_s4] ss:$0 sm:$0xff]  ;;  %s5717_s4 = smov [#allocation2]  }
 0x1d9   :  { %3974 = vmatprep.subr.bf16.mxu0 %v5630_v45  ;;  %v4012_v45 = vld [vmem:[%s7601_s3 + $0x38] sm:$0xff] }
 0x1db   :  { %3647 = vmatpush1.bf16.msra.mxu1 %v5625_v46  ;;  %v4029_v46 = vld [vmem:[%s7601_s3 + $0xc0] sm:$0xff] }
 0x1dc   :  { %3975 = vmatpush1.bf16.msra.mxu0 %v5628_v17  ;;  %3648 = vmatprep.subr.bf16.mxu1 %v5633_v35  ;;  %v4030_v17 = vld [vmem:[%s7601_s3 + $0xc8] sm:$0xff]  ;;  %v4818_v35 = vpack.c.bf16 %v4012_v45, %v4011_v23 }
 0x1dd   :  { %3976 = vmatprep.subr.bf16.mxu0 %v5636_v47  ;;  %v4820_v47 = vpack.c.bf16 %v4030_v17, %v4029_v46  ;;  %v4739_v46 = vld [vmem:[%s7604_s6] ss:$0 sm:$0xff] }
 0x1df   :  { %3649 = vmatpush1.bf16.msra.mxu1 %v5631_v48  ;;  %v4013_v48 = vld [vmem:[%s7601_s3 + $0x40] sm:$0xff] }
 0x1e0   :  { %3977 = vmatpush1.bf16.msra.mxu0 %v5634_v50  ;;  %3650 = vmatprep.subr.bf16.mxu1 %v5639_v51  ;;  %v4014_v50 = vld [vmem:[%s7601_s3 + $0x48] sm:$0xff]  ;;  %v4031_v51 = vld [vmem:[%s7601_s3 + $0xd0] sm:$0xff] }
 0x1e1   :  { %3978 = vmatprep.subr.bf16.mxu0 %v5642_v53  ;;  %v4032_v53 = vld [vmem:[%s7601_s3 + $0xd8] sm:$0xff] }
 0x1e3   :  { %3651 = vmatpush1.bf16.msra.mxu1 %v5637_v54  ;;  %v4822_v54 = vpack.c.bf16 %v4014_v50, %v4013_v48 }
 0x1e4   :  { %3979 = vmatpush1.bf16.msra.mxu0 %v5640_v55  ;;  %3652 = vmatprep.subr.bf16.mxu1 %v5645_v57  ;;  %v4824_v55 = vpack.c.bf16 %v4032_v53, %v4031_v51  ;;  %v4015_v57 = vld [vmem:[%s7601_s3 + $0x50] sm:$0xff] }
 0x1e5   :  { %3980 = vmatprep.subr.bf16.mxu0 %v5648_v39  ;;  %v4016_v39 = vld [vmem:[%s7601_s3 + $0x58] sm:$0xff] }
 0x1e7   :  { %3653 = vmatpush1.bf16.msra.mxu1 %v5643_v59  ;;  %v4826_v59 = vpack.c.bf16 %v4016_v39, %v4015_v57 }
 0x1e8   :  { %3981 = vmatpush1.bf16.msra.mxu0 %v5646_v60  ;;  %3654 = vmatprep.subr.bf16.mxu1 %v5651_v61  ;;  %v4033_v60 = vld [vmem:[%s7601_s3 + $0xe0] sm:$0xff]  ;;  %v4034_v61 = vld [vmem:[%s7601_s3 + $0xe8] sm:$0xff] }
 0x1e9   :  { %3982 = vmatprep.subr.bf16.mxu0 %v5654_v0  ;;  %v4828_v0 = vpack.c.bf16 %v4034_v61, %v4033_v60 }
 0x1eb   :  { %3655 = vmatpush1.bf16.msra.mxu1 %v5649_v1  ;;  %v4017_v1 = vld [vmem:[%s7601_s3 + $0x60] sm:$0xff] }
 0x1ec   :  { %3983 = vmatpush1.bf16.msra.mxu0 %v5652_v43  ;;  %3656 = vmatprep.subr.bf16.mxu1 %v5657_v44  ;;  %v4018_v43 = vld [vmem:[%s7601_s3 + $0x68] sm:$0xff] }
 0x1ed   :  { %3984 = vmatprep.subr.bf16.mxu0 %v5660_v2  ;;  %v4830_v44 = vpack.c.bf16 %v4018_v43, %v4017_v1  ;;  %v4035_v2 = vld [vmem:[%s7601_s3 + $0xf0] sm:$0xff] }
 0x1ef   :  { %3657 = vmatpush1.bf16.msra.mxu1 %v5655_v40  ;;  %v4036_v40 = vld [vmem:[%s7601_s3 + $0xf8] sm:$0xff] }
 0x1f0   :  { %3985 = vmatpush1.bf16.msra.mxu0 %v5658_v4  ;;  %3658 = vmatprep.subr.bf16.mxu1 %v5663_v5  ;;  %v4832_v4 = vpack.c.bf16 %v4036_v40, %v4035_v2  ;;  %v4019_v5 = vld [vmem:[%s7601_s3 + $0x70] sm:$0xff] }
 0x1f1   :  { %3986 = vmatprep.subr.bf16.mxu0 %v5666_v58  ;;  %v4020_v58 = vld [vmem:[%s7601_s3 + $0x78] sm:$0xff] }
 0x1f3   :  { %3659 = vmatpush1.bf16.msra.mxu1 %v5661_v38  ;;  %v4834_v38 = vpack.c.bf16 %v4020_v58, %v4019_v5 }
 0x1f4   :  { %3987 = vmatpush1.bf16.msra.mxu0 %v5664_v6  ;;  %3660 = vmatprep.subr.bf16.mxu1 %v5669_v7  ;;  %v4115_v6 = vld [vmem:[%s7603_s5] sm:$0xff]  ;;  %v4116_v7 = vld [vmem:[%s7603_s5 + $0x8] sm:$0xff] }
 0x1f5   :  { %3988 = vmatprep.subr.bf16.mxu0 %v5672_v8  ;;  %v4117_v8 = vld [vmem:[%s7603_s5 + $0x10] sm:$0xff] }
 0x1f7   :  { %3661 = vmatpush1.bf16.msra.mxu1 %v5667_v9  ;;  %v5714_v9 = vmov 0.0|0.0  }
 0x1f8   :  { %3989 = vmatpush1.bf16.msra.mxu0 %v5670_v10  ;;  %3662 = vmatprep.subr.bf16.mxu1 %v5675_v11  ;;  %v4837_v10 = vpack.c.bf16 %v4116_v7, %v4115_v6  ;;  %v4118_v11 = vld [vmem:[%s7603_s5 + $0x18] sm:$0xff] }
 0x1f9   :  { %3990 = vmatprep.subr.bf16.mxu0 %v5678_v12  ;;  %v4840_v12 = vpack.c.bf16 %v4118_v11, %v4117_v8 }
 0x1fb   :  { %3663 = vmatpush1.bf16.msra.mxu1 %v5673_v62  ;;  %v547_v62 = vsub.s32 0, %v5875_v42 }
 0x1fc   :  { %3991 = vmatpush1.bf16.msra.mxu0 %v5676_v14  ;;  %3664 = vmatprep.subr.bf16.mxu1 %v5681_v15  ;;  %v543_v14 = vld [vmem:[%s7600_s2] sm:$0x3]  ;;  %v551_v15 = vsub.s32 1, %v5875_v42 }
 0x1fd   :  { %3992 = vmatprep.subr.bf16.mxu0 %v5684_v20  ;;  %v548_v20 = vrot.slane %v543_v14, %v547_v62  ;;  %v4119_v42 = vld [vmem:[%s7603_s5 + $0x20] sm:$0xff] }
 0x1fe   :  { %v552_v21 = vrot.slane %v543_v14, %v551_v15  ;;  %v4843_v19 = vpack.c.bf16 %v4120_v18, %v4119_v42 }
 0x1ff   :  { %3665 = vmatpush1.bf16.msra.mxu1 %v5679_v49 }
 0x200   :  { %3993 = vmatpush1.bf16.msra.mxu0 %v5682_v3  ;;  %4836 = vmatprep.subr.bf16.mxu1 %v5714_v9 }
 0x201   :  { %4805 = vmatprep.subr.bf16.mxu0 %v4804_v22 }
 0x202   :  { %3667 = vmatmul.mubr.bf16.vlgmr.msra.gmra.mrb[0].mxu1 %v654_v25 }
 0x203   :  { %3995 = vmatmul.mubr.bf16.vlgmr.msra.gmra.mrb[0].mxu0 %v752_v26  ;;  %4838 = vmatpush3.bf16.msra.mxu1 %v4837_v10 }
 0x204   :  { %4807 = vmatpush3.bf16.msra.mxu0 %v4806_v27  ;;  %4839 = vmatprep.subr.bf16.mxu1 %v5714_v9 }
 0x205   :  { %4809 = vmatprep.subr.bf16.mxu0 %v4808_v28  ;;  %4801 = vmatprep.mubr.msk.f32.mxu1 %vm5715_vm0, %v5716_v34 }
 0x207   :  { %4841 = vmatpush3.bf16.msra.mxu1 %v4840_v12 }
 0x208   :  { %4811 = vmatpush3.bf16.msra.mxu0 %v4810_v31  ;;  %4842 = vmatprep.subr.bf16.mxu1 %v5714_v9  ;;  %v4121_v31 = vld [vmem:[%s7603_s5 + $0x30] sm:$0xff] }
 0x209   :  { %4813 = vmatprep.subr.bf16.mxu0 %v4812_v32  ;;  %v4122_v32 = vld [vmem:[%s7603_s5 + $0x38] sm:$0xff]  ;;  %s4218_s5 = sshll.u32 %s5717_s4, 4  ;;  %s4219_s5 = int_to_ptr.vmem [resolvable:$true] %s4218_s5 }
 0x20a   :  { %v4846_v33 = vpack.c.bf16 %v4122_v32, %v4121_v31  ;;  %s5689_s8 = scalar_lea.vmem %s4219_s5, 32  ;;  %p5694_p1 = scmp.lt.s32.totalorder %s4219_s5, %s4219_s5 }
 0x20b   :  { %4844 = vmatpush3.bf16.msra.mxu1 %v4843_v19  ;;  %p5690_p0 = scmp.ne.s32.totalorder %s4219_s5, %s5689_s8  ;;  %p5695_p2 = scmp.lt.s32.totalorder %s5689_s8, %s5689_s8 }
 0x20c   :  { %4815 = vmatpush3.bf16.msra.mxu0 %v4814_v37  ;;  %4845 = vmatprep.subr.bf16.mxu1 %v5714_v9 }
 0x20d   :  { %4817 = vmatprep.subr.bf16.mxu0 %v4816_v56  ;;  %p5696_p3 = por %p5695_p2, %p5694_p1 }
 0x20f   :  { %4847 = vmatpush3.bf16.msra.mxu1 %v4846_v33  ;;  %p5697_p4 = pnand %p5696_p3, %p5690_p0 }
 0x210   :  { %4819 = vmatpush3.bf16.msra.mxu0 %v4818_v35 }
 0x211   :  { %4821 = vmatprep.subr.bf16.mxu0 %v4820_v47 }
 0x214   :  { %4823 = vmatpush3.bf16.msra.mxu0 %v4822_v54 }
 0x215   :  { %4825 = vmatprep.subr.bf16.mxu0 %v4824_v55 }
 0x218   :  { %4827 = vmatpush3.bf16.msra.mxu0 %v4826_v59 }
 0x219   :  { %4829 = vmatprep.subr.bf16.mxu0 %v4828_v0 }
 0x21c   :  { %4831 = vmatpush3.bf16.msra.mxu0 %v4830_v44 }
 0x21d   :  { %4833 = vmatprep.subr.bf16.mxu0 %v4832_v4 }
 0x220   :  { %4835 = vmatpush3.bf16.msra.mxu0 %v4834_v38 }
 0x2d5   :  { %v3668_v41 = vpop.f32.mrb[0].mxu1 }
 0x2d6   :  { %v3996_v49 = vpop.f32.mrb[0].mxu0  ;;  %v4848_v3 = vadd.f32 %v3668_v41, %v548_v20  ;;  %v3670_v22 = vpop.f32.mrb[1].mxu1 }
 0x2d7   :  { %v3998_v52 = vpop.f32.mrb[1].mxu0  ;;  %v4850_v24 = vadd.f32 %v3670_v22, %v552_v21  ;;  %v3672_v63 = vpop.f32.mrb[2].mxu1 }
 0x2d8   :  { %v4000_v13 = vpop.f32.mrb[2].mxu0  ;;  %v4849_v25 = vadd.f32 %v4848_v3, %v3996_v49  ;;  %v3673_v26 = vpop.f32.mrb[3].mxu1 }
 0x2d9   :  { %v4001_v27 = vpop.f32.mrb[3].mxu0  ;;  %v4851_v28 = vadd.f32 %v4850_v24, %v3998_v52 }
 0x2da   :  { %v4003_v30 = vmax.f32 %v4849_v25, 0.0 }
 0x2db   :  { %v4004_v29 = vmax.f32 %v4851_v28, 0.0 }
 0x2dd   :  { %4108 = vmatprep.mubr.f32.mxu0 %v4004_v29 }
 0x2de   :  { %4109 = vmatmul.mubr.f32.vlgmr.msra.gmra.mrb[4].mxu0 %v4003_v30 }
 0x3b1   :  { %v4773_v16 = vpop.f32.mrb[4].mxu0 }
 0x3b2   :  { %v4774_v37 = vpop.f32.mrb[5].mxu0 }
 0x3b3   :  { %v4775_v56 = vadd.f32 %v4774_v37, %v4773_v16 }
 0x3b5   :  { %v4111_v23 = vadd.f32 %v4775_v56, %v4738_v36 }
 0x3b7   :  { %v4114_v45 = vmax.f32 %v4111_v23, 0.0 }
 0x3b9   :  { %4802 = vmatmul.mubr.msk.f32.vlgmr.msra.gmra.mrb[4].mxu1 %vm4130_vm1, %v4114_v45 }
 0x48c   :  { %v4200_v17 = vpop.f32.mrb[4].mxu1 }
 0x48d   :  { %v4201_v35 = vadd.f32 %v4739_v46, %v4200_v17  ;;  %v4803_v47 = vpop.f32.mrb[5].mxu1 }
 0x48f   :  { %v4204_v48 = vsub.f32 0.0, %v4201_v35 }
 0x491   :  { %v4205_v50 = vmul.f32 1.442695, %v4204_v48 }
 0x493   :  { %5685 = vpow2.f32 %v4205_v50 }
 0x49d   :  { %v5686_v51 = vpop.eup %5685 }
 0x49e   :  { %v4207_v53 = vadd.f32 1.0, %v5686_v51 }
 0x4a0   :  { %5687 = vrcp.f32 %v4207_v53 }
 0x4aa   :  { %v5688_v54 = vpop.eup %5687 }
 0x4ab   :  { %4211 = vst.msk [vmem:[#allocation2] sm:$0x3] %vm4210_vm2, %v5688_v54 }
 0x4ac   :  { %5700 = shalt.err (!%p5697_p4)
}
 0x4ad   :  { %s5701_s10 = scalar_lea.hbm %s7605_s7, 32 }
 0x4ae   :  { %p5702_p5 = scmp.ne.s32.totalorder %s7605_s7, %s5701_s10  ;;  %p5705_p6 = scmp.lt.u32.totalorder %s5701_s10, %s7605_s7 }
 0x4b0   :  { %p5707_p7 = pnand %p5705_p6, %p5702_p5 }
 0x4b2   :  { %5710 = shalt.err (!%p5707_p7)
}
 0x4b3   :  { %4221 = dma.vmem_to_hbm [thread:$0]  %s4219_s5, 32, %s7605_s7, [#allocation3]  }
 0x4b4   :  { %5711 = dma.done.wait [#allocation3], 32  }
 0x4b5   :  { %5712 = vsyncadd [#allocation3], 4294967264 }
 0x4b6   :  { %4225 = vsyncpa [#allocation3], 1 }

</bundles_post_ra>
